<compile_context>
chip_gen: v6e
topology: v6e:2x2x1
jax: 0.10.0
libtpu: 0.0.40
codegen_flags: <defaults>
</compile_context>

<pallas_src>
import numpy as np
import jax
import jax.numpy as jnp
from jax.experimental import pallas as pl
from jax.experimental.pallas import tpu as pltpu

# ---------------------------------------------------------------------------
# Model configuration (synthetic, scaled down)
# ---------------------------------------------------------------------------
IMG = 32                  # input image is IMG x IMG
C_STEM = 8                # stem width
EMBED = 16                # trunk output channels == attnpool embed dim
PLANES = 8                # bottleneck inner width
HEADS = 4
HEAD_DIM = EMBED // HEADS
HEAD_SCALE = 1.0 / float(np.sqrt(HEAD_DIM))
OUT_DIM = 512             # attnpool output dim == text feature dim (ref hardcodes 512)
BLOCK = 7                 # sliding-window size used by the reference
HF = WF = 8               # final feature-map size (32 /2 conv1 /2 avgpool)
HS = IMG // 2             # stem spatial size (16)
POSITIONS = [(i, j) for i in range(HF - BLOCK + 1) for j in range(WF - BLOCK + 1)]
NPATCH = len(POSITIONS)   # 4 windows
SEQ = BLOCK * BLOCK + 1   # 50 real tokens per window (mean token + 49 patches)
SEQ_PAD = 64              # padded tokens per window (lane aligned)
N_TEXT = 40
NBUCKET = 6
INV_SQRT_OUT = float(1.0 / np.sqrt(OUT_DIM))

# conv tap offsets
OFFS_S1 = [(di - 1, dj - 1) for di in range(3) for dj in range(3)]                  # stride-1 3x3
OFFS_C1 = [(-1 if di == 0 else 0, -1 if dj == 0 else 0)                              # stride-2 conv1
           for di in range(3) for dj in range(3)]                                    # (parity planes)


# ---------------------------------------------------------------------------
# Structural constants (built once on the host with numpy)
# ---------------------------------------------------------------------------
def _tap_masks(h, w, offsets):
    """(9, 1, h*w) validity masks for shifted-by-(dr,dc) conv taps (zero padding)."""
    m = np.zeros((9, 1, h * w), np.float32)
    for k, (dr, dc) in enumerate(offsets):
        for oh in range(h):
            for ow in range(w):
                ih, iw = oh + dr, ow + dc
                if 0 <= ih < h and 0 <= iw < w:
                    m[k, 0, oh * w + ow] = 1.0
    return jnp.asarray(m)


def _pool_t():
    """(HS*HS, HF*WF): 2x2 average pooling, applied on the right of (C, HW)."""
    m = np.zeros((HS * HS, HF * WF), np.float32)
    for oh in range(HF):
        for ow in range(WF):
            for a in range(2):
                for b in range(2):
                    m[(2 * oh + a) * HS + (2 * ow + b), oh * WF + ow] = 0.25
    return jnp.asarray(m)


def _token_gather():
    """(HF*WF, NPATCH*SEQ_PAD): gathers 7x7 window patches into padded token slots
    (slot 0 is the window mean, slots 50..63 stay zero)."""
    g = np.zeros((HF * WF, NPATCH * SEQ_PAD), np.float32)
    for p, (i, j) in enumerate(POSITIONS):
        base = p * SEQ_PAD
        for a in range(BLOCK):
            for b in range(BLOCK):
                q = (i + a) * WF + (j + b)
                g[q, base + 1 + a * BLOCK + b] = 1.0
                g[q, base] += 1.0 / (BLOCK * BLOCK)
    return jnp.asarray(g)


def _mean_matrix():
    """(HF*WF, NPATCH): per-window mean of the covered pixels."""
    m = np.zeros((HF * WF, NPATCH), np.float32)
    for p, (i, j) in enumerate(POSITIONS):
        for a in range(BLOCK):
            for b in range(BLOCK):
                m[(i + a) * WF + (j + b), p] += 1.0 / (BLOCK * BLOCK)
    return jnp.asarray(m)


def _cover_t():
    """(NPATCH, HF*WF) 0/1: which window covers which pixel."""
    m = np.zeros((NPATCH, HF * WF), np.float32)
    for p, (i, j) in enumerate(POSITIONS):
        for a in range(BLOCK):
            for b in range(BLOCK):
                m[p, (i + a) * WF + (j + b)] = 1.0
    return jnp.asarray(m)


def _bucket_t():
    """(NBUCKET, N_TEXT) 0/1: text index -> bucket (0..5) one-hot, transposed."""
    m = np.zeros((NBUCKET, N_TEXT), np.float32)
    bounds = (8, 15, 22, 29, 36)
    for k in range(N_TEXT):
        m[sum(k >= t for t in bounds), k] = 1.0
    return jnp.asarray(m)


def _head_indicator():
    """(HEADS, EMBED) 0/1: channel-to-head membership."""
    m = np.zeros((HEADS, EMBED), np.float32)
    for h in range(HEADS):
        m[h, h * HEAD_DIM:(h + 1) * HEAD_DIM] = 1.0
    return jnp.asarray(m)


def _pad_neg():
    """(1, SEQ_PAD): 0 for real keys, -1e30 for padded keys (forces exp -> 0)."""
    m = np.zeros((1, SEQ_PAD), np.float32)
    m[0, SEQ:] = -1e30
    return jnp.asarray(m)


# ---------------------------------------------------------------------------
# Kernel helpers (traced Python, all shapes static)
# ---------------------------------------------------------------------------
def _conv_s1(x, get_w, bias, get_mask, w_dim):
    """3x3 / stride-1 / pad-1 conv on a (Cin, HW) value; returns (Cout, HW).
    Each tap: static lane roll + boundary mask + (Cout,Cin)@(Cin,HW) matmul."""
    acc = None
    for di in range(3):
        for dj in range(3):
            k = di * 3 + dj
            dr, dc = di - 1, dj - 1
            v = x
            off = dr * w_dim + dc
            if off != 0:
                v = jnp.roll(v, -off, axis=1)
            if dr != 0 or dc != 0:
                v = v * get_mask(k)
            t = jnp.dot(get_w(k), v, preferred_element_type=jnp.float32)
            acc = t if acc is None else acc + t
    return acc + bias


# ---------------------------------------------------------------------------
# Fused kernel: backbone + attnpool + text softmax + bucket map (one image/step)
# ---------------------------------------------------------------------------
def _fused_kernel(planes_ref,
                  w1_ref, b1_ref, w2_ref, b2_ref, w3_ref, b3_ref,
                  lw1_ref, lb1_ref, lw2_ref, lb2_ref, lw3_ref, lb3_ref,
                  m1_ref, m16_ref, m8_ref, pool_ref,
                  wq_ref, bq_ref, wk_ref, bk_ref, wv_ref, bv_ref, wo_ref, bo_ref,
                  post_ref, pos0_ref, meanw_ref, gtok_ref, ghead_ref,
                  padneg_ref, covert_ref, bmapt_ref, tn_ref,
                  o_ref):
    f32 = jnp.float32
    relu = lambda v: jnp.maximum(v, 0.0)

    # ---- stem conv1: 3x3 / stride-2 / pad-1 via parity planes (BN folded) ----
    acc = None
    for di in range(3):
        for dj in range(3):
            k = di * 3 + dj
            pi, pj = (di + 1) % 2, (dj + 1) % 2
            dr, dc = (-1 if di == 0 else 0), (-1 if dj == 0 else 0)
            v = planes_ref[0, pi * 2 + pj]                        # (3, 256)
            off = dr * HS + dc
            if off != 0:
                v = jnp.roll(v, -off, axis=1)
            if dr != 0 or dc != 0:
                v = v * m1_ref[k]
            t = jnp.dot(w1_ref[k], v, preferred_element_type=f32)
            acc = t if acc is None else acc + t
    x = relu(acc + b1_ref[...])                                    # (8, 256)

    # ---- stem conv2 / conv3 (stride-1 3x3 on 16x16) + ReLU ----
    x = relu(_conv_s1(x, lambda k: w2_ref[k], b2_ref[...], lambda k: m16_ref[k], HS))
    x = relu(_conv_s1(x, lambda k: w3_ref[k], b3_ref[...], lambda k: m16_ref[k], HS))  # (16, 256)

    # ---- 2x2 average pool -> (16, 64) ----
    x = jnp.dot(x, pool_ref[...], preferred_element_type=f32)

    # ---- layer1..layer4: one bottleneck each (1x1 -> 3x3 -> 1x1 + identity) ----
    for l in range(4):
        y = relu(jnp.dot(lw1_ref[l], x, preferred_element_type=f32) + lb1_ref[l])      # (8, 64)
        y = relu(_conv_s1(y, lambda k, _l=l: lw2_ref[_l, k], lb2_ref[l],
                          lambda k: m8_ref[k], WF))                                    # (8, 64)
        y = jnp.dot(lw3_ref[l], y, preferred_element_type=f32) + lb3_ref[l] + x        # (16, 64)
        x = relu(y)

    # ---- attention pooling over the 4 sliding windows (padded SEQ = 64) ----
    tok = jnp.dot(x, gtok_ref[...], preferred_element_type=f32) + post_ref[...]        # (16, 256)
    kt = jnp.dot(wk_ref[...], tok, preferred_element_type=f32) + bk_ref[...]           # (16, 256)
    vt = jnp.dot(wv_ref[...], tok, preferred_element_type=f32) + bv_ref[...]           # (16, 256)
    qfeat = jnp.dot(x, meanw_ref[...], preferred_element_type=f32) + pos0_ref[...]     # (16, 4)
    qt = jnp.dot(wq_ref[...], qfeat, preferred_element_type=f32) + bq_ref[...]         # (16, 4)

    ghead = ghead_ref[...]                                                             # (4, 16)
    padneg = padneg_ref[...]                                                           # (1, 64)

    rows = []
    for p in range(NPATCH):
        kp = kt[:, p * SEQ_PAD:(p + 1) * SEQ_PAD]                                      # (16, 64)
        vp = vt[:, p * SEQ_PAD:(p + 1) * SEQ_PAD]                                      # (16, 64)
        qp = qt[:, p:p + 1]                                                            # (16, 1)
        sp = jnp.dot(ghead, qp * kp, preferred_element_type=f32) * HEAD_SCALE + padneg  # (4, 64)
        mp = jnp.max(sp, axis=-1, keepdims=True)
        ep = jnp.exp(sp - mp)                                                          # padded -> 0
        ap = ep / jnp.sum(ep, axis=-1, keepdims=True)                                  # (4, 64)
        oph = jax.lax.dot_general(ap, vp, (((1,), (1,)), ((), ())),
                                  preferred_element_type=f32)                          # (4, 16)
        rows.append(jnp.sum(oph * ghead, axis=0, keepdims=True))                       # (1, 16)
    pooled = jnp.concatenate(rows, axis=0)                                             # (4, 16)

    # output projection
    y = jnp.dot(pooled, wo_ref[...], preferred_element_type=f32) + bo_ref[...]         # (4, 512)

    # F.normalize(dim=-1) followed by /= norm (exactly as in the reference)
    n1 = jnp.sqrt(jnp.sum(y * y, axis=-1, keepdims=True))
    y = y / jnp.maximum(n1, 1e-12)
    n2 = jnp.sqrt(jnp.sum(y * y, axis=-1, keepdims=True))
    y = y / n2   # no epsilon (reference quirk)

    # 100 * y @ text_norm^T, softmax, first-argmax over texts
    logits = 100.0 * jax.lax.dot_general(y, tn_ref[...], (((1,), (1,)), ((), ())),
                                         preferred_element_type=f32)                   # (4, 40)
    lmax = jnp.max(logits, axis=-1, keepdims=True)
    ex = jnp.exp(logits - lmax)
    probs = ex / jnp.sum(ex, axis=-1, keepdims=True)

    ids = jax.lax.broadcasted_iota(jnp.int32, (NPATCH, N_TEXT), 1)
    rmax = jnp.max(probs, axis=-1, keepdims=True)
    first = jnp.min(jnp.where(probs == rmax, ids, N_TEXT), axis=-1, keepdims=True)     # (4, 1)
    win = jnp.where(ids == first, 1.0, 0.0)                                            # (4, 40)

    # bucket counts per pixel, first-argmax over buckets, channel-normalised value
    bw = jax.lax.dot_general(bmapt_ref[...], win, (((1,), (1,)), ((), ())),
                             preferred_element_type=f32)                               # (6, 4)
    counts = jnp.dot(bw, covert_ref[...], preferred_element_type=f32)                  # (6, 64)
    bids = jax.lax.broadcasted_iota(jnp.int32, (NBUCKET, HF * WF), 0)
    cmax = jnp.max(counts, axis=0, keepdims=True)
    bidx = jnp.min(jnp.where(counts == cmax, bids, NBUCKET), axis=0, keepdims=True)    # (1, 64)
    o_ref[0] = jnp.where(bidx > 0, INV_SQRT_OUT, 0.0)                                  # (1, 64)


# ---------------------------------------------------------------------------
# pallas_call wrapper
# ---------------------------------------------------------------------------
def _shared_spec(arr):
    nd = arr.ndim
    return pl.BlockSpec(arr.shape, lambda i, _nd=nd: (0,) * _nd)


def _fused_call(planes, tn, p):
    b = planes.shape[0]
    shared = [p['w1'], p['b1'], p['w2'], p['b2'], p['w3'], p['b3'],
              p['lw1'], p['lb1'], p['lw2'], p['lb2'], p['lw3'], p['lb3'],
              p['m1'], p['m16'], p['m8'], p['poolT'],
              p['wq'], p['bq'], p['wk'], p['bk'], p['wv'], p['bv'],
              p['wo'], p['bo'], p['posT'], p['pos0'], p['meanW'],
              p['gtok'], p['ghead'], p['padneg'], p['coverT'], p['bmapT'], tn]
    in_specs = [pl.BlockSpec((1,) + planes.shape[1:], lambda i: (i, 0, 0, 0))]
    in_specs += [_shared_spec(a) for a in shared]
    return pl.pallas_call(
        _fused_kernel,
        out_shape=jax.ShapeDtypeStruct((b, 1, HF * WF), jnp.float32),
        grid=(b,),
        in_specs=in_specs,
        out_specs=pl.BlockSpec((1, 1, HF * WF), lambda i: (i, 0, 0)),
        compiler_params=pltpu.CompilerParams(dimension_semantics=("parallel",)),
    )(planes, *shared)


# ---------------------------------------------------------------------------
# Host glue
# ---------------------------------------------------------------------------
def remoteclip_text_forward(images_nchw, text_features, params):
    bsz = images_nchw.shape[0]
    x = images_nchw.astype(jnp.float32)                                    # (B, 3, 32, 32)

    # stride-2 parity-plane layout for conv1 (pure transpose, no data expansion)
    planes = x.reshape(bsz, 3, HS, 2, HS, 2)                               # (b,c,oh,pi,ow,pj)
    planes = planes.transpose(0, 3, 5, 1, 2, 4).reshape(bsz, 4, 3, HS * HS)

    # text_features /= text_features.norm(dim=-1, keepdim=True)  (image independent)
    tn = text_features.astype(jnp.float32)
    tn = tn / jnp.sqrt(jnp.sum(tn * tn, axis=-1, keepdims=True))

    # one fused kernel: trunk + attnpool + text probs + bucket map
    val = _fused_call(planes, tn, params)                                  # (B, 1, 64)

    # Reference quirk: `result` is re-created inside the per-image loop, so only
    # the LAST image's map survives; all 512 channels hold the same value.
    last = jnp.broadcast_to(val[bsz - 1].reshape(1, HF, WF), (OUT_DIM, HF, WF))
    result = jnp.zeros((bsz, OUT_DIM, HF, WF), jnp.float32).at[bsz - 1].set(last)
    return result


# ---------------------------------------------------------------------------
# Parameter initialisation (deterministic, synthetic; BN folded into conv)
# ---------------------------------------------------------------------------
def init_params(key):
    keys = iter(jax.random.split(key, 128))
    nk = lambda: next(keys)

    def bn_fold(cout):
        gamma = jax.random.uniform(nk(), (cout,), jnp.float32, 0.5, 1.5)
        beta = jax.random.normal(nk(), (cout,), jnp.float32) * 0.1
        mean = jax.random.normal(nk(), (cout,), jnp.float32) * 0.1
        var = jax.random.uniform(nk(), (cout,), jnp.float32, 0.5, 1.5)
        scale = gamma / jnp.sqrt(var + 1e-5)
        shift = beta - mean * scale
        return scale, shift

    def folded_conv9(cout, cin):
        w = jax.random.normal(nk(), (9, cout, cin), jnp.float32) / np.sqrt(9 * cin)
        scale, shift = bn_fold(cout)
        return w * scale[None, :, None], shift.reshape(cout, 1)

    def folded_1x1(cout, cin):
        w = jax.random.normal(nk(), (cout, cin), jnp.float32) / np.sqrt(cin)
        scale, shift = bn_fold(cout)
        return w * scale[:, None], shift.reshape(cout, 1)

    p = {}
    # stem (BN folded)
    p['w1'], p['b1'] = folded_conv9(C_STEM, 3)
    p['w2'], p['b2'] = folded_conv9(C_STEM, C_STEM)
    p['w3'], p['b3'] = folded_conv9(EMBED, C_STEM)
    # layer1..layer4 bottlenecks
    lw1, lb1, lw2, lb2, lw3, lb3 = [], [], [], [], [], []
    for _ in range(4):
        a, ab = folded_1x1(PLANES, EMBED)
        c2, c2b = folded_conv9(PLANES, PLANES)
        c3, c3b = folded_1x1(EMBED, PLANES)
        lw1.append(a); lb1.append(ab)
        lw2.append(c2); lb2.append(c2b)
        lw3.append(c3); lb3.append(c3b)
    p['lw1'] = jnp.stack(lw1); p['lb1'] = jnp.stack(lb1)
    p['lw2'] = jnp.stack(lw2); p['lb2'] = jnp.stack(lb2)
    p['lw3'] = jnp.stack(lw3); p['lb3'] = jnp.stack(lb3)

    # attention pool parameters
    pos_emb = jax.random.normal(nk(), (SEQ, EMBED), jnp.float32) * EMBED ** -0.5
    pos_pad = jnp.zeros((SEQ_PAD, EMBED), jnp.float32).at[:SEQ].set(pos_emb)
    p['posT'] = jnp.tile(pos_pad.T, (1, NPATCH))            # (16, 256)
    p['pos0'] = pos_emb[0].reshape(EMBED, 1)                 # (16, 1)
    for n in ('wq', 'wk', 'wv'):
        p[n] = jax.random.normal(nk(), (EMBED, EMBED), jnp.float32) / np.sqrt(EMBED)
    for n in ('bq', 'bk', 'bv'):
        p[n] = jax.random.normal(nk(), (EMBED, 1), jnp.float32) * 0.01
    p['wo'] = jax.random.normal(nk(), (EMBED, OUT_DIM), jnp.float32) / np.sqrt(EMBED)
    p['bo'] = jax.random.normal(nk(), (1, OUT_DIM), jnp.float32) * 0.01

    # structural constants (all tiny; no multi-MB gather matrices any more)
    p['m1'] = _tap_masks(HS, HS, OFFS_C1)       # (9, 1, 256) conv1 parity-tap masks
    p['m16'] = _tap_masks(HS, HS, OFFS_S1)      # (9, 1, 256) stride-1 16x16 masks
    p['m8'] = _tap_masks(HF, WF, OFFS_S1)       # (9, 1, 64)  stride-1 8x8 masks
    p['poolT'] = _pool_t()                      # (256, 64)
    p['gtok'] = _token_gather()                 # (64, 256)
    p['meanW'] = _mean_matrix()                 # (64, 4)
    p['ghead'] = _head_indicator()              # (4, 16)
    p['padneg'] = _pad_neg()                    # (1, 64)
    p['coverT'] = _cover_t()                    # (4, 64)
    p['bmapT'] = _bucket_t()                    # (6, 40)
    return p


# ---------------------------------------------------------------------------
if __name__ == "__main__":
    key = jax.random.PRNGKey(0)
    kp, ki, kt = jax.random.split(key, 3)
    params = init_params(kp)
    images = jax.random.normal(ki, (2, 3, IMG, IMG), jnp.float32)          # NCHW, like PyTorch
    text_features = jax.random.normal(kt, (N_TEXT, OUT_DIM), jnp.float32)

    fwd = jax.jit(remoteclip_text_forward)
    out = jax.block_until_ready(fwd(images, text_features, params))

    assert out.shape == (2, OUT_DIM, HF, WF), out.shape
    assert bool(jnp.all(jnp.isfinite(out)))
    print("KERNEL_OK")
</pallas_src>

<mosaic_0001>
module attributes {stable_mosaic.version = 11 : i64} {
  func.func @_fused_kernel(%arg0: i32, %arg1: memref<1x4x3x256xf32, #tpu.memory_space<vmem>>, %arg2: memref<9x8x3xf32, #tpu.memory_space<vmem>>, %arg3: memref<8x1xf32, #tpu.memory_space<vmem>>, %arg4: memref<9x8x8xf32, #tpu.memory_space<vmem>>, %arg5: memref<8x1xf32, #tpu.memory_space<vmem>>, %arg6: memref<9x16x8xf32, #tpu.memory_space<vmem>>, %arg7: memref<16x1xf32, #tpu.memory_space<vmem>>, %arg8: memref<4x8x16xf32, #tpu.memory_space<vmem>>, %arg9: memref<4x8x1xf32, #tpu.memory_space<vmem>>, %arg10: memref<4x9x8x8xf32, #tpu.memory_space<vmem>>, %arg11: memref<4x8x1xf32, #tpu.memory_space<vmem>>, %arg12: memref<4x16x8xf32, #tpu.memory_space<vmem>>, %arg13: memref<4x16x1xf32, #tpu.memory_space<vmem>>, %arg14: memref<9x1x256xf32, #tpu.memory_space<vmem>>, %arg15: memref<9x1x256xf32, #tpu.memory_space<vmem>>, %arg16: memref<9x1x64xf32, #tpu.memory_space<vmem>>, %arg17: memref<256x64xf32, #tpu.memory_space<vmem>>, %arg18: memref<16x16xf32, #tpu.memory_space<vmem>>, %arg19: memref<16x1xf32, #tpu.memory_space<vmem>>, %arg20: memref<16x16xf32, #tpu.memory_space<vmem>>, %arg21: memref<16x1xf32, #tpu.memory_space<vmem>>, %arg22: memref<16x16xf32, #tpu.memory_space<vmem>>, %arg23: memref<16x1xf32, #tpu.memory_space<vmem>>, %arg24: memref<16x512xf32, #tpu.memory_space<vmem>>, %arg25: memref<1x512xf32, #tpu.memory_space<vmem>>, %arg26: memref<16x256xf32, #tpu.memory_space<vmem>>, %arg27: memref<16x1xf32, #tpu.memory_space<vmem>>, %arg28: memref<64x4xf32, #tpu.memory_space<vmem>>, %arg29: memref<64x256xf32, #tpu.memory_space<vmem>>, %arg30: memref<4x16xf32, #tpu.memory_space<vmem>>, %arg31: memref<1x64xf32, #tpu.memory_space<vmem>>, %arg32: memref<4x64xf32, #tpu.memory_space<vmem>>, %arg33: memref<6x40xf32, #tpu.memory_space<vmem>>, %arg34: memref<40x512xf32, #tpu.memory_space<vmem>>, %arg35: memref<1x1x64xf32, #tpu.memory_space<vmem>>) attributes {dimension_semantics = [#tpu.dimension_semantics<parallel>], iteration_bounds = array<i64: 2>, scalar_prefetch = 0 : i64, scratch_operands = 0 : i64, tpu.core_type = #tpu.core_type<tc>, window_params = [{transform_indices = @transform_0, window_bounds = array<i64: 1, 4, 3, 256>}, {pipeline_mode = #tpu.pipeline_mode<synchronous>, transform_indices = @transform_1, window_bounds = array<i64: 9, 8, 3>}, {pipeline_mode = #tpu.pipeline_mode<synchronous>, transform_indices = @transform_2, window_bounds = array<i64: 8, 1>}, {pipeline_mode = #tpu.pipeline_mode<synchronous>, transform_indices = @transform_3, window_bounds = array<i64: 9, 8, 8>}, {pipeline_mode = #tpu.pipeline_mode<synchronous>, transform_indices = @transform_4, window_bounds = array<i64: 8, 1>}, {pipeline_mode = #tpu.pipeline_mode<synchronous>, transform_indices = @transform_5, window_bounds = array<i64: 9, 16, 8>}, {pipeline_mode = #tpu.pipeline_mode<synchronous>, transform_indices = @transform_6, window_bounds = array<i64: 16, 1>}, {pipeline_mode = #tpu.pipeline_mode<synchronous>, transform_indices = @transform_7, window_bounds = array<i64: 4, 8, 16>}, {pipeline_mode = #tpu.pipeline_mode<synchronous>, transform_indices = @transform_8, window_bounds = array<i64: 4, 8, 1>}, {pipeline_mode = #tpu.pipeline_mode<synchronous>, transform_indices = @transform_9, window_bounds = array<i64: 4, 9, 8, 8>}, {pipeline_mode = #tpu.pipeline_mode<synchronous>, transform_indices = @transform_10, window_bounds = array<i64: 4, 8, 1>}, {pipeline_mode = #tpu.pipeline_mode<synchronous>, transform_indices = @transform_11, window_bounds = array<i64: 4, 16, 8>}, {pipeline_mode = #tpu.pipeline_mode<synchronous>, transform_indices = @transform_12, window_bounds = array<i64: 4, 16, 1>}, {pipeline_mode = #tpu.pipeline_mode<synchronous>, transform_indices = @transform_13, window_bounds = array<i64: 9, 1, 256>}, {pipeline_mode = #tpu.pipeline_mode<synchronous>, transform_indices = @transform_14, window_bounds = array<i64: 9, 1, 256>}, {pipeline_mode = #tpu.pipeline_mode<synchronous>, transform_indices = @transform_15, window_bounds = array<i64: 9, 1, 64>}, {pipeline_mode = #tpu.pipeline_mode<synchronous>, transform_indices = @transform_16, window_bounds = array<i64: 256, 64>}, {pipeline_mode = #tpu.pipeline_mode<synchronous>, transform_indices = @transform_17, window_bounds = array<i64: 16, 16>}, {pipeline_mode = #tpu.pipeline_mode<synchronous>, transform_indices = @transform_18, window_bounds = array<i64: 16, 1>}, {pipeline_mode = #tpu.pipeline_mode<synchronous>, transform_indices = @transform_19, window_bounds = array<i64: 16, 16>}, {pipeline_mode = #tpu.pipeline_mode<synchronous>, transform_indices = @transform_20, window_bounds = array<i64: 16, 1>}, {pipeline_mode = #tpu.pipeline_mode<synchronous>, transform_indices = @transform_21, window_bounds = array<i64: 16, 16>}, {pipeline_mode = #tpu.pipeline_mode<synchronous>, transform_indices = @transform_22, window_bounds = array<i64: 16, 1>}, {pipeline_mode = #tpu.pipeline_mode<synchronous>, transform_indices = @transform_23, window_bounds = array<i64: 16, 512>}, {pipeline_mode = #tpu.pipeline_mode<synchronous>, transform_indices = @transform_24, window_bounds = array<i64: 1, 512>}, {pipeline_mode = #tpu.pipeline_mode<synchronous>, transform_indices = @transform_25, window_bounds = array<i64: 16, 256>}, {pipeline_mode = #tpu.pipeline_mode<synchronous>, transform_indices = @transform_26, window_bounds = array<i64: 16, 1>}, {pipeline_mode = #tpu.pipeline_mode<synchronous>, transform_indices = @transform_27, window_bounds = array<i64: 64, 4>}, {pipeline_mode = #tpu.pipeline_mode<synchronous>, transform_indices = @transform_28, window_bounds = array<i64: 64, 256>}, {pipeline_mode = #tpu.pipeline_mode<synchronous>, transform_indices = @transform_29, window_bounds = array<i64: 4, 16>}, {pipeline_mode = #tpu.pipeline_mode<synchronous>, transform_indices = @transform_30, window_bounds = array<i64: 1, 64>}, {pipeline_mode = #tpu.pipeline_mode<synchronous>, transform_indices = @transform_31, window_bounds = array<i64: 4, 64>}, {pipeline_mode = #tpu.pipeline_mode<synchronous>, transform_indices = @transform_32, window_bounds = array<i64: 6, 40>}, {pipeline_mode = #tpu.pipeline_mode<synchronous>, transform_indices = @transform_33, window_bounds = array<i64: 40, 512>}, {transform_indices = @transform_34, window_bounds = array<i64: 1, 1, 64>}]} {
    %c0 = arith.constant 0 : index
    %c3 = arith.constant 3 : index
    %c0_0 = arith.constant 0 : index
    %c0_1 = arith.constant 0 : index
    %0 = vector.load %arg1[%c0, %c3, %c0_0, %c0_1] : memref<1x4x3x256xf32, #tpu.memory_space<vmem>>, vector<1x1x3x256xf32>
    %1 = vector.shape_cast %0 : vector<1x1x3x256xf32> to vector<3x256xf32>
    %2 = vector.extract_strided_slice %1 {offsets = [0, 239], sizes = [3, 17], strides = [1, 1]} : vector<3x256xf32> to vector<3x17xf32>
    %3 = vector.extract_strided_slice %1 {offsets = [0, 0], sizes = [3, 239], strides = [1, 1]} : vector<3x256xf32> to vector<3x239xf32>
    %4 = tpu.concatenate %2, %3 in 1 : vector<3x17xf32>, vector<3x239xf32> -> vector<3x256xf32>
    %c0_2 = arith.constant 0 : index
    %c0_3 = arith.constant 0 : index
    %c0_4 = arith.constant 0 : index
    %5 = vector.load %arg14[%c0_2, %c0_3, %c0_4] : memref<9x1x256xf32, #tpu.memory_space<vmem>>, vector<1x1x256xf32>
    %6 = vector.shape_cast %5 : vector<1x1x256xf32> to vector<1x256xf32>
    %7 = vector.broadcast %6 : vector<1x256xf32> to vector<3x256xf32>
    %8 = arith.mulf %4, %7 : vector<3x256xf32>
    %c0_5 = arith.constant 0 : index
    %c0_6 = arith.constant 0 : index
    %c0_7 = arith.constant 0 : index
    %9 = vector.load %arg2[%c0_5, %c0_6, %c0_7] : memref<9x8x3xf32, #tpu.memory_space<vmem>>, vector<1x8x3xf32>
    %10 = vector.shape_cast %9 : vector<1x8x3xf32> to vector<8x3xf32>
    %cst = arith.constant dense<0.000000e+00> : vector<8x256xf32>
    %11 = tpu.matmul %10, %8, %cst {dimension_numbers = #tpu.dot_dimension_numbers<[1], [0], [0], [1], [0, 0, 1, 1], [], []>} : vector<8x3xf32>, vector<3x256xf32>, vector<8x256xf32> -> vector<8x256xf32>
    %c0_8 = arith.constant 0 : index
    %c2 = arith.constant 2 : index
    %c0_9 = arith.constant 0 : index
    %c0_10 = arith.constant 0 : index
    %12 = vector.load %arg1[%c0_8, %c2, %c0_9, %c0_10] : memref<1x4x3x256xf32, #tpu.memory_space<vmem>>, vector<1x1x3x256xf32>
    %13 = vector.shape_cast %12 : vector<1x1x3x256xf32> to vector<3x256xf32>
    %14 = vector.extract_strided_slice %13 {offsets = [0, 240], sizes = [3, 16], strides = [1, 1]} : vector<3x256xf32> to vector<3x16xf32>
    %15 = vector.extract_strided_slice %13 {offsets = [0, 0], sizes = [3, 240], strides = [1, 1]} : vector<3x256xf32> to vector<3x240xf32>
    %16 = tpu.concatenate %14, %15 in 1 : vector<3x16xf32>, vector<3x240xf32> -> vector<3x256xf32>
    %c1 = arith.constant 1 : index
    %c0_11 = arith.constant 0 : index
    %c0_12 = arith.constant 0 : index
    %17 = vector.load %arg14[%c1, %c0_11, %c0_12] : memref<9x1x256xf32, #tpu.memory_space<vmem>>, vector<1x1x256xf32>
    %18 = vector.shape_cast %17 : vector<1x1x256xf32> to vector<1x256xf32>
    %19 = vector.broadcast %18 : vector<1x256xf32> to vector<3x256xf32>
    %20 = arith.mulf %16, %19 : vector<3x256xf32>
    %c1_13 = arith.constant 1 : index
    %c0_14 = arith.constant 0 : index
    %c0_15 = arith.constant 0 : index
    %21 = vector.load %arg2[%c1_13, %c0_14, %c0_15] : memref<9x8x3xf32, #tpu.memory_space<vmem>>, vector<1x8x3xf32>
    %22 = vector.shape_cast %21 : vector<1x8x3xf32> to vector<8x3xf32>
    %cst_16 = arith.constant dense<0.000000e+00> : vector<8x256xf32>
    %23 = tpu.matmul %22, %20, %cst_16 {dimension_numbers = #tpu.dot_dimension_numbers<[1], [0], [0], [1], [0, 0, 1, 1], [], []>} : vector<8x3xf32>, vector<3x256xf32>, vector<8x256xf32> -> vector<8x256xf32>
    %24 = arith.addf %11, %23 : vector<8x256xf32>
    %c0_17 = arith.constant 0 : index
    %c3_18 = arith.constant 3 : index
    %c0_19 = arith.constant 0 : index
    %c0_20 = arith.constant 0 : index
    %25 = vector.load %arg1[%c0_17, %c3_18, %c0_19, %c0_20] : memref<1x4x3x256xf32, #tpu.memory_space<vmem>>, vector<1x1x3x256xf32>
    %26 = vector.shape_cast %25 : vector<1x1x3x256xf32> to vector<3x256xf32>
    %27 = vector.extract_strided_slice %26 {offsets = [0, 240], sizes = [3, 16], strides = [1, 1]} : vector<3x256xf32> to vector<3x16xf32>
    %28 = vector.extract_strided_slice %26 {offsets = [0, 0], sizes = [3, 240], strides = [1, 1]} : vector<3x256xf32> to vector<3x240xf32>
    %29 = tpu.concatenate %27, %28 in 1 : vector<3x16xf32>, vector<3x240xf32> -> vector<3x256xf32>
    %c2_21 = arith.constant 2 : index
    %c0_22 = arith.constant 0 : index
    %c0_23 = arith.constant 0 : index
    %30 = vector.load %arg14[%c2_21, %c0_22, %c0_23] : memref<9x1x256xf32, #tpu.memory_space<vmem>>, vector<1x1x256xf32>
    %31 = vector.shape_cast %30 : vector<1x1x256xf32> to vector<1x256xf32>
    %32 = vector.broadcast %31 : vector<1x256xf32> to vector<3x256xf32>
    %33 = arith.mulf %29, %32 : vector<3x256xf32>
    %c2_24 = arith.constant 2 : index
    %c0_25 = arith.constant 0 : index
    %c0_26 = arith.constant 0 : index
    %34 = vector.load %arg2[%c2_24, %c0_25, %c0_26] : memref<9x8x3xf32, #tpu.memory_space<vmem>>, vector<1x8x3xf32>
    %35 = vector.shape_cast %34 : vector<1x8x3xf32> to vector<8x3xf32>
    %cst_27 = arith.constant dense<0.000000e+00> : vector<8x256xf32>
    %36 = tpu.matmul %35, %33, %cst_27 {dimension_numbers = #tpu.dot_dimension_numbers<[1], [0], [0], [1], [0, 0, 1, 1], [], []>} : vector<8x3xf32>, vector<3x256xf32>, vector<8x256xf32> -> vector<8x256xf32>
    %37 = arith.addf %24, %36 : vector<8x256xf32>
    %c0_28 = arith.constant 0 : index
    %c1_29 = arith.constant 1 : index
    %c0_30 = arith.constant 0 : index
    %c0_31 = arith.constant 0 : index
    %38 = vector.load %arg1[%c0_28, %c1_29, %c0_30, %c0_31] : memref<1x4x3x256xf32, #tpu.memory_space<vmem>>, vector<1x1x3x256xf32>
    %39 = vector.shape_cast %38 : vector<1x1x3x256xf32> to vector<3x256xf32>
    %40 = vector.extract_strided_slice %39 {offsets = [0, 255], sizes = [3, 1], strides = [1, 1]} : vector<3x256xf32> to vector<3x1xf32>
    %41 = vector.extract_strided_slice %39 {offsets = [0, 0], sizes = [3, 255], strides = [1, 1]} : vector<3x256xf32> to vector<3x255xf32>
    %42 = tpu.concatenate %40, %41 in 1 : vector<3x1xf32>, vector<3x255xf32> -> vector<3x256xf32>
    %c3_32 = arith.constant 3 : index
    %c0_33 = arith.constant 0 : index
    %c0_34 = arith.constant 0 : index
    %43 = vector.load %arg14[%c3_32, %c0_33, %c0_34] : memref<9x1x256xf32, #tpu.memory_space<vmem>>, vector<1x1x256xf32>
    %44 = vector.shape_cast %43 : vector<1x1x256xf32> to vector<1x256xf32>
    %45 = vector.broadcast %44 : vector<1x256xf32> to vector<3x256xf32>
    %46 = arith.mulf %42, %45 : vector<3x256xf32>
    %c3_35 = arith.constant 3 : index
    %c0_36 = arith.constant 0 : index
    %c0_37 = arith.constant 0 : index
    %47 = vector.load %arg2[%c3_35, %c0_36, %c0_37] : memref<9x8x3xf32, #tpu.memory_space<vmem>>, vector<1x8x3xf32>
    %48 = vector.shape_cast %47 : vector<1x8x3xf32> to vector<8x3xf32>
    %cst_38 = arith.constant dense<0.000000e+00> : vector<8x256xf32>
    %49 = tpu.matmul %48, %46, %cst_38 {dimension_numbers = #tpu.dot_dimension_numbers<[1], [0], [0], [1], [0, 0, 1, 1], [], []>} : vector<8x3xf32>, vector<3x256xf32>, vector<8x256xf32> -> vector<8x256xf32>
    %50 = arith.addf %37, %49 : vector<8x256xf32>
    %c0_39 = arith.constant 0 : index
    %c0_40 = arith.constant 0 : index
    %c0_41 = arith.constant 0 : index
    %c0_42 = arith.constant 0 : index
    %51 = vector.load %arg1[%c0_39, %c0_40, %c0_41, %c0_42] : memref<1x4x3x256xf32, #tpu.memory_space<vmem>>, vector<1x1x3x256xf32>
    %52 = vector.shape_cast %51 : vector<1x1x3x256xf32> to vector<3x256xf32>
    %c4 = arith.constant 4 : index
    %c0_43 = arith.constant 0 : index
    %c0_44 = arith.constant 0 : index
    %53 = vector.load %arg2[%c4, %c0_43, %c0_44] : memref<9x8x3xf32, #tpu.memory_space<vmem>>, vector<1x8x3xf32>
    %54 = vector.shape_cast %53 : vector<1x8x3xf32> to vector<8x3xf32>
    %cst_45 = arith.constant dense<0.000000e+00> : vector<8x256xf32>
    %55 = tpu.matmul %54, %52, %cst_45 {dimension_numbers = #tpu.dot_dimension_numbers<[1], [0], [0], [1], [0, 0, 1, 1], [], []>} : vector<8x3xf32>, vector<3x256xf32>, vector<8x256xf32> -> vector<8x256xf32>
    %56 = arith.addf %50, %55 : vector<8x256xf32>
    %c0_46 = arith.constant 0 : index
    %c1_47 = arith.constant 1 : index
    %c0_48 = arith.constant 0 : index
    %c0_49 = arith.constant 0 : index
    %57 = vector.load %arg1[%c0_46, %c1_47, %c0_48, %c0_49] : memref<1x4x3x256xf32, #tpu.memory_space<vmem>>, vector<1x1x3x256xf32>
    %58 = vector.shape_cast %57 : vector<1x1x3x256xf32> to vector<3x256xf32>
    %c5 = arith.constant 5 : index
    %c0_50 = arith.constant 0 : index
    %c0_51 = arith.constant 0 : index
    %59 = vector.load %arg2[%c5, %c0_50, %c0_51] : memref<9x8x3xf32, #tpu.memory_space<vmem>>, vector<1x8x3xf32>
    %60 = vector.shape_cast %59 : vector<1x8x3xf32> to vector<8x3xf32>
    %cst_52 = arith.constant dense<0.000000e+00> : vector<8x256xf32>
    %61 = tpu.matmul %60, %58, %cst_52 {dimension_numbers = #tpu.dot_dimension_numbers<[1], [0], [0], [1], [0, 0, 1, 1], [], []>} : vector<8x3xf32>, vector<3x256xf32>, vector<8x256xf32> -> vector<8x256xf32>
    %62 = arith.addf %56, %61 : vector<8x256xf32>
    %c0_53 = arith.constant 0 : index
    %c3_54 = arith.constant 3 : index
    %c0_55 = arith.constant 0 : index
    %c0_56 = arith.constant 0 : index
    %63 = vector.load %arg1[%c0_53, %c3_54, %c0_55, %c0_56] : memref<1x4x3x256xf32, #tpu.memory_space<vmem>>, vector<1x1x3x256xf32>
    %64 = vector.shape_cast %63 : vector<1x1x3x256xf32> to vector<3x256xf32>
    %65 = vector.extract_strided_slice %64 {offsets = [0, 255], sizes = [3, 1], strides = [1, 1]} : vector<3x256xf32> to vector<3x1xf32>
    %66 = vector.extract_strided_slice %64 {offsets = [0, 0], sizes = [3, 255], strides = [1, 1]} : vector<3x256xf32> to vector<3x255xf32>
    %67 = tpu.concatenate %65, %66 in 1 : vector<3x1xf32>, vector<3x255xf32> -> vector<3x256xf32>
    %c6 = arith.constant 6 : index
    %c0_57 = arith.constant 0 : index
    %c0_58 = arith.constant 0 : index
    %68 = vector.load %arg14[%c6, %c0_57, %c0_58] : memref<9x1x256xf32, #tpu.memory_space<vmem>>, vector<1x1x256xf32>
    %69 = vector.shape_cast %68 : vector<1x1x256xf32> to vector<1x256xf32>
    %70 = vector.broadcast %69 : vector<1x256xf32> to vector<3x256xf32>
    %71 = arith.mulf %67, %70 : vector<3x256xf32>
    %c6_59 = arith.constant 6 : index
    %c0_60 = arith.constant 0 : index
    %c0_61 = arith.constant 0 : index
    %72 = vector.load %arg2[%c6_59, %c0_60, %c0_61] : memref<9x8x3xf32, #tpu.memory_space<vmem>>, vector<1x8x3xf32>
    %73 = vector.shape_cast %72 : vector<1x8x3xf32> to vector<8x3xf32>
    %cst_62 = arith.constant dense<0.000000e+00> : vector<8x256xf32>
    %74 = tpu.matmul %73, %71, %cst_62 {dimension_numbers = #tpu.dot_dimension_numbers<[1], [0], [0], [1], [0, 0, 1, 1], [], []>} : vector<8x3xf32>, vector<3x256xf32>, vector<8x256xf32> -> vector<8x256xf32>
    %75 = arith.addf %62, %74 : vector<8x256xf32>
    %c0_63 = arith.constant 0 : index
    %c2_64 = arith.constant 2 : index
    %c0_65 = arith.constant 0 : index
    %c0_66 = arith.constant 0 : index
    %76 = vector.load %arg1[%c0_63, %c2_64, %c0_65, %c0_66] : memref<1x4x3x256xf32, #tpu.memory_space<vmem>>, vector<1x1x3x256xf32>
    %77 = vector.shape_cast %76 : vector<1x1x3x256xf32> to vector<3x256xf32>
    %c7 = arith.constant 7 : index
    %c0_67 = arith.constant 0 : index
    %c0_68 = arith.constant 0 : index
    %78 = vector.load %arg2[%c7, %c0_67, %c0_68] : memref<9x8x3xf32, #tpu.memory_space<vmem>>, vector<1x8x3xf32>
    %79 = vector.shape_cast %78 : vector<1x8x3xf32> to vector<8x3xf32>
    %cst_69 = arith.constant dense<0.000000e+00> : vector<8x256xf32>
    %80 = tpu.matmul %79, %77, %cst_69 {dimension_numbers = #tpu.dot_dimension_numbers<[1], [0], [0], [1], [0, 0, 1, 1], [], []>} : vector<8x3xf32>, vector<3x256xf32>, vector<8x256xf32> -> vector<8x256xf32>
    %81 = arith.addf %75, %80 : vector<8x256xf32>
    %c0_70 = arith.constant 0 : index
    %c3_71 = arith.constant 3 : index
    %c0_72 = arith.constant 0 : index
    %c0_73 = arith.constant 0 : index
    %82 = vector.load %arg1[%c0_70, %c3_71, %c0_72, %c0_73] : memref<1x4x3x256xf32, #tpu.memory_space<vmem>>, vector<1x1x3x256xf32>
    %83 = vector.shape_cast %82 : vector<1x1x3x256xf32> to vector<3x256xf32>
    %c8 = arith.constant 8 : index
    %c0_74 = arith.constant 0 : index
    %c0_75 = arith.constant 0 : index
    %84 = vector.load %arg2[%c8, %c0_74, %c0_75] : memref<9x8x3xf32, #tpu.memory_space<vmem>>, vector<1x8x3xf32>
    %85 = vector.shape_cast %84 : vector<1x8x3xf32> to vector<8x3xf32>
    %cst_76 = arith.constant dense<0.000000e+00> : vector<8x256xf32>
    %86 = tpu.matmul %85, %83, %cst_76 {dimension_numbers = #tpu.dot_dimension_numbers<[1], [0], [0], [1], [0, 0, 1, 1], [], []>} : vector<8x3xf32>, vector<3x256xf32>, vector<8x256xf32> -> vector<8x256xf32>
    %87 = arith.addf %81, %86 : vector<8x256xf32>
    %c0_77 = arith.constant 0 : index
    %c0_78 = arith.constant 0 : index
    %88 = vector.load %arg3[%c0_77, %c0_78] : memref<8x1xf32, #tpu.memory_space<vmem>>, vector<8x1xf32>
    %89 = vector.broadcast %88 : vector<8x1xf32> to vector<8x256xf32>
    %90 = arith.addf %87, %89 : vector<8x256xf32>
    %cst_79 = arith.constant 0.000000e+00 : f32
    %91 = vector.broadcast %cst_79 : f32 to vector<8x256xf32>
    %92 = arith.maximumf %90, %91 : vector<8x256xf32>
    %c0_80 = arith.constant 0 : index
    %c0_81 = arith.constant 0 : index
    %93 = vector.load %arg5[%c0_80, %c0_81] : memref<8x1xf32, #tpu.memory_space<vmem>>, vector<8x1xf32>
    %94 = vector.extract_strided_slice %92 {offsets = [0, 239], sizes = [8, 17], strides = [1, 1]} : vector<8x256xf32> to vector<8x17xf32>
    %95 = vector.extract_strided_slice %92 {offsets = [0, 0], sizes = [8, 239], strides = [1, 1]} : vector<8x256xf32> to vector<8x239xf32>
    %96 = tpu.concatenate %94, %95 in 1 : vector<8x17xf32>, vector<8x239xf32> -> vector<8x256xf32>
    %c0_82 = arith.constant 0 : index
    %c0_83 = arith.constant 0 : index
    %c0_84 = arith.constant 0 : index
    %97 = vector.load %arg15[%c0_82, %c0_83, %c0_84] : memref<9x1x256xf32, #tpu.memory_space<vmem>>, vector<1x1x256xf32>
    %98 = vector.shape_cast %97 : vector<1x1x256xf32> to vector<1x256xf32>
    %99 = vector.broadcast %98 : vector<1x256xf32> to vector<8x256xf32>
    %100 = arith.mulf %96, %99 : vector<8x256xf32>
    %c0_85 = arith.constant 0 : index
    %c0_86 = arith.constant 0 : index
    %c0_87 = arith.constant 0 : index
    %101 = vector.load %arg4[%c0_85, %c0_86, %c0_87] : memref<9x8x8xf32, #tpu.memory_space<vmem>>, vector<1x8x8xf32>
    %102 = vector.shape_cast %101 : vector<1x8x8xf32> to vector<8x8xf32>
    %cst_88 = arith.constant dense<0.000000e+00> : vector<8x256xf32>
    %103 = tpu.matmul %102, %100, %cst_88 {dimension_numbers = #tpu.dot_dimension_numbers<[1], [0], [0], [1], [0, 0, 1, 1], [], []>} : vector<8x8xf32>, vector<8x256xf32>, vector<8x256xf32> -> vector<8x256xf32>
    %104 = vector.extract_strided_slice %92 {offsets = [0, 240], sizes = [8, 16], strides = [1, 1]} : vector<8x256xf32> to vector<8x16xf32>
    %105 = vector.extract_strided_slice %92 {offsets = [0, 0], sizes = [8, 240], strides = [1, 1]} : vector<8x256xf32> to vector<8x240xf32>
    %106 = tpu.concatenate %104, %105 in 1 : vector<8x16xf32>, vector<8x240xf32> -> vector<8x256xf32>
    %c1_89 = arith.constant 1 : index
    %c0_90 = arith.constant 0 : index
    %c0_91 = arith.constant 0 : index
    %107 = vector.load %arg15[%c1_89, %c0_90, %c0_91] : memref<9x1x256xf32, #tpu.memory_space<vmem>>, vector<1x1x256xf32>
    %108 = vector.shape_cast %107 : vector<1x1x256xf32> to vector<1x256xf32>
    %109 = vector.broadcast %108 : vector<1x256xf32> to vector<8x256xf32>
    %110 = arith.mulf %106, %109 : vector<8x256xf32>
    %c1_92 = arith.constant 1 : index
    %c0_93 = arith.constant 0 : index
    %c0_94 = arith.constant 0 : index
    %111 = vector.load %arg4[%c1_92, %c0_93, %c0_94] : memref<9x8x8xf32, #tpu.memory_space<vmem>>, vector<1x8x8xf32>
    %112 = vector.shape_cast %111 : vector<1x8x8xf32> to vector<8x8xf32>
    %cst_95 = arith.constant dense<0.000000e+00> : vector<8x256xf32>
    %113 = tpu.matmul %112, %110, %cst_95 {dimension_numbers = #tpu.dot_dimension_numbers<[1], [0], [0], [1], [0, 0, 1, 1], [], []>} : vector<8x8xf32>, vector<8x256xf32>, vector<8x256xf32> -> vector<8x256xf32>
    %114 = arith.addf %103, %113 : vector<8x256xf32>
    %115 = vector.extract_strided_slice %92 {offsets = [0, 241], sizes = [8, 15], strides = [1, 1]} : vector<8x256xf32> to vector<8x15xf32>
    %116 = vector.extract_strided_slice %92 {offsets = [0, 0], sizes = [8, 241], strides = [1, 1]} : vector<8x256xf32> to vector<8x241xf32>
    %117 = tpu.concatenate %115, %116 in 1 : vector<8x15xf32>, vector<8x241xf32> -> vector<8x256xf32>
    %c2_96 = arith.constant 2 : index
    %c0_97 = arith.constant 0 : index
    %c0_98 = arith.constant 0 : index
    %118 = vector.load %arg15[%c2_96, %c0_97, %c0_98] : memref<9x1x256xf32, #tpu.memory_space<vmem>>, vector<1x1x256xf32>
    %119 = vector.shape_cast %118 : vector<1x1x256xf32> to vector<1x256xf32>
    %120 = vector.broadcast %119 : vector<1x256xf32> to vector<8x256xf32>
    %121 = arith.mulf %117, %120 : vector<8x256xf32>
    %c2_99 = arith.constant 2 : index
    %c0_100 = arith.constant 0 : index
    %c0_101 = arith.constant 0 : index
    %122 = vector.load %arg4[%c2_99, %c0_100, %c0_101] : memref<9x8x8xf32, #tpu.memory_space<vmem>>, vector<1x8x8xf32>
    %123 = vector.shape_cast %122 : vector<1x8x8xf32> to vector<8x8xf32>
    %cst_102 = arith.constant dense<0.000000e+00> : vector<8x256xf32>
    %124 = tpu.matmul %123, %121, %cst_102 {dimension_numbers = #tpu.dot_dimension_numbers<[1], [0], [0], [1], [0, 0, 1, 1], [], []>} : vector<8x8xf32>, vector<8x256xf32>, vector<8x256xf32> -> vector<8x256xf32>
    %125 = arith.addf %114, %124 : vector<8x256xf32>
    %126 = vector.extract_strided_slice %92 {offsets = [0, 255], sizes = [8, 1], strides = [1, 1]} : vector<8x256xf32> to vector<8x1xf32>
    %127 = vector.extract_strided_slice %92 {offsets = [0, 0], sizes = [8, 255], strides = [1, 1]} : vector<8x256xf32> to vector<8x255xf32>
    %128 = tpu.concatenate %126, %127 in 1 : vector<8x1xf32>, vector<8x255xf32> -> vector<8x256xf32>
    %c3_103 = arith.constant 3 : index
    %c0_104 = arith.constant 0 : index
    %c0_105 = arith.constant 0 : index
    %129 = vector.load %arg15[%c3_103, %c0_104, %c0_105] : memref<9x1x256xf32, #tpu.memory_space<vmem>>, vector<1x1x256xf32>
    %130 = vector.shape_cast %129 : vector<1x1x256xf32> to vector<1x256xf32>
    %131 = vector.broadcast %130 : vector<1x256xf32> to vector<8x256xf32>
    %132 = arith.mulf %128, %131 : vector<8x256xf32>
    %c3_106 = arith.constant 3 : index
    %c0_107 = arith.constant 0 : index
    %c0_108 = arith.constant 0 : index
    %133 = vector.load %arg4[%c3_106, %c0_107, %c0_108] : memref<9x8x8xf32, #tpu.memory_space<vmem>>, vector<1x8x8xf32>
    %134 = vector.shape_cast %133 : vector<1x8x8xf32> to vector<8x8xf32>
    %cst_109 = arith.constant dense<0.000000e+00> : vector<8x256xf32>
    %135 = tpu.matmul %134, %132, %cst_109 {dimension_numbers = #tpu.dot_dimension_numbers<[1], [0], [0], [1], [0, 0, 1, 1], [], []>} : vector<8x8xf32>, vector<8x256xf32>, vector<8x256xf32> -> vector<8x256xf32>
    %136 = arith.addf %125, %135 : vector<8x256xf32>
    %c4_110 = arith.constant 4 : index
    %c0_111 = arith.constant 0 : index
    %c0_112 = arith.constant 0 : index
    %137 = vector.load %arg4[%c4_110, %c0_111, %c0_112] : memref<9x8x8xf32, #tpu.memory_space<vmem>>, vector<1x8x8xf32>
    %138 = vector.shape_cast %137 : vector<1x8x8xf32> to vector<8x8xf32>
    %cst_113 = arith.constant dense<0.000000e+00> : vector<8x256xf32>
    %139 = tpu.matmul %138, %92, %cst_113 {dimension_numbers = #tpu.dot_dimension_numbers<[1], [0], [0], [1], [0, 0, 1, 1], [], []>} : vector<8x8xf32>, vector<8x256xf32>, vector<8x256xf32> -> vector<8x256xf32>
    %140 = arith.addf %136, %139 : vector<8x256xf32>
    %141 = vector.extract_strided_slice %92 {offsets = [0, 1], sizes = [8, 255], strides = [1, 1]} : vector<8x256xf32> to vector<8x255xf32>
    %142 = vector.extract_strided_slice %92 {offsets = [0, 0], sizes = [8, 1], strides = [1, 1]} : vector<8x256xf32> to vector<8x1xf32>
    %143 = tpu.concatenate %141, %142 in 1 : vector<8x255xf32>, vector<8x1xf32> -> vector<8x256xf32>
    %c5_114 = arith.constant 5 : index
    %c0_115 = arith.constant 0 : index
    %c0_116 = arith.constant 0 : index
    %144 = vector.load %arg15[%c5_114, %c0_115, %c0_116] : memref<9x1x256xf32, #tpu.memory_space<vmem>>, vector<1x1x256xf32>
    %145 = vector.shape_cast %144 : vector<1x1x256xf32> to vector<1x256xf32>
    %146 = vector.broadcast %145 : vector<1x256xf32> to vector<8x256xf32>
    %147 = arith.mulf %143, %146 : vector<8x256xf32>
    %c5_117 = arith.constant 5 : index
    %c0_118 = arith.constant 0 : index
    %c0_119 = arith.constant 0 : index
    %148 = vector.load %arg4[%c5_117, %c0_118, %c0_119] : memref<9x8x8xf32, #tpu.memory_space<vmem>>, vector<1x8x8xf32>
    %149 = vector.shape_cast %148 : vector<1x8x8xf32> to vector<8x8xf32>
    %cst_120 = arith.constant dense<0.000000e+00> : vector<8x256xf32>
    %150 = tpu.matmul %149, %147, %cst_120 {dimension_numbers = #tpu.dot_dimension_numbers<[1], [0], [0], [1], [0, 0, 1, 1], [], []>} : vector<8x8xf32>, vector<8x256xf32>, vector<8x256xf32> -> vector<8x256xf32>
    %151 = arith.addf %140, %150 : vector<8x256xf32>
    %152 = vector.extract_strided_slice %92 {offsets = [0, 15], sizes = [8, 241], strides = [1, 1]} : vector<8x256xf32> to vector<8x241xf32>
    %153 = vector.extract_strided_slice %92 {offsets = [0, 0], sizes = [8, 15], strides = [1, 1]} : vector<8x256xf32> to vector<8x15xf32>
    %154 = tpu.concatenate %152, %153 in 1 : vector<8x241xf32>, vector<8x15xf32> -> vector<8x256xf32>
    %c6_121 = arith.constant 6 : index
    %c0_122 = arith.constant 0 : index
    %c0_123 = arith.constant 0 : index
    %155 = vector.load %arg15[%c6_121, %c0_122, %c0_123] : memref<9x1x256xf32, #tpu.memory_space<vmem>>, vector<1x1x256xf32>
    %156 = vector.shape_cast %155 : vector<1x1x256xf32> to vector<1x256xf32>
    %157 = vector.broadcast %156 : vector<1x256xf32> to vector<8x256xf32>
    %158 = arith.mulf %154, %157 : vector<8x256xf32>
    %c6_124 = arith.constant 6 : index
    %c0_125 = arith.constant 0 : index
    %c0_126 = arith.constant 0 : index
    %159 = vector.load %arg4[%c6_124, %c0_125, %c0_126] : memref<9x8x8xf32, #tpu.memory_space<vmem>>, vector<1x8x8xf32>
    %160 = vector.shape_cast %159 : vector<1x8x8xf32> to vector<8x8xf32>
    %cst_127 = arith.constant dense<0.000000e+00> : vector<8x256xf32>
    %161 = tpu.matmul %160, %158, %cst_127 {dimension_numbers = #tpu.dot_dimension_numbers<[1], [0], [0], [1], [0, 0, 1, 1], [], []>} : vector<8x8xf32>, vector<8x256xf32>, vector<8x256xf32> -> vector<8x256xf32>
    %162 = arith.addf %151, %161 : vector<8x256xf32>
    %163 = vector.extract_strided_slice %92 {offsets = [0, 16], sizes = [8, 240], strides = [1, 1]} : vector<8x256xf32> to vector<8x240xf32>
    %164 = vector.extract_strided_slice %92 {offsets = [0, 0], sizes = [8, 16], strides = [1, 1]} : vector<8x256xf32> to vector<8x16xf32>
    %165 = tpu.concatenate %163, %164 in 1 : vector<8x240xf32>, vector<8x16xf32> -> vector<8x256xf32>
    %c7_128 = arith.constant 7 : index
    %c0_129 = arith.constant 0 : index
    %c0_130 = arith.constant 0 : index
    %166 = vector.load %arg15[%c7_128, %c0_129, %c0_130] : memref<9x1x256xf32, #tpu.memory_space<vmem>>, vector<1x1x256xf32>
    %167 = vector.shape_cast %166 : vector<1x1x256xf32> to vector<1x256xf32>
    %168 = vector.broadcast %167 : vector<1x256xf32> to vector<8x256xf32>
    %169 = arith.mulf %165, %168 : vector<8x256xf32>
    %c7_131 = arith.constant 7 : index
    %c0_132 = arith.constant 0 : index
    %c0_133 = arith.constant 0 : index
    %170 = vector.load %arg4[%c7_131, %c0_132, %c0_133] : memref<9x8x8xf32, #tpu.memory_space<vmem>>, vector<1x8x8xf32>
    %171 = vector.shape_cast %170 : vector<1x8x8xf32> to vector<8x8xf32>
    %cst_134 = arith.constant dense<0.000000e+00> : vector<8x256xf32>
    %172 = tpu.matmul %171, %169, %cst_134 {dimension_numbers = #tpu.dot_dimension_numbers<[1], [0], [0], [1], [0, 0, 1, 1], [], []>} : vector<8x8xf32>, vector<8x256xf32>, vector<8x256xf32> -> vector<8x256xf32>
    %173 = arith.addf %162, %172 : vector<8x256xf32>
    %174 = vector.extract_strided_slice %92 {offsets = [0, 17], sizes = [8, 239], strides = [1, 1]} : vector<8x256xf32> to vector<8x239xf32>
    %175 = vector.extract_strided_slice %92 {offsets = [0, 0], sizes = [8, 17], strides = [1, 1]} : vector<8x256xf32> to vector<8x17xf32>
    %176 = tpu.concatenate %174, %175 in 1 : vector<8x239xf32>, vector<8x17xf32> -> vector<8x256xf32>
    %c8_135 = arith.constant 8 : index
    %c0_136 = arith.constant 0 : index
    %c0_137 = arith.constant 0 : index
    %177 = vector.load %arg15[%c8_135, %c0_136, %c0_137] : memref<9x1x256xf32, #tpu.memory_space<vmem>>, vector<1x1x256xf32>
    %178 = vector.shape_cast %177 : vector<1x1x256xf32> to vector<1x256xf32>
    %179 = vector.broadcast %178 : vector<1x256xf32> to vector<8x256xf32>
    %180 = arith.mulf %176, %179 : vector<8x256xf32>
    %c8_138 = arith.constant 8 : index
    %c0_139 = arith.constant 0 : index
    %c0_140 = arith.constant 0 : index
    %181 = vector.load %arg4[%c8_138, %c0_139, %c0_140] : memref<9x8x8xf32, #tpu.memory_space<vmem>>, vector<1x8x8xf32>
    %182 = vector.shape_cast %181 : vector<1x8x8xf32> to vector<8x8xf32>
    %cst_141 = arith.constant dense<0.000000e+00> : vector<8x256xf32>
    %183 = tpu.matmul %182, %180, %cst_141 {dimension_numbers = #tpu.dot_dimension_numbers<[1], [0], [0], [1], [0, 0, 1, 1], [], []>} : vector<8x8xf32>, vector<8x256xf32>, vector<8x256xf32> -> vector<8x256xf32>
    %184 = arith.addf %173, %183 : vector<8x256xf32>
    %185 = vector.broadcast %93 : vector<8x1xf32> to vector<8x256xf32>
    %186 = arith.addf %184, %185 : vector<8x256xf32>
    %cst_142 = arith.constant 0.000000e+00 : f32
    %187 = vector.broadcast %cst_142 : f32 to vector<8x256xf32>
    %188 = arith.maximumf %186, %187 : vector<8x256xf32>
    %c0_143 = arith.constant 0 : index
    %c0_144 = arith.constant 0 : index
    %189 = vector.load %arg7[%c0_143, %c0_144] : memref<16x1xf32, #tpu.memory_space<vmem>>, vector<16x1xf32>
    %190 = vector.extract_strided_slice %188 {offsets = [0, 239], sizes = [8, 17], strides = [1, 1]} : vector<8x256xf32> to vector<8x17xf32>
    %191 = vector.extract_strided_slice %188 {offsets = [0, 0], sizes = [8, 239], strides = [1, 1]} : vector<8x256xf32> to vector<8x239xf32>
    %192 = tpu.concatenate %190, %191 in 1 : vector<8x17xf32>, vector<8x239xf32> -> vector<8x256xf32>
    %c0_145 = arith.constant 0 : index
    %c0_146 = arith.constant 0 : index
    %c0_147 = arith.constant 0 : index
    %193 = vector.load %arg15[%c0_145, %c0_146, %c0_147] : memref<9x1x256xf32, #tpu.memory_space<vmem>>, vector<1x1x256xf32>
    %194 = vector.shape_cast %193 : vector<1x1x256xf32> to vector<1x256xf32>
    %195 = vector.broadcast %194 : vector<1x256xf32> to vector<8x256xf32>
    %196 = arith.mulf %192, %195 : vector<8x256xf32>
    %c0_148 = arith.constant 0 : index
    %c0_149 = arith.constant 0 : index
    %c0_150 = arith.constant 0 : index
    %197 = vector.load %arg6[%c0_148, %c0_149, %c0_150] : memref<9x16x8xf32, #tpu.memory_space<vmem>>, vector<1x16x8xf32>
    %198 = vector.shape_cast %197 : vector<1x16x8xf32> to vector<16x8xf32>
    %cst_151 = arith.constant dense<0.000000e+00> : vector<16x256xf32>
    %199 = tpu.matmul %198, %196, %cst_151 {dimension_numbers = #tpu.dot_dimension_numbers<[1], [0], [0], [1], [0, 0, 1, 1], [], []>} : vector<16x8xf32>, vector<8x256xf32>, vector<16x256xf32> -> vector<16x256xf32>
    %200 = vector.extract_strided_slice %188 {offsets = [0, 240], sizes = [8, 16], strides = [1, 1]} : vector<8x256xf32> to vector<8x16xf32>
    %201 = vector.extract_strided_slice %188 {offsets = [0, 0], sizes = [8, 240], strides = [1, 1]} : vector<8x256xf32> to vector<8x240xf32>
    %202 = tpu.concatenate %200, %201 in 1 : vector<8x16xf32>, vector<8x240xf32> -> vector<8x256xf32>
    %c1_152 = arith.constant 1 : index
    %c0_153 = arith.constant 0 : index
    %c0_154 = arith.constant 0 : index
    %203 = vector.load %arg15[%c1_152, %c0_153, %c0_154] : memref<9x1x256xf32, #tpu.memory_space<vmem>>, vector<1x1x256xf32>
    %204 = vector.shape_cast %203 : vector<1x1x256xf32> to vector<1x256xf32>
    %205 = vector.broadcast %204 : vector<1x256xf32> to vector<8x256xf32>
    %206 = arith.mulf %202, %205 : vector<8x256xf32>
    %c1_155 = arith.constant 1 : index
    %c0_156 = arith.constant 0 : index
    %c0_157 = arith.constant 0 : index
    %207 = vector.load %arg6[%c1_155, %c0_156, %c0_157] : memref<9x16x8xf32, #tpu.memory_space<vmem>>, vector<1x16x8xf32>
    %208 = vector.shape_cast %207 : vector<1x16x8xf32> to vector<16x8xf32>
    %cst_158 = arith.constant dense<0.000000e+00> : vector<16x256xf32>
    %209 = tpu.matmul %208, %206, %cst_158 {dimension_numbers = #tpu.dot_dimension_numbers<[1], [0], [0], [1], [0, 0, 1, 1], [], []>} : vector<16x8xf32>, vector<8x256xf32>, vector<16x256xf32> -> vector<16x256xf32>
    %210 = arith.addf %199, %209 : vector<16x256xf32>
    %211 = vector.extract_strided_slice %188 {offsets = [0, 241], sizes = [8, 15], strides = [1, 1]} : vector<8x256xf32> to vector<8x15xf32>
    %212 = vector.extract_strided_slice %188 {offsets = [0, 0], sizes = [8, 241], strides = [1, 1]} : vector<8x256xf32> to vector<8x241xf32>
    %213 = tpu.concatenate %211, %212 in 1 : vector<8x15xf32>, vector<8x241xf32> -> vector<8x256xf32>
    %c2_159 = arith.constant 2 : index
    %c0_160 = arith.constant 0 : index
    %c0_161 = arith.constant 0 : index
    %214 = vector.load %arg15[%c2_159, %c0_160, %c0_161] : memref<9x1x256xf32, #tpu.memory_space<vmem>>, vector<1x1x256xf32>
    %215 = vector.shape_cast %214 : vector<1x1x256xf32> to vector<1x256xf32>
    %216 = vector.broadcast %215 : vector<1x256xf32> to vector<8x256xf32>
    %217 = arith.mulf %213, %216 : vector<8x256xf32>
    %c2_162 = arith.constant 2 : index
    %c0_163 = arith.constant 0 : index
    %c0_164 = arith.constant 0 : index
    %218 = vector.load %arg6[%c2_162, %c0_163, %c0_164] : memref<9x16x8xf32, #tpu.memory_space<vmem>>, vector<1x16x8xf32>
    %219 = vector.shape_cast %218 : vector<1x16x8xf32> to vector<16x8xf32>
    %cst_165 = arith.constant dense<0.000000e+00> : vector<16x256xf32>
    %220 = tpu.matmul %219, %217, %cst_165 {dimension_numbers = #tpu.dot_dimension_numbers<[1], [0], [0], [1], [0, 0, 1, 1], [], []>} : vector<16x8xf32>, vector<8x256xf32>, vector<16x256xf32> -> vector<16x256xf32>
    %221 = arith.addf %210, %220 : vector<16x256xf32>
    %222 = vector.extract_strided_slice %188 {offsets = [0, 255], sizes = [8, 1], strides = [1, 1]} : vector<8x256xf32> to vector<8x1xf32>
    %223 = vector.extract_strided_slice %188 {offsets = [0, 0], sizes = [8, 255], strides = [1, 1]} : vector<8x256xf32> to vector<8x255xf32>
    %224 = tpu.concatenate %222, %223 in 1 : vector<8x1xf32>, vector<8x255xf32> -> vector<8x256xf32>
    %c3_166 = arith.constant 3 : index
    %c0_167 = arith.constant 0 : index
    %c0_168 = arith.constant 0 : index
    %225 = vector.load %arg15[%c3_166, %c0_167, %c0_168] : memref<9x1x256xf32, #tpu.memory_space<vmem>>, vector<1x1x256xf32>
    %226 = vector.shape_cast %225 : vector<1x1x256xf32> to vector<1x256xf32>
    %227 = vector.broadcast %226 : vector<1x256xf32> to vector<8x256xf32>
    %228 = arith.mulf %224, %227 : vector<8x256xf32>
    %c3_169 = arith.constant 3 : index
    %c0_170 = arith.constant 0 : index
    %c0_171 = arith.constant 0 : index
    %229 = vector.load %arg6[%c3_169, %c0_170, %c0_171] : memref<9x16x8xf32, #tpu.memory_space<vmem>>, vector<1x16x8xf32>
    %230 = vector.shape_cast %229 : vector<1x16x8xf32> to vector<16x8xf32>
    %cst_172 = arith.constant dense<0.000000e+00> : vector<16x256xf32>
    %231 = tpu.matmul %230, %228, %cst_172 {dimension_numbers = #tpu.dot_dimension_numbers<[1], [0], [0], [1], [0, 0, 1, 1], [], []>} : vector<16x8xf32>, vector<8x256xf32>, vector<16x256xf32> -> vector<16x256xf32>
    %232 = arith.addf %221, %231 : vector<16x256xf32>
    %c4_173 = arith.constant 4 : index
    %c0_174 = arith.constant 0 : index
    %c0_175 = arith.constant 0 : index
    %233 = vector.load %arg6[%c4_173, %c0_174, %c0_175] : memref<9x16x8xf32, #tpu.memory_space<vmem>>, vector<1x16x8xf32>
    %234 = vector.shape_cast %233 : vector<1x16x8xf32> to vector<16x8xf32>
    %cst_176 = arith.constant dense<0.000000e+00> : vector<16x256xf32>
    %235 = tpu.matmul %234, %188, %cst_176 {dimension_numbers = #tpu.dot_dimension_numbers<[1], [0], [0], [1], [0, 0, 1, 1], [], []>} : vector<16x8xf32>, vector<8x256xf32>, vector<16x256xf32> -> vector<16x256xf32>
    %236 = arith.addf %232, %235 : vector<16x256xf32>
    %237 = vector.extract_strided_slice %188 {offsets = [0, 1], sizes = [8, 255], strides = [1, 1]} : vector<8x256xf32> to vector<8x255xf32>
    %238 = vector.extract_strided_slice %188 {offsets = [0, 0], sizes = [8, 1], strides = [1, 1]} : vector<8x256xf32> to vector<8x1xf32>
    %239 = tpu.concatenate %237, %238 in 1 : vector<8x255xf32>, vector<8x1xf32> -> vector<8x256xf32>
    %c5_177 = arith.constant 5 : index
    %c0_178 = arith.constant 0 : index
    %c0_179 = arith.constant 0 : index
    %240 = vector.load %arg15[%c5_177, %c0_178, %c0_179] : memref<9x1x256xf32, #tpu.memory_space<vmem>>, vector<1x1x256xf32>
    %241 = vector.shape_cast %240 : vector<1x1x256xf32> to vector<1x256xf32>
    %242 = vector.broadcast %241 : vector<1x256xf32> to vector<8x256xf32>
    %243 = arith.mulf %239, %242 : vector<8x256xf32>
    %c5_180 = arith.constant 5 : index
    %c0_181 = arith.constant 0 : index
    %c0_182 = arith.constant 0 : index
    %244 = vector.load %arg6[%c5_180, %c0_181, %c0_182] : memref<9x16x8xf32, #tpu.memory_space<vmem>>, vector<1x16x8xf32>
    %245 = vector.shape_cast %244 : vector<1x16x8xf32> to vector<16x8xf32>
    %cst_183 = arith.constant dense<0.000000e+00> : vector<16x256xf32>
    %246 = tpu.matmul %245, %243, %cst_183 {dimension_numbers = #tpu.dot_dimension_numbers<[1], [0], [0], [1], [0, 0, 1, 1], [], []>} : vector<16x8xf32>, vector<8x256xf32>, vector<16x256xf32> -> vector<16x256xf32>
    %247 = arith.addf %236, %246 : vector<16x256xf32>
    %248 = vector.extract_strided_slice %188 {offsets = [0, 15], sizes = [8, 241], strides = [1, 1]} : vector<8x256xf32> to vector<8x241xf32>
    %249 = vector.extract_strided_slice %188 {offsets = [0, 0], sizes = [8, 15], strides = [1, 1]} : vector<8x256xf32> to vector<8x15xf32>
    %250 = tpu.concatenate %248, %249 in 1 : vector<8x241xf32>, vector<8x15xf32> -> vector<8x256xf32>
    %c6_184 = arith.constant 6 : index
    %c0_185 = arith.constant 0 : index
    %c0_186 = arith.constant 0 : index
    %251 = vector.load %arg15[%c6_184, %c0_185, %c0_186] : memref<9x1x256xf32, #tpu.memory_space<vmem>>, vector<1x1x256xf32>
    %252 = vector.shape_cast %251 : vector<1x1x256xf32> to vector<1x256xf32>
    %253 = vector.broadcast %252 : vector<1x256xf32> to vector<8x256xf32>
    %254 = arith.mulf %250, %253 : vector<8x256xf32>
    %c6_187 = arith.constant 6 : index
    %c0_188 = arith.constant 0 : index
    %c0_189 = arith.constant 0 : index
    %255 = vector.load %arg6[%c6_187, %c0_188, %c0_189] : memref<9x16x8xf32, #tpu.memory_space<vmem>>, vector<1x16x8xf32>
    %256 = vector.shape_cast %255 : vector<1x16x8xf32> to vector<16x8xf32>
    %cst_190 = arith.constant dense<0.000000e+00> : vector<16x256xf32>
    %257 = tpu.matmul %256, %254, %cst_190 {dimension_numbers = #tpu.dot_dimension_numbers<[1], [0], [0], [1], [0, 0, 1, 1], [], []>} : vector<16x8xf32>, vector<8x256xf32>, vector<16x256xf32> -> vector<16x256xf32>
    %258 = arith.addf %247, %257 : vector<16x256xf32>
    %259 = vector.extract_strided_slice %188 {offsets = [0, 16], sizes = [8, 240], strides = [1, 1]} : vector<8x256xf32> to vector<8x240xf32>
    %260 = vector.extract_strided_slice %188 {offsets = [0, 0], sizes = [8, 16], strides = [1, 1]} : vector<8x256xf32> to vector<8x16xf32>
    %261 = tpu.concatenate %259, %260 in 1 : vector<8x240xf32>, vector<8x16xf32> -> vector<8x256xf32>
    %c7_191 = arith.constant 7 : index
    %c0_192 = arith.constant 0 : index
    %c0_193 = arith.constant 0 : index
    %262 = vector.load %arg15[%c7_191, %c0_192, %c0_193] : memref<9x1x256xf32, #tpu.memory_space<vmem>>, vector<1x1x256xf32>
    %263 = vector.shape_cast %262 : vector<1x1x256xf32> to vector<1x256xf32>
    %264 = vector.broadcast %263 : vector<1x256xf32> to vector<8x256xf32>
    %265 = arith.mulf %261, %264 : vector<8x256xf32>
    %c7_194 = arith.constant 7 : index
    %c0_195 = arith.constant 0 : index
    %c0_196 = arith.constant 0 : index
    %266 = vector.load %arg6[%c7_194, %c0_195, %c0_196] : memref<9x16x8xf32, #tpu.memory_space<vmem>>, vector<1x16x8xf32>
    %267 = vector.shape_cast %266 : vector<1x16x8xf32> to vector<16x8xf32>
    %cst_197 = arith.constant dense<0.000000e+00> : vector<16x256xf32>
    %268 = tpu.matmul %267, %265, %cst_197 {dimension_numbers = #tpu.dot_dimension_numbers<[1], [0], [0], [1], [0, 0, 1, 1], [], []>} : vector<16x8xf32>, vector<8x256xf32>, vector<16x256xf32> -> vector<16x256xf32>
    %269 = arith.addf %258, %268 : vector<16x256xf32>
    %270 = vector.extract_strided_slice %188 {offsets = [0, 17], sizes = [8, 239], strides = [1, 1]} : vector<8x256xf32> to vector<8x239xf32>
    %271 = vector.extract_strided_slice %188 {offsets = [0, 0], sizes = [8, 17], strides = [1, 1]} : vector<8x256xf32> to vector<8x17xf32>
    %272 = tpu.concatenate %270, %271 in 1 : vector<8x239xf32>, vector<8x17xf32> -> vector<8x256xf32>
    %c8_198 = arith.constant 8 : index
    %c0_199 = arith.constant 0 : index
    %c0_200 = arith.constant 0 : index
    %273 = vector.load %arg15[%c8_198, %c0_199, %c0_200] : memref<9x1x256xf32, #tpu.memory_space<vmem>>, vector<1x1x256xf32>
    %274 = vector.shape_cast %273 : vector<1x1x256xf32> to vector<1x256xf32>
    %275 = vector.broadcast %274 : vector<1x256xf32> to vector<8x256xf32>
    %276 = arith.mulf %272, %275 : vector<8x256xf32>
    %c8_201 = arith.constant 8 : index
    %c0_202 = arith.constant 0 : index
    %c0_203 = arith.constant 0 : index
    %277 = vector.load %arg6[%c8_201, %c0_202, %c0_203] : memref<9x16x8xf32, #tpu.memory_space<vmem>>, vector<1x16x8xf32>
    %278 = vector.shape_cast %277 : vector<1x16x8xf32> to vector<16x8xf32>
    %cst_204 = arith.constant dense<0.000000e+00> : vector<16x256xf32>
    %279 = tpu.matmul %278, %276, %cst_204 {dimension_numbers = #tpu.dot_dimension_numbers<[1], [0], [0], [1], [0, 0, 1, 1], [], []>} : vector<16x8xf32>, vector<8x256xf32>, vector<16x256xf32> -> vector<16x256xf32>
    %280 = arith.addf %269, %279 : vector<16x256xf32>
    %281 = vector.broadcast %189 : vector<16x1xf32> to vector<16x256xf32>
    %282 = arith.addf %280, %281 : vector<16x256xf32>
    %cst_205 = arith.constant 0.000000e+00 : f32
    %283 = vector.broadcast %cst_205 : f32 to vector<16x256xf32>
    %284 = arith.maximumf %282, %283 : vector<16x256xf32>
    %c0_206 = arith.constant 0 : index
    %c0_207 = arith.constant 0 : index
    %285 = vector.load %arg17[%c0_206, %c0_207] : memref<256x64xf32, #tpu.memory_space<vmem>>, vector<256x64xf32>
    %cst_208 = arith.constant dense<0.000000e+00> : vector<16x64xf32>
    %286 = tpu.matmul %284, %285, %cst_208 {dimension_numbers = #tpu.dot_dimension_numbers<[1], [0], [0], [1], [0, 0, 1, 1], [], []>} : vector<16x256xf32>, vector<256x64xf32>, vector<16x64xf32> -> vector<16x64xf32>
    %c0_209 = arith.constant 0 : index
    %c0_210 = arith.constant 0 : index
    %c0_211 = arith.constant 0 : index
    %287 = vector.load %arg8[%c0_209, %c0_210, %c0_211] : memref<4x8x16xf32, #tpu.memory_space<vmem>>, vector<1x8x16xf32>
    %288 = vector.shape_cast %287 : vector<1x8x16xf32> to vector<8x16xf32>
    %cst_212 = arith.constant dense<0.000000e+00> : vector<8x64xf32>
    %289 = tpu.matmul %288, %286, %cst_212 {dimension_numbers = #tpu.dot_dimension_numbers<[1], [0], [0], [1], [0, 0, 1, 1], [], []>} : vector<8x16xf32>, vector<16x64xf32>, vector<8x64xf32> -> vector<8x64xf32>
    %c0_213 = arith.constant 0 : index
    %c0_214 = arith.constant 0 : index
    %c0_215 = arith.constant 0 : index
    %290 = vector.load %arg9[%c0_213, %c0_214, %c0_215] : memref<4x8x1xf32, #tpu.memory_space<vmem>>, vector<1x8x1xf32>
    %291 = vector.shape_cast %290 : vector<1x8x1xf32> to vector<8x1xf32>
    %292 = vector.broadcast %291 : vector<8x1xf32> to vector<8x64xf32>
    %293 = arith.addf %289, %292 : vector<8x64xf32>
    %cst_216 = arith.constant 0.000000e+00 : f32
    %294 = vector.broadcast %cst_216 : f32 to vector<8x64xf32>
    %295 = arith.maximumf %293, %294 : vector<8x64xf32>
    %c0_217 = arith.constant 0 : index
    %c0_218 = arith.constant 0 : index
    %c0_219 = arith.constant 0 : index
    %296 = vector.load %arg11[%c0_217, %c0_218, %c0_219] : memref<4x8x1xf32, #tpu.memory_space<vmem>>, vector<1x8x1xf32>
    %297 = vector.shape_cast %296 : vector<1x8x1xf32> to vector<8x1xf32>
    %298 = vector.extract_strided_slice %295 {offsets = [0, 55], sizes = [8, 9], strides = [1, 1]} : vector<8x64xf32> to vector<8x9xf32>
    %299 = vector.extract_strided_slice %295 {offsets = [0, 0], sizes = [8, 55], strides = [1, 1]} : vector<8x64xf32> to vector<8x55xf32>
    %300 = tpu.concatenate %298, %299 in 1 : vector<8x9xf32>, vector<8x55xf32> -> vector<8x64xf32>
    %c0_220 = arith.constant 0 : index
    %c0_221 = arith.constant 0 : index
    %c0_222 = arith.constant 0 : index
    %301 = vector.load %arg16[%c0_220, %c0_221, %c0_222] : memref<9x1x64xf32, #tpu.memory_space<vmem>>, vector<1x1x64xf32>
    %302 = vector.shape_cast %301 : vector<1x1x64xf32> to vector<1x64xf32>
    %303 = vector.broadcast %302 : vector<1x64xf32> to vector<8x64xf32>
    %304 = arith.mulf %300, %303 : vector<8x64xf32>
    %c0_223 = arith.constant 0 : index
    %c0_224 = arith.constant 0 : index
    %c0_225 = arith.constant 0 : index
    %c0_226 = arith.constant 0 : index
    %305 = vector.load %arg10[%c0_223, %c0_224, %c0_225, %c0_226] : memref<4x9x8x8xf32, #tpu.memory_space<vmem>>, vector<1x1x8x8xf32>
    %306 = vector.shape_cast %305 : vector<1x1x8x8xf32> to vector<8x8xf32>
    %cst_227 = arith.constant dense<0.000000e+00> : vector<8x64xf32>
    %307 = tpu.matmul %306, %304, %cst_227 {dimension_numbers = #tpu.dot_dimension_numbers<[1], [0], [0], [1], [0, 0, 1, 1], [], []>} : vector<8x8xf32>, vector<8x64xf32>, vector<8x64xf32> -> vector<8x64xf32>
    %308 = vector.extract_strided_slice %295 {offsets = [0, 56], sizes = [8, 8], strides = [1, 1]} : vector<8x64xf32> to vector<8x8xf32>
    %309 = vector.extract_strided_slice %295 {offsets = [0, 0], sizes = [8, 56], strides = [1, 1]} : vector<8x64xf32> to vector<8x56xf32>
    %310 = tpu.concatenate %308, %309 in 1 : vector<8x8xf32>, vector<8x56xf32> -> vector<8x64xf32>
    %c1_228 = arith.constant 1 : index
    %c0_229 = arith.constant 0 : index
    %c0_230 = arith.constant 0 : index
    %311 = vector.load %arg16[%c1_228, %c0_229, %c0_230] : memref<9x1x64xf32, #tpu.memory_space<vmem>>, vector<1x1x64xf32>
    %312 = vector.shape_cast %311 : vector<1x1x64xf32> to vector<1x64xf32>
    %313 = vector.broadcast %312 : vector<1x64xf32> to vector<8x64xf32>
    %314 = arith.mulf %310, %313 : vector<8x64xf32>
    %c0_231 = arith.constant 0 : index
    %c1_232 = arith.constant 1 : index
    %c0_233 = arith.constant 0 : index
    %c0_234 = arith.constant 0 : index
    %315 = vector.load %arg10[%c0_231, %c1_232, %c0_233, %c0_234] : memref<4x9x8x8xf32, #tpu.memory_space<vmem>>, vector<1x1x8x8xf32>
    %316 = vector.shape_cast %315 : vector<1x1x8x8xf32> to vector<8x8xf32>
    %cst_235 = arith.constant dense<0.000000e+00> : vector<8x64xf32>
    %317 = tpu.matmul %316, %314, %cst_235 {dimension_numbers = #tpu.dot_dimension_numbers<[1], [0], [0], [1], [0, 0, 1, 1], [], []>} : vector<8x8xf32>, vector<8x64xf32>, vector<8x64xf32> -> vector<8x64xf32>
    %318 = arith.addf %307, %317 : vector<8x64xf32>
    %319 = vector.extract_strided_slice %295 {offsets = [0, 57], sizes = [8, 7], strides = [1, 1]} : vector<8x64xf32> to vector<8x7xf32>
    %320 = vector.extract_strided_slice %295 {offsets = [0, 0], sizes = [8, 57], strides = [1, 1]} : vector<8x64xf32> to vector<8x57xf32>
    %321 = tpu.concatenate %319, %320 in 1 : vector<8x7xf32>, vector<8x57xf32> -> vector<8x64xf32>
    %c2_236 = arith.constant 2 : index
    %c0_237 = arith.constant 0 : index
    %c0_238 = arith.constant 0 : index
    %322 = vector.load %arg16[%c2_236, %c0_237, %c0_238] : memref<9x1x64xf32, #tpu.memory_space<vmem>>, vector<1x1x64xf32>
    %323 = vector.shape_cast %322 : vector<1x1x64xf32> to vector<1x64xf32>
    %324 = vector.broadcast %323 : vector<1x64xf32> to vector<8x64xf32>
    %325 = arith.mulf %321, %324 : vector<8x64xf32>
    %c0_239 = arith.constant 0 : index
    %c2_240 = arith.constant 2 : index
    %c0_241 = arith.constant 0 : index
    %c0_242 = arith.constant 0 : index
    %326 = vector.load %arg10[%c0_239, %c2_240, %c0_241, %c0_242] : memref<4x9x8x8xf32, #tpu.memory_space<vmem>>, vector<1x1x8x8xf32>
    %327 = vector.shape_cast %326 : vector<1x1x8x8xf32> to vector<8x8xf32>
    %cst_243 = arith.constant dense<0.000000e+00> : vector<8x64xf32>
    %328 = tpu.matmul %327, %325, %cst_243 {dimension_numbers = #tpu.dot_dimension_numbers<[1], [0], [0], [1], [0, 0, 1, 1], [], []>} : vector<8x8xf32>, vector<8x64xf32>, vector<8x64xf32> -> vector<8x64xf32>
    %329 = arith.addf %318, %328 : vector<8x64xf32>
    %330 = vector.extract_strided_slice %295 {offsets = [0, 63], sizes = [8, 1], strides = [1, 1]} : vector<8x64xf32> to vector<8x1xf32>
    %331 = vector.extract_strided_slice %295 {offsets = [0, 0], sizes = [8, 63], strides = [1, 1]} : vector<8x64xf32> to vector<8x63xf32>
    %332 = tpu.concatenate %330, %331 in 1 : vector<8x1xf32>, vector<8x63xf32> -> vector<8x64xf32>
    %c3_244 = arith.constant 3 : index
    %c0_245 = arith.constant 0 : index
    %c0_246 = arith.constant 0 : index
    %333 = vector.load %arg16[%c3_244, %c0_245, %c0_246] : memref<9x1x64xf32, #tpu.memory_space<vmem>>, vector<1x1x64xf32>
    %334 = vector.shape_cast %333 : vector<1x1x64xf32> to vector<1x64xf32>
    %335 = vector.broadcast %334 : vector<1x64xf32> to vector<8x64xf32>
    %336 = arith.mulf %332, %335 : vector<8x64xf32>
    %c0_247 = arith.constant 0 : index
    %c3_248 = arith.constant 3 : index
    %c0_249 = arith.constant 0 : index
    %c0_250 = arith.constant 0 : index
    %337 = vector.load %arg10[%c0_247, %c3_248, %c0_249, %c0_250] : memref<4x9x8x8xf32, #tpu.memory_space<vmem>>, vector<1x1x8x8xf32>
    %338 = vector.shape_cast %337 : vector<1x1x8x8xf32> to vector<8x8xf32>
    %cst_251 = arith.constant dense<0.000000e+00> : vector<8x64xf32>
    %339 = tpu.matmul %338, %336, %cst_251 {dimension_numbers = #tpu.dot_dimension_numbers<[1], [0], [0], [1], [0, 0, 1, 1], [], []>} : vector<8x8xf32>, vector<8x64xf32>, vector<8x64xf32> -> vector<8x64xf32>
    %340 = arith.addf %329, %339 : vector<8x64xf32>
    %c0_252 = arith.constant 0 : index
    %c4_253 = arith.constant 4 : index
    %c0_254 = arith.constant 0 : index
    %c0_255 = arith.constant 0 : index
    %341 = vector.load %arg10[%c0_252, %c4_253, %c0_254, %c0_255] : memref<4x9x8x8xf32, #tpu.memory_space<vmem>>, vector<1x1x8x8xf32>
    %342 = vector.shape_cast %341 : vector<1x1x8x8xf32> to vector<8x8xf32>
    %cst_256 = arith.constant dense<0.000000e+00> : vector<8x64xf32>
    %343 = tpu.matmul %342, %295, %cst_256 {dimension_numbers = #tpu.dot_dimension_numbers<[1], [0], [0], [1], [0, 0, 1, 1], [], []>} : vector<8x8xf32>, vector<8x64xf32>, vector<8x64xf32> -> vector<8x64xf32>
    %344 = arith.addf %340, %343 : vector<8x64xf32>
    %345 = vector.extract_strided_slice %295 {offsets = [0, 1], sizes = [8, 63], strides = [1, 1]} : vector<8x64xf32> to vector<8x63xf32>
    %346 = vector.extract_strided_slice %295 {offsets = [0, 0], sizes = [8, 1], strides = [1, 1]} : vector<8x64xf32> to vector<8x1xf32>
    %347 = tpu.concatenate %345, %346 in 1 : vector<8x63xf32>, vector<8x1xf32> -> vector<8x64xf32>
    %c5_257 = arith.constant 5 : index
    %c0_258 = arith.constant 0 : index
    %c0_259 = arith.constant 0 : index
    %348 = vector.load %arg16[%c5_257, %c0_258, %c0_259] : memref<9x1x64xf32, #tpu.memory_space<vmem>>, vector<1x1x64xf32>
    %349 = vector.shape_cast %348 : vector<1x1x64xf32> to vector<1x64xf32>
    %350 = vector.broadcast %349 : vector<1x64xf32> to vector<8x64xf32>
    %351 = arith.mulf %347, %350 : vector<8x64xf32>
    %c0_260 = arith.constant 0 : index
    %c5_261 = arith.constant 5 : index
    %c0_262 = arith.constant 0 : index
    %c0_263 = arith.constant 0 : index
    %352 = vector.load %arg10[%c0_260, %c5_261, %c0_262, %c0_263] : memref<4x9x8x8xf32, #tpu.memory_space<vmem>>, vector<1x1x8x8xf32>
    %353 = vector.shape_cast %352 : vector<1x1x8x8xf32> to vector<8x8xf32>
    %cst_264 = arith.constant dense<0.000000e+00> : vector<8x64xf32>
    %354 = tpu.matmul %353, %351, %cst_264 {dimension_numbers = #tpu.dot_dimension_numbers<[1], [0], [0], [1], [0, 0, 1, 1], [], []>} : vector<8x8xf32>, vector<8x64xf32>, vector<8x64xf32> -> vector<8x64xf32>
    %355 = arith.addf %344, %354 : vector<8x64xf32>
    %356 = vector.extract_strided_slice %295 {offsets = [0, 7], sizes = [8, 57], strides = [1, 1]} : vector<8x64xf32> to vector<8x57xf32>
    %357 = vector.extract_strided_slice %295 {offsets = [0, 0], sizes = [8, 7], strides = [1, 1]} : vector<8x64xf32> to vector<8x7xf32>
    %358 = tpu.concatenate %356, %357 in 1 : vector<8x57xf32>, vector<8x7xf32> -> vector<8x64xf32>
    %c6_265 = arith.constant 6 : index
    %c0_266 = arith.constant 0 : index
    %c0_267 = arith.constant 0 : index
    %359 = vector.load %arg16[%c6_265, %c0_266, %c0_267] : memref<9x1x64xf32, #tpu.memory_space<vmem>>, vector<1x1x64xf32>
    %360 = vector.shape_cast %359 : vector<1x1x64xf32> to vector<1x64xf32>
    %361 = vector.broadcast %360 : vector<1x64xf32> to vector<8x64xf32>
    %362 = arith.mulf %358, %361 : vector<8x64xf32>
    %c0_268 = arith.constant 0 : index
    %c6_269 = arith.constant 6 : index
    %c0_270 = arith.constant 0 : index
    %c0_271 = arith.constant 0 : index
    %363 = vector.load %arg10[%c0_268, %c6_269, %c0_270, %c0_271] : memref<4x9x8x8xf32, #tpu.memory_space<vmem>>, vector<1x1x8x8xf32>
    %364 = vector.shape_cast %363 : vector<1x1x8x8xf32> to vector<8x8xf32>
    %cst_272 = arith.constant dense<0.000000e+00> : vector<8x64xf32>
    %365 = tpu.matmul %364, %362, %cst_272 {dimension_numbers = #tpu.dot_dimension_numbers<[1], [0], [0], [1], [0, 0, 1, 1], [], []>} : vector<8x8xf32>, vector<8x64xf32>, vector<8x64xf32> -> vector<8x64xf32>
    %366 = arith.addf %355, %365 : vector<8x64xf32>
    %367 = vector.extract_strided_slice %295 {offsets = [0, 8], sizes = [8, 56], strides = [1, 1]} : vector<8x64xf32> to vector<8x56xf32>
    %368 = vector.extract_strided_slice %295 {offsets = [0, 0], sizes = [8, 8], strides = [1, 1]} : vector<8x64xf32> to vector<8x8xf32>
    %369 = tpu.concatenate %367, %368 in 1 : vector<8x56xf32>, vector<8x8xf32> -> vector<8x64xf32>
    %c7_273 = arith.constant 7 : index
    %c0_274 = arith.constant 0 : index
    %c0_275 = arith.constant 0 : index
    %370 = vector.load %arg16[%c7_273, %c0_274, %c0_275] : memref<9x1x64xf32, #tpu.memory_space<vmem>>, vector<1x1x64xf32>
    %371 = vector.shape_cast %370 : vector<1x1x64xf32> to vector<1x64xf32>
    %372 = vector.broadcast %371 : vector<1x64xf32> to vector<8x64xf32>
    %373 = arith.mulf %369, %372 : vector<8x64xf32>
    %c0_276 = arith.constant 0 : index
    %c7_277 = arith.constant 7 : index
    %c0_278 = arith.constant 0 : index
    %c0_279 = arith.constant 0 : index
    %374 = vector.load %arg10[%c0_276, %c7_277, %c0_278, %c0_279] : memref<4x9x8x8xf32, #tpu.memory_space<vmem>>, vector<1x1x8x8xf32>
    %375 = vector.shape_cast %374 : vector<1x1x8x8xf32> to vector<8x8xf32>
    %cst_280 = arith.constant dense<0.000000e+00> : vector<8x64xf32>
    %376 = tpu.matmul %375, %373, %cst_280 {dimension_numbers = #tpu.dot_dimension_numbers<[1], [0], [0], [1], [0, 0, 1, 1], [], []>} : vector<8x8xf32>, vector<8x64xf32>, vector<8x64xf32> -> vector<8x64xf32>
    %377 = arith.addf %366, %376 : vector<8x64xf32>
    %378 = vector.extract_strided_slice %295 {offsets = [0, 9], sizes = [8, 55], strides = [1, 1]} : vector<8x64xf32> to vector<8x55xf32>
    %379 = vector.extract_strided_slice %295 {offsets = [0, 0], sizes = [8, 9], strides = [1, 1]} : vector<8x64xf32> to vector<8x9xf32>
    %380 = tpu.concatenate %378, %379 in 1 : vector<8x55xf32>, vector<8x9xf32> -> vector<8x64xf32>
    %c8_281 = arith.constant 8 : index
    %c0_282 = arith.constant 0 : index
    %c0_283 = arith.constant 0 : index
    %381 = vector.load %arg16[%c8_281, %c0_282, %c0_283] : memref<9x1x64xf32, #tpu.memory_space<vmem>>, vector<1x1x64xf32>
    %382 = vector.shape_cast %381 : vector<1x1x64xf32> to vector<1x64xf32>
    %383 = vector.broadcast %382 : vector<1x64xf32> to vector<8x64xf32>
    %384 = arith.mulf %380, %383 : vector<8x64xf32>
    %c0_284 = arith.constant 0 : index
    %c8_285 = arith.constant 8 : index
    %c0_286 = arith.constant 0 : index
    %c0_287 = arith.constant 0 : index
    %385 = vector.load %arg10[%c0_284, %c8_285, %c0_286, %c0_287] : memref<4x9x8x8xf32, #tpu.memory_space<vmem>>, vector<1x1x8x8xf32>
    %386 = vector.shape_cast %385 : vector<1x1x8x8xf32> to vector<8x8xf32>
    %cst_288 = arith.constant dense<0.000000e+00> : vector<8x64xf32>
    %387 = tpu.matmul %386, %384, %cst_288 {dimension_numbers = #tpu.dot_dimension_numbers<[1], [0], [0], [1], [0, 0, 1, 1], [], []>} : vector<8x8xf32>, vector<8x64xf32>, vector<8x64xf32> -> vector<8x64xf32>
    %388 = arith.addf %377, %387 : vector<8x64xf32>
    %389 = vector.broadcast %297 : vector<8x1xf32> to vector<8x64xf32>
    %390 = arith.addf %388, %389 : vector<8x64xf32>
    %cst_289 = arith.constant 0.000000e+00 : f32
    %391 = vector.broadcast %cst_289 : f32 to vector<8x64xf32>
    %392 = arith.maximumf %390, %391 : vector<8x64xf32>
    %c0_290 = arith.constant 0 : index
    %c0_291 = arith.constant 0 : index
    %c0_292 = arith.constant 0 : index
    %393 = vector.load %arg12[%c0_290, %c0_291, %c0_292] : memref<4x16x8xf32, #tpu.memory_space<vmem>>, vector<1x16x8xf32>
    %394 = vector.shape_cast %393 : vector<1x16x8xf32> to vector<16x8xf32>
    %cst_293 = arith.constant dense<0.000000e+00> : vector<16x64xf32>
    %395 = tpu.matmul %394, %392, %cst_293 {dimension_numbers = #tpu.dot_dimension_numbers<[1], [0], [0], [1], [0, 0, 1, 1], [], []>} : vector<16x8xf32>, vector<8x64xf32>, vector<16x64xf32> -> vector<16x64xf32>
    %c0_294 = arith.constant 0 : index
    %c0_295 = arith.constant 0 : index
    %c0_296 = arith.constant 0 : index
    %396 = vector.load %arg13[%c0_294, %c0_295, %c0_296] : memref<4x16x1xf32, #tpu.memory_space<vmem>>, vector<1x16x1xf32>
    %397 = vector.shape_cast %396 : vector<1x16x1xf32> to vector<16x1xf32>
    %398 = vector.broadcast %397 : vector<16x1xf32> to vector<16x64xf32>
    %399 = arith.addf %395, %398 : vector<16x64xf32>
    %400 = arith.addf %399, %286 : vector<16x64xf32>
    %cst_297 = arith.constant 0.000000e+00 : f32
    %401 = vector.broadcast %cst_297 : f32 to vector<16x64xf32>
    %402 = arith.maximumf %400, %401 : vector<16x64xf32>
    %c1_298 = arith.constant 1 : index
    %c0_299 = arith.constant 0 : index
    %c0_300 = arith.constant 0 : index
    %403 = vector.load %arg8[%c1_298, %c0_299, %c0_300] : memref<4x8x16xf32, #tpu.memory_space<vmem>>, vector<1x8x16xf32>
    %404 = vector.shape_cast %403 : vector<1x8x16xf32> to vector<8x16xf32>
    %cst_301 = arith.constant dense<0.000000e+00> : vector<8x64xf32>
    %405 = tpu.matmul %404, %402, %cst_301 {dimension_numbers = #tpu.dot_dimension_numbers<[1], [0], [0], [1], [0, 0, 1, 1], [], []>} : vector<8x16xf32>, vector<16x64xf32>, vector<8x64xf32> -> vector<8x64xf32>
    %c1_302 = arith.constant 1 : index
    %c0_303 = arith.constant 0 : index
    %c0_304 = arith.constant 0 : index
    %406 = vector.load %arg9[%c1_302, %c0_303, %c0_304] : memref<4x8x1xf32, #tpu.memory_space<vmem>>, vector<1x8x1xf32>
    %407 = vector.shape_cast %406 : vector<1x8x1xf32> to vector<8x1xf32>
    %408 = vector.broadcast %407 : vector<8x1xf32> to vector<8x64xf32>
    %409 = arith.addf %405, %408 : vector<8x64xf32>
    %cst_305 = arith.constant 0.000000e+00 : f32
    %410 = vector.broadcast %cst_305 : f32 to vector<8x64xf32>
    %411 = arith.maximumf %409, %410 : vector<8x64xf32>
    %c1_306 = arith.constant 1 : index
    %c0_307 = arith.constant 0 : index
    %c0_308 = arith.constant 0 : index
    %412 = vector.load %arg11[%c1_306, %c0_307, %c0_308] : memref<4x8x1xf32, #tpu.memory_space<vmem>>, vector<1x8x1xf32>
    %413 = vector.shape_cast %412 : vector<1x8x1xf32> to vector<8x1xf32>
    %414 = vector.extract_strided_slice %411 {offsets = [0, 55], sizes = [8, 9], strides = [1, 1]} : vector<8x64xf32> to vector<8x9xf32>
    %415 = vector.extract_strided_slice %411 {offsets = [0, 0], sizes = [8, 55], strides = [1, 1]} : vector<8x64xf32> to vector<8x55xf32>
    %416 = tpu.concatenate %414, %415 in 1 : vector<8x9xf32>, vector<8x55xf32> -> vector<8x64xf32>
    %c0_309 = arith.constant 0 : index
    %c0_310 = arith.constant 0 : index
    %c0_311 = arith.constant 0 : index
    %417 = vector.load %arg16[%c0_309, %c0_310, %c0_311] : memref<9x1x64xf32, #tpu.memory_space<vmem>>, vector<1x1x64xf32>
    %418 = vector.shape_cast %417 : vector<1x1x64xf32> to vector<1x64xf32>
    %419 = vector.broadcast %418 : vector<1x64xf32> to vector<8x64xf32>
    %420 = arith.mulf %416, %419 : vector<8x64xf32>
    %c1_312 = arith.constant 1 : index
    %c0_313 = arith.constant 0 : index
    %c0_314 = arith.constant 0 : index
    %c0_315 = arith.constant 0 : index
    %421 = vector.load %arg10[%c1_312, %c0_313, %c0_314, %c0_315] : memref<4x9x8x8xf32, #tpu.memory_space<vmem>>, vector<1x1x8x8xf32>
    %422 = vector.shape_cast %421 : vector<1x1x8x8xf32> to vector<8x8xf32>
    %cst_316 = arith.constant dense<0.000000e+00> : vector<8x64xf32>
    %423 = tpu.matmul %422, %420, %cst_316 {dimension_numbers = #tpu.dot_dimension_numbers<[1], [0], [0], [1], [0, 0, 1, 1], [], []>} : vector<8x8xf32>, vector<8x64xf32>, vector<8x64xf32> -> vector<8x64xf32>
    %424 = vector.extract_strided_slice %411 {offsets = [0, 56], sizes = [8, 8], strides = [1, 1]} : vector<8x64xf32> to vector<8x8xf32>
    %425 = vector.extract_strided_slice %411 {offsets = [0, 0], sizes = [8, 56], strides = [1, 1]} : vector<8x64xf32> to vector<8x56xf32>
    %426 = tpu.concatenate %424, %425 in 1 : vector<8x8xf32>, vector<8x56xf32> -> vector<8x64xf32>
    %c1_317 = arith.constant 1 : index
    %c0_318 = arith.constant 0 : index
    %c0_319 = arith.constant 0 : index
    %427 = vector.load %arg16[%c1_317, %c0_318, %c0_319] : memref<9x1x64xf32, #tpu.memory_space<vmem>>, vector<1x1x64xf32>
    %428 = vector.shape_cast %427 : vector<1x1x64xf32> to vector<1x64xf32>
    %429 = vector.broadcast %428 : vector<1x64xf32> to vector<8x64xf32>
    %430 = arith.mulf %426, %429 : vector<8x64xf32>
    %c1_320 = arith.constant 1 : index
    %c1_321 = arith.constant 1 : index
    %c0_322 = arith.constant 0 : index
    %c0_323 = arith.constant 0 : index
    %431 = vector.load %arg10[%c1_320, %c1_321, %c0_322, %c0_323] : memref<4x9x8x8xf32, #tpu.memory_space<vmem>>, vector<1x1x8x8xf32>
    %432 = vector.shape_cast %431 : vector<1x1x8x8xf32> to vector<8x8xf32>
    %cst_324 = arith.constant dense<0.000000e+00> : vector<8x64xf32>
    %433 = tpu.matmul %432, %430, %cst_324 {dimension_numbers = #tpu.dot_dimension_numbers<[1], [0], [0], [1], [0, 0, 1, 1], [], []>} : vector<8x8xf32>, vector<8x64xf32>, vector<8x64xf32> -> vector<8x64xf32>
    %434 = arith.addf %423, %433 : vector<8x64xf32>
    %435 = vector.extract_strided_slice %411 {offsets = [0, 57], sizes = [8, 7], strides = [1, 1]} : vector<8x64xf32> to vector<8x7xf32>
    %436 = vector.extract_strided_slice %411 {offsets = [0, 0], sizes = [8, 57], strides = [1, 1]} : vector<8x64xf32> to vector<8x57xf32>
    %437 = tpu.concatenate %435, %436 in 1 : vector<8x7xf32>, vector<8x57xf32> -> vector<8x64xf32>
    %c2_325 = arith.constant 2 : index
    %c0_326 = arith.constant 0 : index
    %c0_327 = arith.constant 0 : index
    %438 = vector.load %arg16[%c2_325, %c0_326, %c0_327] : memref<9x1x64xf32, #tpu.memory_space<vmem>>, vector<1x1x64xf32>
    %439 = vector.shape_cast %438 : vector<1x1x64xf32> to vector<1x64xf32>
    %440 = vector.broadcast %439 : vector<1x64xf32> to vector<8x64xf32>
    %441 = arith.mulf %437, %440 : vector<8x64xf32>
    %c1_328 = arith.constant 1 : index
    %c2_329 = arith.constant 2 : index
    %c0_330 = arith.constant 0 : index
    %c0_331 = arith.constant 0 : index
    %442 = vector.load %arg10[%c1_328, %c2_329, %c0_330, %c0_331] : memref<4x9x8x8xf32, #tpu.memory_space<vmem>>, vector<1x1x8x8xf32>
    %443 = vector.shape_cast %442 : vector<1x1x8x8xf32> to vector<8x8xf32>
    %cst_332 = arith.constant dense<0.000000e+00> : vector<8x64xf32>
    %444 = tpu.matmul %443, %441, %cst_332 {dimension_numbers = #tpu.dot_dimension_numbers<[1], [0], [0], [1], [0, 0, 1, 1], [], []>} : vector<8x8xf32>, vector<8x64xf32>, vector<8x64xf32> -> vector<8x64xf32>
    %445 = arith.addf %434, %444 : vector<8x64xf32>
    %446 = vector.extract_strided_slice %411 {offsets = [0, 63], sizes = [8, 1], strides = [1, 1]} : vector<8x64xf32> to vector<8x1xf32>
    %447 = vector.extract_strided_slice %411 {offsets = [0, 0], sizes = [8, 63], strides = [1, 1]} : vector<8x64xf32> to vector<8x63xf32>
    %448 = tpu.concatenate %446, %447 in 1 : vector<8x1xf32>, vector<8x63xf32> -> vector<8x64xf32>
    %c3_333 = arith.constant 3 : index
    %c0_334 = arith.constant 0 : index
    %c0_335 = arith.constant 0 : index
    %449 = vector.load %arg16[%c3_333, %c0_334, %c0_335] : memref<9x1x64xf32, #tpu.memory_space<vmem>>, vector<1x1x64xf32>
    %450 = vector.shape_cast %449 : vector<1x1x64xf32> to vector<1x64xf32>
    %451 = vector.broadcast %450 : vector<1x64xf32> to vector<8x64xf32>
    %452 = arith.mulf %448, %451 : vector<8x64xf32>
    %c1_336 = arith.constant 1 : index
    %c3_337 = arith.constant 3 : index
    %c0_338 = arith.constant 0 : index
    %c0_339 = arith.constant 0 : index
    %453 = vector.load %arg10[%c1_336, %c3_337, %c0_338, %c0_339] : memref<4x9x8x8xf32, #tpu.memory_space<vmem>>, vector<1x1x8x8xf32>
    %454 = vector.shape_cast %453 : vector<1x1x8x8xf32> to vector<8x8xf32>
    %cst_340 = arith.constant dense<0.000000e+00> : vector<8x64xf32>
    %455 = tpu.matmul %454, %452, %cst_340 {dimension_numbers = #tpu.dot_dimension_numbers<[1], [0], [0], [1], [0, 0, 1, 1], [], []>} : vector<8x8xf32>, vector<8x64xf32>, vector<8x64xf32> -> vector<8x64xf32>
    %456 = arith.addf %445, %455 : vector<8x64xf32>
    %c1_341 = arith.constant 1 : index
    %c4_342 = arith.constant 4 : index
    %c0_343 = arith.constant 0 : index
    %c0_344 = arith.constant 0 : index
    %457 = vector.load %arg10[%c1_341, %c4_342, %c0_343, %c0_344] : memref<4x9x8x8xf32, #tpu.memory_space<vmem>>, vector<1x1x8x8xf32>
    %458 = vector.shape_cast %457 : vector<1x1x8x8xf32> to vector<8x8xf32>
    %cst_345 = arith.constant dense<0.000000e+00> : vector<8x64xf32>
    %459 = tpu.matmul %458, %411, %cst_345 {dimension_numbers = #tpu.dot_dimension_numbers<[1], [0], [0], [1], [0, 0, 1, 1], [], []>} : vector<8x8xf32>, vector<8x64xf32>, vector<8x64xf32> -> vector<8x64xf32>
    %460 = arith.addf %456, %459 : vector<8x64xf32>
    %461 = vector.extract_strided_slice %411 {offsets = [0, 1], sizes = [8, 63], strides = [1, 1]} : vector<8x64xf32> to vector<8x63xf32>
    %462 = vector.extract_strided_slice %411 {offsets = [0, 0], sizes = [8, 1], strides = [1, 1]} : vector<8x64xf32> to vector<8x1xf32>
    %463 = tpu.concatenate %461, %462 in 1 : vector<8x63xf32>, vector<8x1xf32> -> vector<8x64xf32>
    %c5_346 = arith.constant 5 : index
    %c0_347 = arith.constant 0 : index
    %c0_348 = arith.constant 0 : index
    %464 = vector.load %arg16[%c5_346, %c0_347, %c0_348] : memref<9x1x64xf32, #tpu.memory_space<vmem>>, vector<1x1x64xf32>
    %465 = vector.shape_cast %464 : vector<1x1x64xf32> to vector<1x64xf32>
    %466 = vector.broadcast %465 : vector<1x64xf32> to vector<8x64xf32>
    %467 = arith.mulf %463, %466 : vector<8x64xf32>
    %c1_349 = arith.constant 1 : index
    %c5_350 = arith.constant 5 : index
    %c0_351 = arith.constant 0 : index
    %c0_352 = arith.constant 0 : index
    %468 = vector.load %arg10[%c1_349, %c5_350, %c0_351, %c0_352] : memref<4x9x8x8xf32, #tpu.memory_space<vmem>>, vector<1x1x8x8xf32>
    %469 = vector.shape_cast %468 : vector<1x1x8x8xf32> to vector<8x8xf32>
    %cst_353 = arith.constant dense<0.000000e+00> : vector<8x64xf32>
    %470 = tpu.matmul %469, %467, %cst_353 {dimension_numbers = #tpu.dot_dimension_numbers<[1], [0], [0], [1], [0, 0, 1, 1], [], []>} : vector<8x8xf32>, vector<8x64xf32>, vector<8x64xf32> -> vector<8x64xf32>
    %471 = arith.addf %460, %470 : vector<8x64xf32>
    %472 = vector.extract_strided_slice %411 {offsets = [0, 7], sizes = [8, 57], strides = [1, 1]} : vector<8x64xf32> to vector<8x57xf32>
    %473 = vector.extract_strided_slice %411 {offsets = [0, 0], sizes = [8, 7], strides = [1, 1]} : vector<8x64xf32> to vector<8x7xf32>
    %474 = tpu.concatenate %472, %473 in 1 : vector<8x57xf32>, vector<8x7xf32> -> vector<8x64xf32>
    %c6_354 = arith.constant 6 : index
    %c0_355 = arith.constant 0 : index
    %c0_356 = arith.constant 0 : index
    %475 = vector.load %arg16[%c6_354, %c0_355, %c0_356] : memref<9x1x64xf32, #tpu.memory_space<vmem>>, vector<1x1x64xf32>
    %476 = vector.shape_cast %475 : vector<1x1x64xf32> to vector<1x64xf32>
    %477 = vector.broadcast %476 : vector<1x64xf32> to vector<8x64xf32>
    %478 = arith.mulf %474, %477 : vector<8x64xf32>
    %c1_357 = arith.constant 1 : index
    %c6_358 = arith.constant 6 : index
    %c0_359 = arith.constant 0 : index
    %c0_360 = arith.constant 0 : index
    %479 = vector.load %arg10[%c1_357, %c6_358, %c0_359, %c0_360] : memref<4x9x8x8xf32, #tpu.memory_space<vmem>>, vector<1x1x8x8xf32>
    %480 = vector.shape_cast %479 : vector<1x1x8x8xf32> to vector<8x8xf32>
    %cst_361 = arith.constant dense<0.000000e+00> : vector<8x64xf32>
    %481 = tpu.matmul %480, %478, %cst_361 {dimension_numbers = #tpu.dot_dimension_numbers<[1], [0], [0], [1], [0, 0, 1, 1], [], []>} : vector<8x8xf32>, vector<8x64xf32>, vector<8x64xf32> -> vector<8x64xf32>
    %482 = arith.addf %471, %481 : vector<8x64xf32>
    %483 = vector.extract_strided_slice %411 {offsets = [0, 8], sizes = [8, 56], strides = [1, 1]} : vector<8x64xf32> to vector<8x56xf32>
    %484 = vector.extract_strided_slice %411 {offsets = [0, 0], sizes = [8, 8], strides = [1, 1]} : vector<8x64xf32> to vector<8x8xf32>
    %485 = tpu.concatenate %483, %484 in 1 : vector<8x56xf32>, vector<8x8xf32> -> vector<8x64xf32>
    %c7_362 = arith.constant 7 : index
    %c0_363 = arith.constant 0 : index
    %c0_364 = arith.constant 0 : index
    %486 = vector.load %arg16[%c7_362, %c0_363, %c0_364] : memref<9x1x64xf32, #tpu.memory_space<vmem>>, vector<1x1x64xf32>
    %487 = vector.shape_cast %486 : vector<1x1x64xf32> to vector<1x64xf32>
    %488 = vector.broadcast %487 : vector<1x64xf32> to vector<8x64xf32>
    %489 = arith.mulf %485, %488 : vector<8x64xf32>
    %c1_365 = arith.constant 1 : index
    %c7_366 = arith.constant 7 : index
    %c0_367 = arith.constant 0 : index
    %c0_368 = arith.constant 0 : index
    %490 = vector.load %arg10[%c1_365, %c7_366, %c0_367, %c0_368] : memref<4x9x8x8xf32, #tpu.memory_space<vmem>>, vector<1x1x8x8xf32>
    %491 = vector.shape_cast %490 : vector<1x1x8x8xf32> to vector<8x8xf32>
    %cst_369 = arith.constant dense<0.000000e+00> : vector<8x64xf32>
    %492 = tpu.matmul %491, %489, %cst_369 {dimension_numbers = #tpu.dot_dimension_numbers<[1], [0], [0], [1], [0, 0, 1, 1], [], []>} : vector<8x8xf32>, vector<8x64xf32>, vector<8x64xf32> -> vector<8x64xf32>
    %493 = arith.addf %482, %492 : vector<8x64xf32>
    %494 = vector.extract_strided_slice %411 {offsets = [0, 9], sizes = [8, 55], strides = [1, 1]} : vector<8x64xf32> to vector<8x55xf32>
    %495 = vector.extract_strided_slice %411 {offsets = [0, 0], sizes = [8, 9], strides = [1, 1]} : vector<8x64xf32> to vector<8x9xf32>
    %496 = tpu.concatenate %494, %495 in 1 : vector<8x55xf32>, vector<8x9xf32> -> vector<8x64xf32>
    %c8_370 = arith.constant 8 : index
    %c0_371 = arith.constant 0 : index
    %c0_372 = arith.constant 0 : index
    %497 = vector.load %arg16[%c8_370, %c0_371, %c0_372] : memref<9x1x64xf32, #tpu.memory_space<vmem>>, vector<1x1x64xf32>
    %498 = vector.shape_cast %497 : vector<1x1x64xf32> to vector<1x64xf32>
    %499 = vector.broadcast %498 : vector<1x64xf32> to vector<8x64xf32>
    %500 = arith.mulf %496, %499 : vector<8x64xf32>
    %c1_373 = arith.constant 1 : index
    %c8_374 = arith.constant 8 : index
    %c0_375 = arith.constant 0 : index
    %c0_376 = arith.constant 0 : index
    %501 = vector.load %arg10[%c1_373, %c8_374, %c0_375, %c0_376] : memref<4x9x8x8xf32, #tpu.memory_space<vmem>>, vector<1x1x8x8xf32>
    %502 = vector.shape_cast %501 : vector<1x1x8x8xf32> to vector<8x8xf32>
    %cst_377 = arith.constant dense<0.000000e+00> : vector<8x64xf32>
    %503 = tpu.matmul %502, %500, %cst_377 {dimension_numbers = #tpu.dot_dimension_numbers<[1], [0], [0], [1], [0, 0, 1, 1], [], []>} : vector<8x8xf32>, vector<8x64xf32>, vector<8x64xf32> -> vector<8x64xf32>
    %504 = arith.addf %493, %503 : vector<8x64xf32>
    %505 = vector.broadcast %413 : vector<8x1xf32> to vector<8x64xf32>
    %506 = arith.addf %504, %505 : vector<8x64xf32>
    %cst_378 = arith.constant 0.000000e+00 : f32
    %507 = vector.broadcast %cst_378 : f32 to vector<8x64xf32>
    %508 = arith.maximumf %506, %507 : vector<8x64xf32>
    %c1_379 = arith.constant 1 : index
    %c0_380 = arith.constant 0 : index
    %c0_381 = arith.constant 0 : index
    %509 = vector.load %arg12[%c1_379, %c0_380, %c0_381] : memref<4x16x8xf32, #tpu.memory_space<vmem>>, vector<1x16x8xf32>
    %510 = vector.shape_cast %509 : vector<1x16x8xf32> to vector<16x8xf32>
    %cst_382 = arith.constant dense<0.000000e+00> : vector<16x64xf32>
    %511 = tpu.matmul %510, %508, %cst_382 {dimension_numbers = #tpu.dot_dimension_numbers<[1], [0], [0], [1], [0, 0, 1, 1], [], []>} : vector<16x8xf32>, vector<8x64xf32>, vector<16x64xf32> -> vector<16x64xf32>
    %c1_383 = arith.constant 1 : index
    %c0_384 = arith.constant 0 : index
    %c0_385 = arith.constant 0 : index
    %512 = vector.load %arg13[%c1_383, %c0_384, %c0_385] : memref<4x16x1xf32, #tpu.memory_space<vmem>>, vector<1x16x1xf32>
    %513 = vector.shape_cast %512 : vector<1x16x1xf32> to vector<16x1xf32>
    %514 = vector.broadcast %513 : vector<16x1xf32> to vector<16x64xf32>
    %515 = arith.addf %511, %514 : vector<16x64xf32>
    %516 = arith.addf %515, %402 : vector<16x64xf32>
    %cst_386 = arith.constant 0.000000e+00 : f32
    %517 = vector.broadcast %cst_386 : f32 to vector<16x64xf32>
    %518 = arith.maximumf %516, %517 : vector<16x64xf32>
    %c2_387 = arith.constant 2 : index
    %c0_388 = arith.constant 0 : index
    %c0_389 = arith.constant 0 : index
    %519 = vector.load %arg8[%c2_387, %c0_388, %c0_389] : memref<4x8x16xf32, #tpu.memory_space<vmem>>, vector<1x8x16xf32>
    %520 = vector.shape_cast %519 : vector<1x8x16xf32> to vector<8x16xf32>
    %cst_390 = arith.constant dense<0.000000e+00> : vector<8x64xf32>
    %521 = tpu.matmul %520, %518, %cst_390 {dimension_numbers = #tpu.dot_dimension_numbers<[1], [0], [0], [1], [0, 0, 1, 1], [], []>} : vector<8x16xf32>, vector<16x64xf32>, vector<8x64xf32> -> vector<8x64xf32>
    %c2_391 = arith.constant 2 : index
    %c0_392 = arith.constant 0 : index
    %c0_393 = arith.constant 0 : index
    %522 = vector.load %arg9[%c2_391, %c0_392, %c0_393] : memref<4x8x1xf32, #tpu.memory_space<vmem>>, vector<1x8x1xf32>
    %523 = vector.shape_cast %522 : vector<1x8x1xf32> to vector<8x1xf32>
    %524 = vector.broadcast %523 : vector<8x1xf32> to vector<8x64xf32>
    %525 = arith.addf %521, %524 : vector<8x64xf32>
    %cst_394 = arith.constant 0.000000e+00 : f32
    %526 = vector.broadcast %cst_394 : f32 to vector<8x64xf32>
    %527 = arith.maximumf %525, %526 : vector<8x64xf32>
    %c2_395 = arith.constant 2 : index
    %c0_396 = arith.constant 0 : index
    %c0_397 = arith.constant 0 : index
    %528 = vector.load %arg11[%c2_395, %c0_396, %c0_397] : memref<4x8x1xf32, #tpu.memory_space<vmem>>, vector<1x8x1xf32>
    %529 = vector.shape_cast %528 : vector<1x8x1xf32> to vector<8x1xf32>
    %530 = vector.extract_strided_slice %527 {offsets = [0, 55], sizes = [8, 9], strides = [1, 1]} : vector<8x64xf32> to vector<8x9xf32>
    %531 = vector.extract_strided_slice %527 {offsets = [0, 0], sizes = [8, 55], strides = [1, 1]} : vector<8x64xf32> to vector<8x55xf32>
    %532 = tpu.concatenate %530, %531 in 1 : vector<8x9xf32>, vector<8x55xf32> -> vector<8x64xf32>
    %c0_398 = arith.constant 0 : index
    %c0_399 = arith.constant 0 : index
    %c0_400 = arith.constant 0 : index
    %533 = vector.load %arg16[%c0_398, %c0_399, %c0_400] : memref<9x1x64xf32, #tpu.memory_space<vmem>>, vector<1x1x64xf32>
    %534 = vector.shape_cast %533 : vector<1x1x64xf32> to vector<1x64xf32>
    %535 = vector.broadcast %534 : vector<1x64xf32> to vector<8x64xf32>
    %536 = arith.mulf %532, %535 : vector<8x64xf32>
    %c2_401 = arith.constant 2 : index
    %c0_402 = arith.constant 0 : index
    %c0_403 = arith.constant 0 : index
    %c0_404 = arith.constant 0 : index
    %537 = vector.load %arg10[%c2_401, %c0_402, %c0_403, %c0_404] : memref<4x9x8x8xf32, #tpu.memory_space<vmem>>, vector<1x1x8x8xf32>
    %538 = vector.shape_cast %537 : vector<1x1x8x8xf32> to vector<8x8xf32>
    %cst_405 = arith.constant dense<0.000000e+00> : vector<8x64xf32>
    %539 = tpu.matmul %538, %536, %cst_405 {dimension_numbers = #tpu.dot_dimension_numbers<[1], [0], [0], [1], [0, 0, 1, 1], [], []>} : vector<8x8xf32>, vector<8x64xf32>, vector<8x64xf32> -> vector<8x64xf32>
    %540 = vector.extract_strided_slice %527 {offsets = [0, 56], sizes = [8, 8], strides = [1, 1]} : vector<8x64xf32> to vector<8x8xf32>
    %541 = vector.extract_strided_slice %527 {offsets = [0, 0], sizes = [8, 56], strides = [1, 1]} : vector<8x64xf32> to vector<8x56xf32>
    %542 = tpu.concatenate %540, %541 in 1 : vector<8x8xf32>, vector<8x56xf32> -> vector<8x64xf32>
    %c1_406 = arith.constant 1 : index
    %c0_407 = arith.constant 0 : index
    %c0_408 = arith.constant 0 : index
    %543 = vector.load %arg16[%c1_406, %c0_407, %c0_408] : memref<9x1x64xf32, #tpu.memory_space<vmem>>, vector<1x1x64xf32>
    %544 = vector.shape_cast %543 : vector<1x1x64xf32> to vector<1x64xf32>
    %545 = vector.broadcast %544 : vector<1x64xf32> to vector<8x64xf32>
    %546 = arith.mulf %542, %545 : vector<8x64xf32>
    %c2_409 = arith.constant 2 : index
    %c1_410 = arith.constant 1 : index
    %c0_411 = arith.constant 0 : index
    %c0_412 = arith.constant 0 : index
    %547 = vector.load %arg10[%c2_409, %c1_410, %c0_411, %c0_412] : memref<4x9x8x8xf32, #tpu.memory_space<vmem>>, vector<1x1x8x8xf32>
    %548 = vector.shape_cast %547 : vector<1x1x8x8xf32> to vector<8x8xf32>
    %cst_413 = arith.constant dense<0.000000e+00> : vector<8x64xf32>
    %549 = tpu.matmul %548, %546, %cst_413 {dimension_numbers = #tpu.dot_dimension_numbers<[1], [0], [0], [1], [0, 0, 1, 1], [], []>} : vector<8x8xf32>, vector<8x64xf32>, vector<8x64xf32> -> vector<8x64xf32>
    %550 = arith.addf %539, %549 : vector<8x64xf32>
    %551 = vector.extract_strided_slice %527 {offsets = [0, 57], sizes = [8, 7], strides = [1, 1]} : vector<8x64xf32> to vector<8x7xf32>
    %552 = vector.extract_strided_slice %527 {offsets = [0, 0], sizes = [8, 57], strides = [1, 1]} : vector<8x64xf32> to vector<8x57xf32>
    %553 = tpu.concatenate %551, %552 in 1 : vector<8x7xf32>, vector<8x57xf32> -> vector<8x64xf32>
    %c2_414 = arith.constant 2 : index
    %c0_415 = arith.constant 0 : index
    %c0_416 = arith.constant 0 : index
    %554 = vector.load %arg16[%c2_414, %c0_415, %c0_416] : memref<9x1x64xf32, #tpu.memory_space<vmem>>, vector<1x1x64xf32>
    %555 = vector.shape_cast %554 : vector<1x1x64xf32> to vector<1x64xf32>
    %556 = vector.broadcast %555 : vector<1x64xf32> to vector<8x64xf32>
    %557 = arith.mulf %553, %556 : vector<8x64xf32>
    %c2_417 = arith.constant 2 : index
    %c2_418 = arith.constant 2 : index
    %c0_419 = arith.constant 0 : index
    %c0_420 = arith.constant 0 : index
    %558 = vector.load %arg10[%c2_417, %c2_418, %c0_419, %c0_420] : memref<4x9x8x8xf32, #tpu.memory_space<vmem>>, vector<1x1x8x8xf32>
    %559 = vector.shape_cast %558 : vector<1x1x8x8xf32> to vector<8x8xf32>
    %cst_421 = arith.constant dense<0.000000e+00> : vector<8x64xf32>
    %560 = tpu.matmul %559, %557, %cst_421 {dimension_numbers = #tpu.dot_dimension_numbers<[1], [0], [0], [1], [0, 0, 1, 1], [], []>} : vector<8x8xf32>, vector<8x64xf32>, vector<8x64xf32> -> vector<8x64xf32>
    %561 = arith.addf %550, %560 : vector<8x64xf32>
    %562 = vector.extract_strided_slice %527 {offsets = [0, 63], sizes = [8, 1], strides = [1, 1]} : vector<8x64xf32> to vector<8x1xf32>
    %563 = vector.extract_strided_slice %527 {offsets = [0, 0], sizes = [8, 63], strides = [1, 1]} : vector<8x64xf32> to vector<8x63xf32>
    %564 = tpu.concatenate %562, %563 in 1 : vector<8x1xf32>, vector<8x63xf32> -> vector<8x64xf32>
    %c3_422 = arith.constant 3 : index
    %c0_423 = arith.constant 0 : index
    %c0_424 = arith.constant 0 : index
    %565 = vector.load %arg16[%c3_422, %c0_423, %c0_424] : memref<9x1x64xf32, #tpu.memory_space<vmem>>, vector<1x1x64xf32>
    %566 = vector.shape_cast %565 : vector<1x1x64xf32> to vector<1x64xf32>
    %567 = vector.broadcast %566 : vector<1x64xf32> to vector<8x64xf32>
    %568 = arith.mulf %564, %567 : vector<8x64xf32>
    %c2_425 = arith.constant 2 : index
    %c3_426 = arith.constant 3 : index
    %c0_427 = arith.constant 0 : index
    %c0_428 = arith.constant 0 : index
    %569 = vector.load %arg10[%c2_425, %c3_426, %c0_427, %c0_428] : memref<4x9x8x8xf32, #tpu.memory_space<vmem>>, vector<1x1x8x8xf32>
    %570 = vector.shape_cast %569 : vector<1x1x8x8xf32> to vector<8x8xf32>
    %cst_429 = arith.constant dense<0.000000e+00> : vector<8x64xf32>
    %571 = tpu.matmul %570, %568, %cst_429 {dimension_numbers = #tpu.dot_dimension_numbers<[1], [0], [0], [1], [0, 0, 1, 1], [], []>} : vector<8x8xf32>, vector<8x64xf32>, vector<8x64xf32> -> vector<8x64xf32>
    %572 = arith.addf %561, %571 : vector<8x64xf32>
    %c2_430 = arith.constant 2 : index
    %c4_431 = arith.constant 4 : index
    %c0_432 = arith.constant 0 : index
    %c0_433 = arith.constant 0 : index
    %573 = vector.load %arg10[%c2_430, %c4_431, %c0_432, %c0_433] : memref<4x9x8x8xf32, #tpu.memory_space<vmem>>, vector<1x1x8x8xf32>
    %574 = vector.shape_cast %573 : vector<1x1x8x8xf32> to vector<8x8xf32>
    %cst_434 = arith.constant dense<0.000000e+00> : vector<8x64xf32>
    %575 = tpu.matmul %574, %527, %cst_434 {dimension_numbers = #tpu.dot_dimension_numbers<[1], [0], [0], [1], [0, 0, 1, 1], [], []>} : vector<8x8xf32>, vector<8x64xf32>, vector<8x64xf32> -> vector<8x64xf32>
    %576 = arith.addf %572, %575 : vector<8x64xf32>
    %577 = vector.extract_strided_slice %527 {offsets = [0, 1], sizes = [8, 63], strides = [1, 1]} : vector<8x64xf32> to vector<8x63xf32>
    %578 = vector.extract_strided_slice %527 {offsets = [0, 0], sizes = [8, 1], strides = [1, 1]} : vector<8x64xf32> to vector<8x1xf32>
    %579 = tpu.concatenate %577, %578 in 1 : vector<8x63xf32>, vector<8x1xf32> -> vector<8x64xf32>
    %c5_435 = arith.constant 5 : index
    %c0_436 = arith.constant 0 : index
    %c0_437 = arith.constant 0 : index
    %580 = vector.load %arg16[%c5_435, %c0_436, %c0_437] : memref<9x1x64xf32, #tpu.memory_space<vmem>>, vector<1x1x64xf32>
    %581 = vector.shape_cast %580 : vector<1x1x64xf32> to vector<1x64xf32>
    %582 = vector.broadcast %581 : vector<1x64xf32> to vector<8x64xf32>
    %583 = arith.mulf %579, %582 : vector<8x64xf32>
    %c2_438 = arith.constant 2 : index
    %c5_439 = arith.constant 5 : index
    %c0_440 = arith.constant 0 : index
    %c0_441 = arith.constant 0 : index
    %584 = vector.load %arg10[%c2_438, %c5_439, %c0_440, %c0_441] : memref<4x9x8x8xf32, #tpu.memory_space<vmem>>, vector<1x1x8x8xf32>
    %585 = vector.shape_cast %584 : vector<1x1x8x8xf32> to vector<8x8xf32>
    %cst_442 = arith.constant dense<0.000000e+00> : vector<8x64xf32>
    %586 = tpu.matmul %585, %583, %cst_442 {dimension_numbers = #tpu.dot_dimension_numbers<[1], [0], [0], [1], [0, 0, 1, 1], [], []>} : vector<8x8xf32>, vector<8x64xf32>, vector<8x64xf32> -> vector<8x64xf32>
    %587 = arith.addf %576, %586 : vector<8x64xf32>
    %588 = vector.extract_strided_slice %527 {offsets = [0, 7], sizes = [8, 57], strides = [1, 1]} : vector<8x64xf32> to vector<8x57xf32>
    %589 = vector.extract_strided_slice %527 {offsets = [0, 0], sizes = [8, 7], strides = [1, 1]} : vector<8x64xf32> to vector<8x7xf32>
    %590 = tpu.concatenate %588, %589 in 1 : vector<8x57xf32>, vector<8x7xf32> -> vector<8x64xf32>
    %c6_443 = arith.constant 6 : index
    %c0_444 = arith.constant 0 : index
    %c0_445 = arith.constant 0 : index
    %591 = vector.load %arg16[%c6_443, %c0_444, %c0_445] : memref<9x1x64xf32, #tpu.memory_space<vmem>>, vector<1x1x64xf32>
    %592 = vector.shape_cast %591 : vector<1x1x64xf32> to vector<1x64xf32>
    %593 = vector.broadcast %592 : vector<1x64xf32> to vector<8x64xf32>
    %594 = arith.mulf %590, %593 : vector<8x64xf32>
    %c2_446 = arith.constant 2 : index
    %c6_447 = arith.constant 6 : index
    %c0_448 = arith.constant 0 : index
    %c0_449 = arith.constant 0 : index
    %595 = vector.load %arg10[%c2_446, %c6_447, %c0_448, %c0_449] : memref<4x9x8x8xf32, #tpu.memory_space<vmem>>, vector<1x1x8x8xf32>
    %596 = vector.shape_cast %595 : vector<1x1x8x8xf32> to vector<8x8xf32>
    %cst_450 = arith.constant dense<0.000000e+00> : vector<8x64xf32>
    %597 = tpu.matmul %596, %594, %cst_450 {dimension_numbers = #tpu.dot_dimension_numbers<[1], [0], [0], [1], [0, 0, 1, 1], [], []>} : vector<8x8xf32>, vector<8x64xf32>, vector<8x64xf32> -> vector<8x64xf32>
    %598 = arith.addf %587, %597 : vector<8x64xf32>
    %599 = vector.extract_strided_slice %527 {offsets = [0, 8], sizes = [8, 56], strides = [1, 1]} : vector<8x64xf32> to vector<8x56xf32>
    %600 = vector.extract_strided_slice %527 {offsets = [0, 0], sizes = [8, 8], strides = [1, 1]} : vector<8x64xf32> to vector<8x8xf32>
    %601 = tpu.concatenate %599, %600 in 1 : vector<8x56xf32>, vector<8x8xf32> -> vector<8x64xf32>
    %c7_451 = arith.constant 7 : index
    %c0_452 = arith.constant 0 : index
    %c0_453 = arith.constant 0 : index
    %602 = vector.load %arg16[%c7_451, %c0_452, %c0_453] : memref<9x1x64xf32, #tpu.memory_space<vmem>>, vector<1x1x64xf32>
    %603 = vector.shape_cast %602 : vector<1x1x64xf32> to vector<1x64xf32>
    %604 = vector.broadcast %603 : vector<1x64xf32> to vector<8x64xf32>
    %605 = arith.mulf %601, %604 : vector<8x64xf32>
    %c2_454 = arith.constant 2 : index
    %c7_455 = arith.constant 7 : index
    %c0_456 = arith.constant 0 : index
    %c0_457 = arith.constant 0 : index
    %606 = vector.load %arg10[%c2_454, %c7_455, %c0_456, %c0_457] : memref<4x9x8x8xf32, #tpu.memory_space<vmem>>, vector<1x1x8x8xf32>
    %607 = vector.shape_cast %606 : vector<1x1x8x8xf32> to vector<8x8xf32>
    %cst_458 = arith.constant dense<0.000000e+00> : vector<8x64xf32>
    %608 = tpu.matmul %607, %605, %cst_458 {dimension_numbers = #tpu.dot_dimension_numbers<[1], [0], [0], [1], [0, 0, 1, 1], [], []>} : vector<8x8xf32>, vector<8x64xf32>, vector<8x64xf32> -> vector<8x64xf32>
    %609 = arith.addf %598, %608 : vector<8x64xf32>
    %610 = vector.extract_strided_slice %527 {offsets = [0, 9], sizes = [8, 55], strides = [1, 1]} : vector<8x64xf32> to vector<8x55xf32>
    %611 = vector.extract_strided_slice %527 {offsets = [0, 0], sizes = [8, 9], strides = [1, 1]} : vector<8x64xf32> to vector<8x9xf32>
    %612 = tpu.concatenate %610, %611 in 1 : vector<8x55xf32>, vector<8x9xf32> -> vector<8x64xf32>
    %c8_459 = arith.constant 8 : index
    %c0_460 = arith.constant 0 : index
    %c0_461 = arith.constant 0 : index
    %613 = vector.load %arg16[%c8_459, %c0_460, %c0_461] : memref<9x1x64xf32, #tpu.memory_space<vmem>>, vector<1x1x64xf32>
    %614 = vector.shape_cast %613 : vector<1x1x64xf32> to vector<1x64xf32>
    %615 = vector.broadcast %614 : vector<1x64xf32> to vector<8x64xf32>
    %616 = arith.mulf %612, %615 : vector<8x64xf32>
    %c2_462 = arith.constant 2 : index
    %c8_463 = arith.constant 8 : index
    %c0_464 = arith.constant 0 : index
    %c0_465 = arith.constant 0 : index
    %617 = vector.load %arg10[%c2_462, %c8_463, %c0_464, %c0_465] : memref<4x9x8x8xf32, #tpu.memory_space<vmem>>, vector<1x1x8x8xf32>
    %618 = vector.shape_cast %617 : vector<1x1x8x8xf32> to vector<8x8xf32>
    %cst_466 = arith.constant dense<0.000000e+00> : vector<8x64xf32>
    %619 = tpu.matmul %618, %616, %cst_466 {dimension_numbers = #tpu.dot_dimension_numbers<[1], [0], [0], [1], [0, 0, 1, 1], [], []>} : vector<8x8xf32>, vector<8x64xf32>, vector<8x64xf32> -> vector<8x64xf32>
    %620 = arith.addf %609, %619 : vector<8x64xf32>
    %621 = vector.broadcast %529 : vector<8x1xf32> to vector<8x64xf32>
    %622 = arith.addf %620, %621 : vector<8x64xf32>
    %cst_467 = arith.constant 0.000000e+00 : f32
    %623 = vector.broadcast %cst_467 : f32 to vector<8x64xf32>
    %624 = arith.maximumf %622, %623 : vector<8x64xf32>
    %c2_468 = arith.constant 2 : index
    %c0_469 = arith.constant 0 : index
    %c0_470 = arith.constant 0 : index
    %625 = vector.load %arg12[%c2_468, %c0_469, %c0_470] : memref<4x16x8xf32, #tpu.memory_space<vmem>>, vector<1x16x8xf32>
    %626 = vector.shape_cast %625 : vector<1x16x8xf32> to vector<16x8xf32>
    %cst_471 = arith.constant dense<0.000000e+00> : vector<16x64xf32>
    %627 = tpu.matmul %626, %624, %cst_471 {dimension_numbers = #tpu.dot_dimension_numbers<[1], [0], [0], [1], [0, 0, 1, 1], [], []>} : vector<16x8xf32>, vector<8x64xf32>, vector<16x64xf32> -> vector<16x64xf32>
    %c2_472 = arith.constant 2 : index
    %c0_473 = arith.constant 0 : index
    %c0_474 = arith.constant 0 : index
    %628 = vector.load %arg13[%c2_472, %c0_473, %c0_474] : memref<4x16x1xf32, #tpu.memory_space<vmem>>, vector<1x16x1xf32>
    %629 = vector.shape_cast %628 : vector<1x16x1xf32> to vector<16x1xf32>
    %630 = vector.broadcast %629 : vector<16x1xf32> to vector<16x64xf32>
    %631 = arith.addf %627, %630 : vector<16x64xf32>
    %632 = arith.addf %631, %518 : vector<16x64xf32>
    %cst_475 = arith.constant 0.000000e+00 : f32
    %633 = vector.broadcast %cst_475 : f32 to vector<16x64xf32>
    %634 = arith.maximumf %632, %633 : vector<16x64xf32>
    %c3_476 = arith.constant 3 : index
    %c0_477 = arith.constant 0 : index
    %c0_478 = arith.constant 0 : index
    %635 = vector.load %arg8[%c3_476, %c0_477, %c0_478] : memref<4x8x16xf32, #tpu.memory_space<vmem>>, vector<1x8x16xf32>
    %636 = vector.shape_cast %635 : vector<1x8x16xf32> to vector<8x16xf32>
    %cst_479 = arith.constant dense<0.000000e+00> : vector<8x64xf32>
    %637 = tpu.matmul %636, %634, %cst_479 {dimension_numbers = #tpu.dot_dimension_numbers<[1], [0], [0], [1], [0, 0, 1, 1], [], []>} : vector<8x16xf32>, vector<16x64xf32>, vector<8x64xf32> -> vector<8x64xf32>
    %c3_480 = arith.constant 3 : index
    %c0_481 = arith.constant 0 : index
    %c0_482 = arith.constant 0 : index
    %638 = vector.load %arg9[%c3_480, %c0_481, %c0_482] : memref<4x8x1xf32, #tpu.memory_space<vmem>>, vector<1x8x1xf32>
    %639 = vector.shape_cast %638 : vector<1x8x1xf32> to vector<8x1xf32>
    %640 = vector.broadcast %639 : vector<8x1xf32> to vector<8x64xf32>
    %641 = arith.addf %637, %640 : vector<8x64xf32>
    %cst_483 = arith.constant 0.000000e+00 : f32
    %642 = vector.broadcast %cst_483 : f32 to vector<8x64xf32>
    %643 = arith.maximumf %641, %642 : vector<8x64xf32>
    %c3_484 = arith.constant 3 : index
    %c0_485 = arith.constant 0 : index
    %c0_486 = arith.constant 0 : index
    %644 = vector.load %arg11[%c3_484, %c0_485, %c0_486] : memref<4x8x1xf32, #tpu.memory_space<vmem>>, vector<1x8x1xf32>
    %645 = vector.shape_cast %644 : vector<1x8x1xf32> to vector<8x1xf32>
    %646 = vector.extract_strided_slice %643 {offsets = [0, 55], sizes = [8, 9], strides = [1, 1]} : vector<8x64xf32> to vector<8x9xf32>
    %647 = vector.extract_strided_slice %643 {offsets = [0, 0], sizes = [8, 55], strides = [1, 1]} : vector<8x64xf32> to vector<8x55xf32>
    %648 = tpu.concatenate %646, %647 in 1 : vector<8x9xf32>, vector<8x55xf32> -> vector<8x64xf32>
    %c0_487 = arith.constant 0 : index
    %c0_488 = arith.constant 0 : index
    %c0_489 = arith.constant 0 : index
    %649 = vector.load %arg16[%c0_487, %c0_488, %c0_489] : memref<9x1x64xf32, #tpu.memory_space<vmem>>, vector<1x1x64xf32>
    %650 = vector.shape_cast %649 : vector<1x1x64xf32> to vector<1x64xf32>
    %651 = vector.broadcast %650 : vector<1x64xf32> to vector<8x64xf32>
    %652 = arith.mulf %648, %651 : vector<8x64xf32>
    %c3_490 = arith.constant 3 : index
    %c0_491 = arith.constant 0 : index
    %c0_492 = arith.constant 0 : index
    %c0_493 = arith.constant 0 : index
    %653 = vector.load %arg10[%c3_490, %c0_491, %c0_492, %c0_493] : memref<4x9x8x8xf32, #tpu.memory_space<vmem>>, vector<1x1x8x8xf32>
    %654 = vector.shape_cast %653 : vector<1x1x8x8xf32> to vector<8x8xf32>
    %cst_494 = arith.constant dense<0.000000e+00> : vector<8x64xf32>
    %655 = tpu.matmul %654, %652, %cst_494 {dimension_numbers = #tpu.dot_dimension_numbers<[1], [0], [0], [1], [0, 0, 1, 1], [], []>} : vector<8x8xf32>, vector<8x64xf32>, vector<8x64xf32> -> vector<8x64xf32>
    %656 = vector.extract_strided_slice %643 {offsets = [0, 56], sizes = [8, 8], strides = [1, 1]} : vector<8x64xf32> to vector<8x8xf32>
    %657 = vector.extract_strided_slice %643 {offsets = [0, 0], sizes = [8, 56], strides = [1, 1]} : vector<8x64xf32> to vector<8x56xf32>
    %658 = tpu.concatenate %656, %657 in 1 : vector<8x8xf32>, vector<8x56xf32> -> vector<8x64xf32>
    %c1_495 = arith.constant 1 : index
    %c0_496 = arith.constant 0 : index
    %c0_497 = arith.constant 0 : index
    %659 = vector.load %arg16[%c1_495, %c0_496, %c0_497] : memref<9x1x64xf32, #tpu.memory_space<vmem>>, vector<1x1x64xf32>
    %660 = vector.shape_cast %659 : vector<1x1x64xf32> to vector<1x64xf32>
    %661 = vector.broadcast %660 : vector<1x64xf32> to vector<8x64xf32>
    %662 = arith.mulf %658, %661 : vector<8x64xf32>
    %c3_498 = arith.constant 3 : index
    %c1_499 = arith.constant 1 : index
    %c0_500 = arith.constant 0 : index
    %c0_501 = arith.constant 0 : index
    %663 = vector.load %arg10[%c3_498, %c1_499, %c0_500, %c0_501] : memref<4x9x8x8xf32, #tpu.memory_space<vmem>>, vector<1x1x8x8xf32>
    %664 = vector.shape_cast %663 : vector<1x1x8x8xf32> to vector<8x8xf32>
    %cst_502 = arith.constant dense<0.000000e+00> : vector<8x64xf32>
    %665 = tpu.matmul %664, %662, %cst_502 {dimension_numbers = #tpu.dot_dimension_numbers<[1], [0], [0], [1], [0, 0, 1, 1], [], []>} : vector<8x8xf32>, vector<8x64xf32>, vector<8x64xf32> -> vector<8x64xf32>
    %666 = arith.addf %655, %665 : vector<8x64xf32>
    %667 = vector.extract_strided_slice %643 {offsets = [0, 57], sizes = [8, 7], strides = [1, 1]} : vector<8x64xf32> to vector<8x7xf32>
    %668 = vector.extract_strided_slice %643 {offsets = [0, 0], sizes = [8, 57], strides = [1, 1]} : vector<8x64xf32> to vector<8x57xf32>
    %669 = tpu.concatenate %667, %668 in 1 : vector<8x7xf32>, vector<8x57xf32> -> vector<8x64xf32>
    %c2_503 = arith.constant 2 : index
    %c0_504 = arith.constant 0 : index
    %c0_505 = arith.constant 0 : index
    %670 = vector.load %arg16[%c2_503, %c0_504, %c0_505] : memref<9x1x64xf32, #tpu.memory_space<vmem>>, vector<1x1x64xf32>
    %671 = vector.shape_cast %670 : vector<1x1x64xf32> to vector<1x64xf32>
    %672 = vector.broadcast %671 : vector<1x64xf32> to vector<8x64xf32>
    %673 = arith.mulf %669, %672 : vector<8x64xf32>
    %c3_506 = arith.constant 3 : index
    %c2_507 = arith.constant 2 : index
    %c0_508 = arith.constant 0 : index
    %c0_509 = arith.constant 0 : index
    %674 = vector.load %arg10[%c3_506, %c2_507, %c0_508, %c0_509] : memref<4x9x8x8xf32, #tpu.memory_space<vmem>>, vector<1x1x8x8xf32>
    %675 = vector.shape_cast %674 : vector<1x1x8x8xf32> to vector<8x8xf32>
    %cst_510 = arith.constant dense<0.000000e+00> : vector<8x64xf32>
    %676 = tpu.matmul %675, %673, %cst_510 {dimension_numbers = #tpu.dot_dimension_numbers<[1], [0], [0], [1], [0, 0, 1, 1], [], []>} : vector<8x8xf32>, vector<8x64xf32>, vector<8x64xf32> -> vector<8x64xf32>
    %677 = arith.addf %666, %676 : vector<8x64xf32>
    %678 = vector.extract_strided_slice %643 {offsets = [0, 63], sizes = [8, 1], strides = [1, 1]} : vector<8x64xf32> to vector<8x1xf32>
    %679 = vector.extract_strided_slice %643 {offsets = [0, 0], sizes = [8, 63], strides = [1, 1]} : vector<8x64xf32> to vector<8x63xf32>
    %680 = tpu.concatenate %678, %679 in 1 : vector<8x1xf32>, vector<8x63xf32> -> vector<8x64xf32>
    %c3_511 = arith.constant 3 : index
    %c0_512 = arith.constant 0 : index
    %c0_513 = arith.constant 0 : index
    %681 = vector.load %arg16[%c3_511, %c0_512, %c0_513] : memref<9x1x64xf32, #tpu.memory_space<vmem>>, vector<1x1x64xf32>
    %682 = vector.shape_cast %681 : vector<1x1x64xf32> to vector<1x64xf32>
    %683 = vector.broadcast %682 : vector<1x64xf32> to vector<8x64xf32>
    %684 = arith.mulf %680, %683 : vector<8x64xf32>
    %c3_514 = arith.constant 3 : index
    %c3_515 = arith.constant 3 : index
    %c0_516 = arith.constant 0 : index
    %c0_517 = arith.constant 0 : index
    %685 = vector.load %arg10[%c3_514, %c3_515, %c0_516, %c0_517] : memref<4x9x8x8xf32, #tpu.memory_space<vmem>>, vector<1x1x8x8xf32>
    %686 = vector.shape_cast %685 : vector<1x1x8x8xf32> to vector<8x8xf32>
    %cst_518 = arith.constant dense<0.000000e+00> : vector<8x64xf32>
    %687 = tpu.matmul %686, %684, %cst_518 {dimension_numbers = #tpu.dot_dimension_numbers<[1], [0], [0], [1], [0, 0, 1, 1], [], []>} : vector<8x8xf32>, vector<8x64xf32>, vector<8x64xf32> -> vector<8x64xf32>
    %688 = arith.addf %677, %687 : vector<8x64xf32>
    %c3_519 = arith.constant 3 : index
    %c4_520 = arith.constant 4 : index
    %c0_521 = arith.constant 0 : index
    %c0_522 = arith.constant 0 : index
    %689 = vector.load %arg10[%c3_519, %c4_520, %c0_521, %c0_522] : memref<4x9x8x8xf32, #tpu.memory_space<vmem>>, vector<1x1x8x8xf32>
    %690 = vector.shape_cast %689 : vector<1x1x8x8xf32> to vector<8x8xf32>
    %cst_523 = arith.constant dense<0.000000e+00> : vector<8x64xf32>
    %691 = tpu.matmul %690, %643, %cst_523 {dimension_numbers = #tpu.dot_dimension_numbers<[1], [0], [0], [1], [0, 0, 1, 1], [], []>} : vector<8x8xf32>, vector<8x64xf32>, vector<8x64xf32> -> vector<8x64xf32>
    %692 = arith.addf %688, %691 : vector<8x64xf32>
    %693 = vector.extract_strided_slice %643 {offsets = [0, 1], sizes = [8, 63], strides = [1, 1]} : vector<8x64xf32> to vector<8x63xf32>
    %694 = vector.extract_strided_slice %643 {offsets = [0, 0], sizes = [8, 1], strides = [1, 1]} : vector<8x64xf32> to vector<8x1xf32>
    %695 = tpu.concatenate %693, %694 in 1 : vector<8x63xf32>, vector<8x1xf32> -> vector<8x64xf32>
    %c5_524 = arith.constant 5 : index
    %c0_525 = arith.constant 0 : index
    %c0_526 = arith.constant 0 : index
    %696 = vector.load %arg16[%c5_524, %c0_525, %c0_526] : memref<9x1x64xf32, #tpu.memory_space<vmem>>, vector<1x1x64xf32>
    %697 = vector.shape_cast %696 : vector<1x1x64xf32> to vector<1x64xf32>
    %698 = vector.broadcast %697 : vector<1x64xf32> to vector<8x64xf32>
    %699 = arith.mulf %695, %698 : vector<8x64xf32>
    %c3_527 = arith.constant 3 : index
    %c5_528 = arith.constant 5 : index
    %c0_529 = arith.constant 0 : index
    %c0_530 = arith.constant 0 : index
    %700 = vector.load %arg10[%c3_527, %c5_528, %c0_529, %c0_530] : memref<4x9x8x8xf32, #tpu.memory_space<vmem>>, vector<1x1x8x8xf32>
    %701 = vector.shape_cast %700 : vector<1x1x8x8xf32> to vector<8x8xf32>
    %cst_531 = arith.constant dense<0.000000e+00> : vector<8x64xf32>
    %702 = tpu.matmul %701, %699, %cst_531 {dimension_numbers = #tpu.dot_dimension_numbers<[1], [0], [0], [1], [0, 0, 1, 1], [], []>} : vector<8x8xf32>, vector<8x64xf32>, vector<8x64xf32> -> vector<8x64xf32>
    %703 = arith.addf %692, %702 : vector<8x64xf32>
    %704 = vector.extract_strided_slice %643 {offsets = [0, 7], sizes = [8, 57], strides = [1, 1]} : vector<8x64xf32> to vector<8x57xf32>
    %705 = vector.extract_strided_slice %643 {offsets = [0, 0], sizes = [8, 7], strides = [1, 1]} : vector<8x64xf32> to vector<8x7xf32>
    %706 = tpu.concatenate %704, %705 in 1 : vector<8x57xf32>, vector<8x7xf32> -> vector<8x64xf32>
    %c6_532 = arith.constant 6 : index
    %c0_533 = arith.constant 0 : index
    %c0_534 = arith.constant 0 : index
    %707 = vector.load %arg16[%c6_532, %c0_533, %c0_534] : memref<9x1x64xf32, #tpu.memory_space<vmem>>, vector<1x1x64xf32>
    %708 = vector.shape_cast %707 : vector<1x1x64xf32> to vector<1x64xf32>
    %709 = vector.broadcast %708 : vector<1x64xf32> to vector<8x64xf32>
    %710 = arith.mulf %706, %709 : vector<8x64xf32>
    %c3_535 = arith.constant 3 : index
    %c6_536 = arith.constant 6 : index
    %c0_537 = arith.constant 0 : index
    %c0_538 = arith.constant 0 : index
    %711 = vector.load %arg10[%c3_535, %c6_536, %c0_537, %c0_538] : memref<4x9x8x8xf32, #tpu.memory_space<vmem>>, vector<1x1x8x8xf32>
    %712 = vector.shape_cast %711 : vector<1x1x8x8xf32> to vector<8x8xf32>
    %cst_539 = arith.constant dense<0.000000e+00> : vector<8x64xf32>
    %713 = tpu.matmul %712, %710, %cst_539 {dimension_numbers = #tpu.dot_dimension_numbers<[1], [0], [0], [1], [0, 0, 1, 1], [], []>} : vector<8x8xf32>, vector<8x64xf32>, vector<8x64xf32> -> vector<8x64xf32>
    %714 = arith.addf %703, %713 : vector<8x64xf32>
    %715 = vector.extract_strided_slice %643 {offsets = [0, 8], sizes = [8, 56], strides = [1, 1]} : vector<8x64xf32> to vector<8x56xf32>
    %716 = vector.extract_strided_slice %643 {offsets = [0, 0], sizes = [8, 8], strides = [1, 1]} : vector<8x64xf32> to vector<8x8xf32>
    %717 = tpu.concatenate %715, %716 in 1 : vector<8x56xf32>, vector<8x8xf32> -> vector<8x64xf32>
    %c7_540 = arith.constant 7 : index
    %c0_541 = arith.constant 0 : index
    %c0_542 = arith.constant 0 : index
    %718 = vector.load %arg16[%c7_540, %c0_541, %c0_542] : memref<9x1x64xf32, #tpu.memory_space<vmem>>, vector<1x1x64xf32>
    %719 = vector.shape_cast %718 : vector<1x1x64xf32> to vector<1x64xf32>
    %720 = vector.broadcast %719 : vector<1x64xf32> to vector<8x64xf32>
    %721 = arith.mulf %717, %720 : vector<8x64xf32>
    %c3_543 = arith.constant 3 : index
    %c7_544 = arith.constant 7 : index
    %c0_545 = arith.constant 0 : index
    %c0_546 = arith.constant 0 : index
    %722 = vector.load %arg10[%c3_543, %c7_544, %c0_545, %c0_546] : memref<4x9x8x8xf32, #tpu.memory_space<vmem>>, vector<1x1x8x8xf32>
    %723 = vector.shape_cast %722 : vector<1x1x8x8xf32> to vector<8x8xf32>
    %cst_547 = arith.constant dense<0.000000e+00> : vector<8x64xf32>
    %724 = tpu.matmul %723, %721, %cst_547 {dimension_numbers = #tpu.dot_dimension_numbers<[1], [0], [0], [1], [0, 0, 1, 1], [], []>} : vector<8x8xf32>, vector<8x64xf32>, vector<8x64xf32> -> vector<8x64xf32>
    %725 = arith.addf %714, %724 : vector<8x64xf32>
    %726 = vector.extract_strided_slice %643 {offsets = [0, 9], sizes = [8, 55], strides = [1, 1]} : vector<8x64xf32> to vector<8x55xf32>
    %727 = vector.extract_strided_slice %643 {offsets = [0, 0], sizes = [8, 9], strides = [1, 1]} : vector<8x64xf32> to vector<8x9xf32>
    %728 = tpu.concatenate %726, %727 in 1 : vector<8x55xf32>, vector<8x9xf32> -> vector<8x64xf32>
    %c8_548 = arith.constant 8 : index
    %c0_549 = arith.constant 0 : index
    %c0_550 = arith.constant 0 : index
    %729 = vector.load %arg16[%c8_548, %c0_549, %c0_550] : memref<9x1x64xf32, #tpu.memory_space<vmem>>, vector<1x1x64xf32>
    %730 = vector.shape_cast %729 : vector<1x1x64xf32> to vector<1x64xf32>
    %731 = vector.broadcast %730 : vector<1x64xf32> to vector<8x64xf32>
    %732 = arith.mulf %728, %731 : vector<8x64xf32>
    %c3_551 = arith.constant 3 : index
    %c8_552 = arith.constant 8 : index
    %c0_553 = arith.constant 0 : index
    %c0_554 = arith.constant 0 : index
    %733 = vector.load %arg10[%c3_551, %c8_552, %c0_553, %c0_554] : memref<4x9x8x8xf32, #tpu.memory_space<vmem>>, vector<1x1x8x8xf32>
    %734 = vector.shape_cast %733 : vector<1x1x8x8xf32> to vector<8x8xf32>
    %cst_555 = arith.constant dense<0.000000e+00> : vector<8x64xf32>
    %735 = tpu.matmul %734, %732, %cst_555 {dimension_numbers = #tpu.dot_dimension_numbers<[1], [0], [0], [1], [0, 0, 1, 1], [], []>} : vector<8x8xf32>, vector<8x64xf32>, vector<8x64xf32> -> vector<8x64xf32>
    %736 = arith.addf %725, %735 : vector<8x64xf32>
    %737 = vector.broadcast %645 : vector<8x1xf32> to vector<8x64xf32>
    %738 = arith.addf %736, %737 : vector<8x64xf32>
    %cst_556 = arith.constant 0.000000e+00 : f32
    %739 = vector.broadcast %cst_556 : f32 to vector<8x64xf32>
    %740 = arith.maximumf %738, %739 : vector<8x64xf32>
    %c3_557 = arith.constant 3 : index
    %c0_558 = arith.constant 0 : index
    %c0_559 = arith.constant 0 : index
    %741 = vector.load %arg12[%c3_557, %c0_558, %c0_559] : memref<4x16x8xf32, #tpu.memory_space<vmem>>, vector<1x16x8xf32>
    %742 = vector.shape_cast %741 : vector<1x16x8xf32> to vector<16x8xf32>
    %cst_560 = arith.constant dense<0.000000e+00> : vector<16x64xf32>
    %743 = tpu.matmul %742, %740, %cst_560 {dimension_numbers = #tpu.dot_dimension_numbers<[1], [0], [0], [1], [0, 0, 1, 1], [], []>} : vector<16x8xf32>, vector<8x64xf32>, vector<16x64xf32> -> vector<16x64xf32>
    %c3_561 = arith.constant 3 : index
    %c0_562 = arith.constant 0 : index
    %c0_563 = arith.constant 0 : index
    %744 = vector.load %arg13[%c3_561, %c0_562, %c0_563] : memref<4x16x1xf32, #tpu.memory_space<vmem>>, vector<1x16x1xf32>
    %745 = vector.shape_cast %744 : vector<1x16x1xf32> to vector<16x1xf32>
    %746 = vector.broadcast %745 : vector<16x1xf32> to vector<16x64xf32>
    %747 = arith.addf %743, %746 : vector<16x64xf32>
    %748 = arith.addf %747, %634 : vector<16x64xf32>
    %cst_564 = arith.constant 0.000000e+00 : f32
    %749 = vector.broadcast %cst_564 : f32 to vector<16x64xf32>
    %750 = arith.maximumf %748, %749 : vector<16x64xf32>
    %c0_565 = arith.constant 0 : index
    %c0_566 = arith.constant 0 : index
    %751 = vector.load %arg29[%c0_565, %c0_566] : memref<64x256xf32, #tpu.memory_space<vmem>>, vector<64x256xf32>
    %cst_567 = arith.constant dense<0.000000e+00> : vector<16x256xf32>
    %752 = tpu.matmul %750, %751, %cst_567 {dimension_numbers = #tpu.dot_dimension_numbers<[1], [0], [0], [1], [0, 0, 1, 1], [], []>} : vector<16x64xf32>, vector<64x256xf32>, vector<16x256xf32> -> vector<16x256xf32>
    %c0_568 = arith.constant 0 : index
    %c0_569 = arith.constant 0 : index
    %753 = vector.load %arg26[%c0_568, %c0_569] : memref<16x256xf32, #tpu.memory_space<vmem>>, vector<16x256xf32>
    %754 = arith.addf %752, %753 : vector<16x256xf32>
    %c0_570 = arith.constant 0 : index
    %c0_571 = arith.constant 0 : index
    %755 = vector.load %arg20[%c0_570, %c0_571] : memref<16x16xf32, #tpu.memory_space<vmem>>, vector<16x16xf32>
    %cst_572 = arith.constant dense<0.000000e+00> : vector<16x256xf32>
    %756 = tpu.matmul %755, %754, %cst_572 {dimension_numbers = #tpu.dot_dimension_numbers<[1], [0], [0], [1], [0, 0, 1, 1], [], []>} : vector<16x16xf32>, vector<16x256xf32>, vector<16x256xf32> -> vector<16x256xf32>
    %c0_573 = arith.constant 0 : index
    %c0_574 = arith.constant 0 : index
    %757 = vector.load %arg21[%c0_573, %c0_574] : memref<16x1xf32, #tpu.memory_space<vmem>>, vector<16x1xf32>
    %758 = vector.broadcast %757 : vector<16x1xf32> to vector<16x256xf32>
    %759 = arith.addf %756, %758 : vector<16x256xf32>
    %c0_575 = arith.constant 0 : index
    %c0_576 = arith.constant 0 : index
    %760 = vector.load %arg22[%c0_575, %c0_576] : memref<16x16xf32, #tpu.memory_space<vmem>>, vector<16x16xf32>
    %cst_577 = arith.constant dense<0.000000e+00> : vector<16x256xf32>
    %761 = tpu.matmul %760, %754, %cst_577 {dimension_numbers = #tpu.dot_dimension_numbers<[1], [0], [0], [1], [0, 0, 1, 1], [], []>} : vector<16x16xf32>, vector<16x256xf32>, vector<16x256xf32> -> vector<16x256xf32>
    %c0_578 = arith.constant 0 : index
    %c0_579 = arith.constant 0 : index
    %762 = vector.load %arg23[%c0_578, %c0_579] : memref<16x1xf32, #tpu.memory_space<vmem>>, vector<16x1xf32>
    %763 = vector.broadcast %762 : vector<16x1xf32> to vector<16x256xf32>
    %764 = arith.addf %761, %763 : vector<16x256xf32>
    %c0_580 = arith.constant 0 : index
    %c0_581 = arith.constant 0 : index
    %765 = vector.load %arg28[%c0_580, %c0_581] : memref<64x4xf32, #tpu.memory_space<vmem>>, vector<64x4xf32>
    %cst_582 = arith.constant dense<0.000000e+00> : vector<16x4xf32>
    %766 = tpu.matmul %750, %765, %cst_582 {dimension_numbers = #tpu.dot_dimension_numbers<[1], [0], [0], [1], [0, 0, 1, 1], [], []>} : vector<16x64xf32>, vector<64x4xf32>, vector<16x4xf32> -> vector<16x4xf32>
    %c0_583 = arith.constant 0 : index
    %c0_584 = arith.constant 0 : index
    %767 = vector.load %arg27[%c0_583, %c0_584] : memref<16x1xf32, #tpu.memory_space<vmem>>, vector<16x1xf32>
    %768 = vector.broadcast %767 : vector<16x1xf32> to vector<16x4xf32>
    %769 = arith.addf %766, %768 : vector<16x4xf32>
    %c0_585 = arith.constant 0 : index
    %c0_586 = arith.constant 0 : index
    %770 = vector.load %arg18[%c0_585, %c0_586] : memref<16x16xf32, #tpu.memory_space<vmem>>, vector<16x16xf32>
    %cst_587 = arith.constant dense<0.000000e+00> : vector<16x4xf32>
    %771 = tpu.matmul %770, %769, %cst_587 {dimension_numbers = #tpu.dot_dimension_numbers<[1], [0], [0], [1], [0, 0, 1, 1], [], []>} : vector<16x16xf32>, vector<16x4xf32>, vector<16x4xf32> -> vector<16x4xf32>
    %c0_588 = arith.constant 0 : index
    %c0_589 = arith.constant 0 : index
    %772 = vector.load %arg19[%c0_588, %c0_589] : memref<16x1xf32, #tpu.memory_space<vmem>>, vector<16x1xf32>
    %773 = vector.broadcast %772 : vector<16x1xf32> to vector<16x4xf32>
    %774 = arith.addf %771, %773 : vector<16x4xf32>
    %c0_590 = arith.constant 0 : index
    %c0_591 = arith.constant 0 : index
    %775 = vector.load %arg30[%c0_590, %c0_591] : memref<4x16xf32, #tpu.memory_space<vmem>>, vector<4x16xf32>
    %c0_592 = arith.constant 0 : index
    %c0_593 = arith.constant 0 : index
    %776 = vector.load %arg31[%c0_592, %c0_593] : memref<1x64xf32, #tpu.memory_space<vmem>>, vector<1x64xf32>
    %777 = vector.extract_strided_slice %759 {offsets = [0, 0], sizes = [16, 64], strides = [1, 1]} : vector<16x256xf32> to vector<16x64xf32>
    %778 = vector.extract_strided_slice %764 {offsets = [0, 0], sizes = [16, 64], strides = [1, 1]} : vector<16x256xf32> to vector<16x64xf32>
    %779 = vector.extract_strided_slice %774 {offsets = [0, 0], sizes = [16, 1], strides = [1, 1]} : vector<16x4xf32> to vector<16x1xf32>
    %780 = vector.broadcast %779 : vector<16x1xf32> to vector<16x64xf32>
    %781 = arith.mulf %780, %777 : vector<16x64xf32>
    %cst_594 = arith.constant dense<0.000000e+00> : vector<4x64xf32>
    %782 = tpu.matmul %775, %781, %cst_594 {dimension_numbers = #tpu.dot_dimension_numbers<[1], [0], [0], [1], [0, 0, 1, 1], [], []>} : vector<4x16xf32>, vector<16x64xf32>, vector<4x64xf32> -> vector<4x64xf32>
    %cst_595 = arith.constant 5.000000e-01 : f32
    %783 = vector.broadcast %cst_595 : f32 to vector<4x64xf32>
    %784 = arith.mulf %782, %783 : vector<4x64xf32>
    %785 = vector.broadcast %776 : vector<1x64xf32> to vector<4x64xf32>
    %786 = arith.addf %784, %785 : vector<4x64xf32>
    %cst_596 = arith.constant dense<0xFF800000> : vector<4xf32>
    %787 = vector.multi_reduction <maximumf>, %786, %cst_596 [1] : vector<4x64xf32> to vector<4xf32>
    %788 = vector.shape_cast %787 : vector<4xf32> to vector<4x1xf32>
    %789 = vector.broadcast %788 : vector<4x1xf32> to vector<4x64xf32>
    %790 = arith.subf %786, %789 : vector<4x64xf32>
    %791 = math.exp %790 : vector<4x64xf32>
    %cst_597 = arith.constant dense<0.000000e+00> : vector<4xf32>
    %792 = vector.multi_reduction <add>, %791, %cst_597 [1] : vector<4x64xf32> to vector<4xf32>
    %793 = vector.shape_cast %792 : vector<4xf32> to vector<4x1xf32>
    %794 = vector.broadcast %793 : vector<4x1xf32> to vector<4x64xf32>
    %795 = arith.divf %791, %794 : vector<4x64xf32>
    %cst_598 = arith.constant dense<0.000000e+00> : vector<4x16xf32>
    %796 = tpu.matmul %795, %778, %cst_598 {dimension_numbers = #tpu.dot_dimension_numbers<[1], [1], [0], [0], [0, 0, 1, 0], [], []>} : vector<4x64xf32>, vector<16x64xf32>, vector<4x16xf32> -> vector<4x16xf32>
    %797 = arith.mulf %796, %775 : vector<4x16xf32>
    %cst_599 = arith.constant dense<0.000000e+00> : vector<16xf32>
    %798 = vector.multi_reduction <add>, %797, %cst_599 [0] : vector<4x16xf32> to vector<16xf32>
    %799 = vector.shape_cast %798 : vector<16xf32> to vector<1x16xf32>
    %800 = vector.extract_strided_slice %759 {offsets = [0, 64], sizes = [16, 64], strides = [1, 1]} : vector<16x256xf32> to vector<16x64xf32>
    %801 = vector.extract_strided_slice %764 {offsets = [0, 64], sizes = [16, 64], strides = [1, 1]} : vector<16x256xf32> to vector<16x64xf32>
    %802 = vector.extract_strided_slice %774 {offsets = [0, 1], sizes = [16, 1], strides = [1, 1]} : vector<16x4xf32> to vector<16x1xf32>
    %803 = vector.broadcast %802 : vector<16x1xf32> to vector<16x64xf32>
    %804 = arith.mulf %803, %800 : vector<16x64xf32>
    %cst_600 = arith.constant dense<0.000000e+00> : vector<4x64xf32>
    %805 = tpu.matmul %775, %804, %cst_600 {dimension_numbers = #tpu.dot_dimension_numbers<[1], [0], [0], [1], [0, 0, 1, 1], [], []>} : vector<4x16xf32>, vector<16x64xf32>, vector<4x64xf32> -> vector<4x64xf32>
    %cst_601 = arith.constant 5.000000e-01 : f32
    %806 = vector.broadcast %cst_601 : f32 to vector<4x64xf32>
    %807 = arith.mulf %805, %806 : vector<4x64xf32>
    %808 = vector.broadcast %776 : vector<1x64xf32> to vector<4x64xf32>
    %809 = arith.addf %807, %808 : vector<4x64xf32>
    %cst_602 = arith.constant dense<0xFF800000> : vector<4xf32>
    %810 = vector.multi_reduction <maximumf>, %809, %cst_602 [1] : vector<4x64xf32> to vector<4xf32>
    %811 = vector.shape_cast %810 : vector<4xf32> to vector<4x1xf32>
    %812 = vector.broadcast %811 : vector<4x1xf32> to vector<4x64xf32>
    %813 = arith.subf %809, %812 : vector<4x64xf32>
    %814 = math.exp %813 : vector<4x64xf32>
    %cst_603 = arith.constant dense<0.000000e+00> : vector<4xf32>
    %815 = vector.multi_reduction <add>, %814, %cst_603 [1] : vector<4x64xf32> to vector<4xf32>
    %816 = vector.shape_cast %815 : vector<4xf32> to vector<4x1xf32>
    %817 = vector.broadcast %816 : vector<4x1xf32> to vector<4x64xf32>
    %818 = arith.divf %814, %817 : vector<4x64xf32>
    %cst_604 = arith.constant dense<0.000000e+00> : vector<4x16xf32>
    %819 = tpu.matmul %818, %801, %cst_604 {dimension_numbers = #tpu.dot_dimension_numbers<[1], [1], [0], [0], [0, 0, 1, 0], [], []>} : vector<4x64xf32>, vector<16x64xf32>, vector<4x16xf32> -> vector<4x16xf32>
    %820 = arith.mulf %819, %775 : vector<4x16xf32>
    %cst_605 = arith.constant dense<0.000000e+00> : vector<16xf32>
    %821 = vector.multi_reduction <add>, %820, %cst_605 [0] : vector<4x16xf32> to vector<16xf32>
    %822 = vector.shape_cast %821 : vector<16xf32> to vector<1x16xf32>
    %823 = vector.extract_strided_slice %759 {offsets = [0, 128], sizes = [16, 64], strides = [1, 1]} : vector<16x256xf32> to vector<16x64xf32>
    %824 = vector.extract_strided_slice %764 {offsets = [0, 128], sizes = [16, 64], strides = [1, 1]} : vector<16x256xf32> to vector<16x64xf32>
    %825 = vector.extract_strided_slice %774 {offsets = [0, 2], sizes = [16, 1], strides = [1, 1]} : vector<16x4xf32> to vector<16x1xf32>
    %826 = vector.broadcast %825 : vector<16x1xf32> to vector<16x64xf32>
    %827 = arith.mulf %826, %823 : vector<16x64xf32>
    %cst_606 = arith.constant dense<0.000000e+00> : vector<4x64xf32>
    %828 = tpu.matmul %775, %827, %cst_606 {dimension_numbers = #tpu.dot_dimension_numbers<[1], [0], [0], [1], [0, 0, 1, 1], [], []>} : vector<4x16xf32>, vector<16x64xf32>, vector<4x64xf32> -> vector<4x64xf32>
    %cst_607 = arith.constant 5.000000e-01 : f32
    %829 = vector.broadcast %cst_607 : f32 to vector<4x64xf32>
    %830 = arith.mulf %828, %829 : vector<4x64xf32>
    %831 = vector.broadcast %776 : vector<1x64xf32> to vector<4x64xf32>
    %832 = arith.addf %830, %831 : vector<4x64xf32>
    %cst_608 = arith.constant dense<0xFF800000> : vector<4xf32>
    %833 = vector.multi_reduction <maximumf>, %832, %cst_608 [1] : vector<4x64xf32> to vector<4xf32>
    %834 = vector.shape_cast %833 : vector<4xf32> to vector<4x1xf32>
    %835 = vector.broadcast %834 : vector<4x1xf32> to vector<4x64xf32>
    %836 = arith.subf %832, %835 : vector<4x64xf32>
    %837 = math.exp %836 : vector<4x64xf32>
    %cst_609 = arith.constant dense<0.000000e+00> : vector<4xf32>
    %838 = vector.multi_reduction <add>, %837, %cst_609 [1] : vector<4x64xf32> to vector<4xf32>
    %839 = vector.shape_cast %838 : vector<4xf32> to vector<4x1xf32>
    %840 = vector.broadcast %839 : vector<4x1xf32> to vector<4x64xf32>
    %841 = arith.divf %837, %840 : vector<4x64xf32>
    %cst_610 = arith.constant dense<0.000000e+00> : vector<4x16xf32>
    %842 = tpu.matmul %841, %824, %cst_610 {dimension_numbers = #tpu.dot_dimension_numbers<[1], [1], [0], [0], [0, 0, 1, 0], [], []>} : vector<4x64xf32>, vector<16x64xf32>, vector<4x16xf32> -> vector<4x16xf32>
    %843 = arith.mulf %842, %775 : vector<4x16xf32>
    %cst_611 = arith.constant dense<0.000000e+00> : vector<16xf32>
    %844 = vector.multi_reduction <add>, %843, %cst_611 [0] : vector<4x16xf32> to vector<16xf32>
    %845 = vector.shape_cast %844 : vector<16xf32> to vector<1x16xf32>
    %846 = vector.extract_strided_slice %759 {offsets = [0, 192], sizes = [16, 64], strides = [1, 1]} : vector<16x256xf32> to vector<16x64xf32>
    %847 = vector.extract_strided_slice %764 {offsets = [0, 192], sizes = [16, 64], strides = [1, 1]} : vector<16x256xf32> to vector<16x64xf32>
    %848 = vector.extract_strided_slice %774 {offsets = [0, 3], sizes = [16, 1], strides = [1, 1]} : vector<16x4xf32> to vector<16x1xf32>
    %849 = vector.broadcast %848 : vector<16x1xf32> to vector<16x64xf32>
    %850 = arith.mulf %849, %846 : vector<16x64xf32>
    %cst_612 = arith.constant dense<0.000000e+00> : vector<4x64xf32>
    %851 = tpu.matmul %775, %850, %cst_612 {dimension_numbers = #tpu.dot_dimension_numbers<[1], [0], [0], [1], [0, 0, 1, 1], [], []>} : vector<4x16xf32>, vector<16x64xf32>, vector<4x64xf32> -> vector<4x64xf32>
    %cst_613 = arith.constant 5.000000e-01 : f32
    %852 = vector.broadcast %cst_613 : f32 to vector<4x64xf32>
    %853 = arith.mulf %851, %852 : vector<4x64xf32>
    %854 = vector.broadcast %776 : vector<1x64xf32> to vector<4x64xf32>
    %855 = arith.addf %853, %854 : vector<4x64xf32>
    %cst_614 = arith.constant dense<0xFF800000> : vector<4xf32>
    %856 = vector.multi_reduction <maximumf>, %855, %cst_614 [1] : vector<4x64xf32> to vector<4xf32>
    %857 = vector.shape_cast %856 : vector<4xf32> to vector<4x1xf32>
    %858 = vector.broadcast %857 : vector<4x1xf32> to vector<4x64xf32>
    %859 = arith.subf %855, %858 : vector<4x64xf32>
    %860 = math.exp %859 : vector<4x64xf32>
    %cst_615 = arith.constant dense<0.000000e+00> : vector<4xf32>
    %861 = vector.multi_reduction <add>, %860, %cst_615 [1] : vector<4x64xf32> to vector<4xf32>
    %862 = vector.shape_cast %861 : vector<4xf32> to vector<4x1xf32>
    %863 = vector.broadcast %862 : vector<4x1xf32> to vector<4x64xf32>
    %864 = arith.divf %860, %863 : vector<4x64xf32>
    %cst_616 = arith.constant dense<0.000000e+00> : vector<4x16xf32>
    %865 = tpu.matmul %864, %847, %cst_616 {dimension_numbers = #tpu.dot_dimension_numbers<[1], [1], [0], [0], [0, 0, 1, 0], [], []>} : vector<4x64xf32>, vector<16x64xf32>, vector<4x16xf32> -> vector<4x16xf32>
    %866 = arith.mulf %865, %775 : vector<4x16xf32>
    %cst_617 = arith.constant dense<0.000000e+00> : vector<16xf32>
    %867 = vector.multi_reduction <add>, %866, %cst_617 [0] : vector<4x16xf32> to vector<16xf32>
    %868 = vector.shape_cast %867 : vector<16xf32> to vector<1x16xf32>
    %869 = tpu.concatenate %799, %822, %845, %868 in 0 : vector<1x16xf32>, vector<1x16xf32>, vector<1x16xf32>, vector<1x16xf32> -> vector<4x16xf32>
    %c0_618 = arith.constant 0 : index
    %c0_619 = arith.constant 0 : index
    %870 = vector.load %arg24[%c0_618, %c0_619] : memref<16x512xf32, #tpu.memory_space<vmem>>, vector<16x512xf32>
    %cst_620 = arith.constant dense<0.000000e+00> : vector<4x512xf32>
    %871 = tpu.matmul %869, %870, %cst_620 {dimension_numbers = #tpu.dot_dimension_numbers<[1], [0], [0], [1], [0, 0, 1, 1], [], []>} : vector<4x16xf32>, vector<16x512xf32>, vector<4x512xf32> -> vector<4x512xf32>
    %c0_621 = arith.constant 0 : index
    %c0_622 = arith.constant 0 : index
    %872 = vector.load %arg25[%c0_621, %c0_622] : memref<1x512xf32, #tpu.memory_space<vmem>>, vector<1x512xf32>
    %873 = vector.broadcast %872 : vector<1x512xf32> to vector<4x512xf32>
    %874 = arith.addf %871, %873 : vector<4x512xf32>
    %875 = arith.mulf %874, %874 : vector<4x512xf32>
    %cst_623 = arith.constant dense<0.000000e+00> : vector<4xf32>
    %876 = vector.multi_reduction <add>, %875, %cst_623 [1] : vector<4x512xf32> to vector<4xf32>
    %877 = vector.shape_cast %876 : vector<4xf32> to vector<4x1xf32>
    %878 = math.sqrt %877 : vector<4x1xf32>
    %cst_624 = arith.constant 9.99999996E-13 : f32
    %879 = vector.broadcast %cst_624 : f32 to vector<4x1xf32>
    %880 = arith.maximumf %878, %879 : vector<4x1xf32>
    %881 = vector.broadcast %880 : vector<4x1xf32> to vector<4x512xf32>
    %882 = arith.divf %874, %881 : vector<4x512xf32>
    %883 = arith.mulf %882, %882 : vector<4x512xf32>
    %cst_625 = arith.constant dense<0.000000e+00> : vector<4xf32>
    %884 = vector.multi_reduction <add>, %883, %cst_625 [1] : vector<4x512xf32> to vector<4xf32>
    %885 = vector.shape_cast %884 : vector<4xf32> to vector<4x1xf32>
    %886 = math.sqrt %885 : vector<4x1xf32>
    %887 = vector.broadcast %886 : vector<4x1xf32> to vector<4x512xf32>
    %888 = arith.divf %882, %887 : vector<4x512xf32>
    %c0_626 = arith.constant 0 : index
    %c0_627 = arith.constant 0 : index
    %889 = vector.load %arg34[%c0_626, %c0_627] : memref<40x512xf32, #tpu.memory_space<vmem>>, vector<40x512xf32>
    %cst_628 = arith.constant dense<0.000000e+00> : vector<4x40xf32>
    %890 = tpu.matmul %888, %889, %cst_628 {dimension_numbers = #tpu.dot_dimension_numbers<[1], [1], [0], [0], [0, 0, 1, 0], [], []>} : vector<4x512xf32>, vector<40x512xf32>, vector<4x40xf32> -> vector<4x40xf32>
    %cst_629 = arith.constant 1.000000e+02 : f32
    %891 = vector.broadcast %cst_629 : f32 to vector<4x40xf32>
    %892 = arith.mulf %891, %890 : vector<4x40xf32>
    %cst_630 = arith.constant dense<0xFF800000> : vector<4xf32>
    %893 = vector.multi_reduction <maximumf>, %892, %cst_630 [1] : vector<4x40xf32> to vector<4xf32>
    %894 = vector.shape_cast %893 : vector<4xf32> to vector<4x1xf32>
    %895 = vector.broadcast %894 : vector<4x1xf32> to vector<4x40xf32>
    %896 = arith.subf %892, %895 : vector<4x40xf32>
    %897 = math.exp %896 : vector<4x40xf32>
    %cst_631 = arith.constant dense<0.000000e+00> : vector<4xf32>
    %898 = vector.multi_reduction <add>, %897, %cst_631 [1] : vector<4x40xf32> to vector<4xf32>
    %899 = vector.shape_cast %898 : vector<4xf32> to vector<4x1xf32>
    %900 = vector.broadcast %899 : vector<4x1xf32> to vector<4x40xf32>
    %901 = arith.divf %897, %900 : vector<4x40xf32>
    %902 = tpu.iota {dimensions = array<i32: 1>} : vector<4x40xi32>
    %cst_632 = arith.constant dense<0xFF800000> : vector<4xf32>
    %903 = vector.multi_reduction <maximumf>, %901, %cst_632 [1] : vector<4x40xf32> to vector<4xf32>
    %904 = vector.shape_cast %903 : vector<4xf32> to vector<4x1xf32>
    %905 = vector.broadcast %904 : vector<4x1xf32> to vector<4x40xf32>
    %906 = arith.cmpf oeq, %901, %905 : vector<4x40xf32>
    %c40_i32 = arith.constant 40 : i32
    %907 = vector.broadcast %c40_i32 : i32 to vector<4x40xi32>
    %908 = arith.select %906, %902, %907 : vector<4x40xi1>, vector<4x40xi32>
    %cst_633 = arith.constant dense<2147483647> : vector<4xi32>
    %909 = vector.multi_reduction <minsi>, %908, %cst_633 [1] : vector<4x40xi32> to vector<4xi32>
    %910 = vector.shape_cast %909 : vector<4xi32> to vector<4x1xi32>
    %911 = vector.broadcast %910 : vector<4x1xi32> to vector<4x40xi32>
    %912 = arith.cmpi eq, %902, %911 : vector<4x40xi32>
    %cst_634 = arith.constant 1.000000e+00 : f32
    %cst_635 = arith.constant 0.000000e+00 : f32
    %913 = vector.broadcast %cst_634 : f32 to vector<4x40xf32>
    %914 = vector.broadcast %cst_635 : f32 to vector<4x40xf32>
    %915 = arith.select %912, %913, %914 : vector<4x40xi1>, vector<4x40xf32>
    %c0_636 = arith.constant 0 : index
    %c0_637 = arith.constant 0 : index
    %916 = vector.load %arg33[%c0_636, %c0_637] : memref<6x40xf32, #tpu.memory_space<vmem>>, vector<6x40xf32>
    %cst_638 = arith.constant dense<0.000000e+00> : vector<6x4xf32>
    %917 = tpu.matmul %916, %915, %cst_638 {dimension_numbers = #tpu.dot_dimension_numbers<[1], [1], [0], [0], [0, 0, 1, 0], [], []>} : vector<6x40xf32>, vector<4x40xf32>, vector<6x4xf32> -> vector<6x4xf32>
    %c0_639 = arith.constant 0 : index
    %c0_640 = arith.constant 0 : index
    %918 = vector.load %arg32[%c0_639, %c0_640] : memref<4x64xf32, #tpu.memory_space<vmem>>, vector<4x64xf32>
    %cst_641 = arith.constant dense<0.000000e+00> : vector<6x64xf32>
    %919 = tpu.matmul %917, %918, %cst_641 {dimension_numbers = #tpu.dot_dimension_numbers<[1], [0], [0], [1], [0, 0, 1, 1], [], []>} : vector<6x4xf32>, vector<4x64xf32>, vector<6x64xf32> -> vector<6x64xf32>
    %920 = tpu.iota {dimensions = array<i32: 0>} : vector<6x64xi32>
    %cst_642 = arith.constant dense<0xFF800000> : vector<64xf32>
    %921 = vector.multi_reduction <maximumf>, %919, %cst_642 [0] : vector<6x64xf32> to vector<64xf32>
    %922 = vector.shape_cast %921 : vector<64xf32> to vector<1x64xf32>
    %923 = vector.broadcast %922 : vector<1x64xf32> to vector<6x64xf32>
    %924 = arith.cmpf oeq, %919, %923 : vector<6x64xf32>
    %c6_i32 = arith.constant 6 : i32
    %925 = vector.broadcast %c6_i32 : i32 to vector<6x64xi32>
    %926 = arith.select %924, %920, %925 : vector<6x64xi1>, vector<6x64xi32>
    %cst_643 = arith.constant dense<2147483647> : vector<64xi32>
    %927 = vector.multi_reduction <minsi>, %926, %cst_643 [0] : vector<6x64xi32> to vector<64xi32>
    %928 = vector.shape_cast %927 : vector<64xi32> to vector<1x64xi32>
    %c0_i32 = arith.constant 0 : i32
    %929 = vector.broadcast %c0_i32 : i32 to vector<1x64xi32>
    %930 = arith.cmpi sgt, %928, %929 : vector<1x64xi32>
    %cst_644 = arith.constant 0.0441941731 : f32
    %cst_645 = arith.constant 0.000000e+00 : f32
    %931 = vector.broadcast %cst_644 : f32 to vector<1x64xf32>
    %932 = vector.broadcast %cst_645 : f32 to vector<1x64xf32>
    %933 = arith.select %930, %931, %932 : vector<1x64xi1>, vector<1x64xf32>
    %c0_646 = arith.constant 0 : index
    %c0_647 = arith.constant 0 : index
    %c0_648 = arith.constant 0 : index
    %934 = vector.load %arg35[%c0_646, %c0_647, %c0_648] : memref<1x1x64xf32, #tpu.memory_space<vmem>>, vector<1x1x64xf32>
    %935 = vector.shape_cast %934 : vector<1x1x64xf32> to vector<1x64xf32>
    %936 = vector.shape_cast %933 : vector<1x64xf32> to vector<1x1x64xf32>
    tpu.vector_store %arg35[%c0_646, %c0_647, %c0_648], %936 {strides = array<i32>} : memref<1x1x64xf32, #tpu.memory_space<vmem>>, vector<1x1x64xf32>,
    return
  }
  func.func @transform_0(%arg0: i32) -> (i32, i32, i32, i32) {
    %c0_i32 = arith.constant 0 : i32
    %c0_i32_0 = arith.constant 0 : i32
    %c0_i32_1 = arith.constant 0 : i32
    %c0_i32_2 = arith.constant 0 : i32
    return %arg0, %c0_i32, %c0_i32_0, %c0_i32_1 : i32, i32, i32, i32
  }
  func.func @transform_1(%arg0: i32) -> (i32, i32, i32) {
    %c0_i32 = arith.constant 0 : i32
    %c0_i32_0 = arith.constant 0 : i32
    %c0_i32_1 = arith.constant 0 : i32
    %c0_i32_2 = arith.constant 0 : i32
    return %c0_i32, %c0_i32_0, %c0_i32_1 : i32, i32, i32
  }
  func.func @transform_2(%arg0: i32) -> (i32, i32) {
    %c0_i32 = arith.constant 0 : i32
    %c0_i32_0 = arith.constant 0 : i32
    %c0_i32_1 = arith.constant 0 : i32
    return %c0_i32, %c0_i32_0 : i32, i32
  }
  func.func @transform_3(%arg0: i32) -> (i32, i32, i32) {
    %c0_i32 = arith.constant 0 : i32
    %c0_i32_0 = arith.constant 0 : i32
    %c0_i32_1 = arith.constant 0 : i32
    %c0_i32_2 = arith.constant 0 : i32
    return %c0_i32, %c0_i32_0, %c0_i32_1 : i32, i32, i32
  }
  func.func @transform_4(%arg0: i32) -> (i32, i32) {
    %c0_i32 = arith.constant 0 : i32
    %c0_i32_0 = arith.constant 0 : i32
    %c0_i32_1 = arith.constant 0 : i32
    return %c0_i32, %c0_i32_0 : i32, i32
  }
  func.func @transform_5(%arg0: i32) -> (i32, i32, i32) {
    %c0_i32 = arith.constant 0 : i32
    %c0_i32_0 = arith.constant 0 : i32
    %c0_i32_1 = arith.constant 0 : i32
    %c0_i32_2 = arith.constant 0 : i32
    return %c0_i32, %c0_i32_0, %c0_i32_1 : i32, i32, i32
  }
  func.func @transform_6(%arg0: i32) -> (i32, i32) {
    %c0_i32 = arith.constant 0 : i32
    %c0_i32_0 = arith.constant 0 : i32
    %c0_i32_1 = arith.constant 0 : i32
    return %c0_i32, %c0_i32_0 : i32, i32
  }
  func.func @transform_7(%arg0: i32) -> (i32, i32, i32) {
    %c0_i32 = arith.constant 0 : i32
    %c0_i32_0 = arith.constant 0 : i32
    %c0_i32_1 = arith.constant 0 : i32
    %c0_i32_2 = arith.constant 0 : i32
    return %c0_i32, %c0_i32_0, %c0_i32_1 : i32, i32, i32
  }
  func.func @transform_8(%arg0: i32) -> (i32, i32, i32) {
    %c0_i32 = arith.constant 0 : i32
    %c0_i32_0 = arith.constant 0 : i32
    %c0_i32_1 = arith.constant 0 : i32
    %c0_i32_2 = arith.constant 0 : i32
    return %c0_i32, %c0_i32_0, %c0_i32_1 : i32, i32, i32
  }
  func.func @transform_9(%arg0: i32) -> (i32, i32, i32, i32) {
    %c0_i32 = arith.constant 0 : i32
    %c0_i32_0 = arith.constant 0 : i32
    %c0_i32_1 = arith.constant 0 : i32
    %c0_i32_2 = arith.constant 0 : i32
    %c0_i32_3 = arith.constant 0 : i32
    return %c0_i32, %c0_i32_0, %c0_i32_1, %c0_i32_2 : i32, i32, i32, i32
  }
  func.func @transform_10(%arg0: i32) -> (i32, i32, i32) {
    %c0_i32 = arith.constant 0 : i32
    %c0_i32_0 = arith.constant 0 : i32
    %c0_i32_1 = arith.constant 0 : i32
    %c0_i32_2 = arith.constant 0 : i32
    return %c0_i32, %c0_i32_0, %c0_i32_1 : i32, i32, i32
  }
  func.func @transform_11(%arg0: i32) -> (i32, i32, i32) {
    %c0_i32 = arith.constant 0 : i32
    %c0_i32_0 = arith.constant 0 : i32
    %c0_i32_1 = arith.constant 0 : i32
    %c0_i32_2 = arith.constant 0 : i32
    return %c0_i32, %c0_i32_0, %c0_i32_1 : i32, i32, i32
  }
  func.func @transform_12(%arg0: i32) -> (i32, i32, i32) {
    %c0_i32 = arith.constant 0 : i32
    %c0_i32_0 = arith.constant 0 : i32
    %c0_i32_1 = arith.constant 0 : i32
    %c0_i32_2 = arith.constant 0 : i32
    return %c0_i32, %c0_i32_0, %c0_i32_1 : i32, i32, i32
  }
  func.func @transform_13(%arg0: i32) -> (i32, i32, i32) {
    %c0_i32 = arith.constant 0 : i32
    %c0_i32_0 = arith.constant 0 : i32
    %c0_i32_1 = arith.constant 0 : i32
    %c0_i32_2 = arith.constant 0 : i32
    return %c0_i32, %c0_i32_0, %c0_i32_1 : i32, i32, i32
  }
  func.func @transform_14(%arg0: i32) -> (i32, i32, i32) {
    %c0_i32 = arith.constant 0 : i32
    %c0_i32_0 = arith.constant 0 : i32
    %c0_i32_1 = arith.constant 0 : i32
    %c0_i32_2 = arith.constant 0 : i32
    return %c0_i32, %c0_i32_0, %c0_i32_1 : i32, i32, i32
  }
  func.func @transform_15(%arg0: i32) -> (i32, i32, i32) {
    %c0_i32 = arith.constant 0 : i32
    %c0_i32_0 = arith.constant 0 : i32
    %c0_i32_1 = arith.constant 0 : i32
    %c0_i32_2 = arith.constant 0 : i32
    return %c0_i32, %c0_i32_0, %c0_i32_1 : i32, i32, i32
  }
  func.func @transform_16(%arg0: i32) -> (i32, i32) {
    %c0_i32 = arith.constant 0 : i32
    %c0_i32_0 = arith.constant 0 : i32
    %c0_i32_1 = arith.constant 0 : i32
    return %c0_i32, %c0_i32_0 : i32, i32
  }
  func.func @transform_17(%arg0: i32) -> (i32, i32) {
    %c0_i32 = arith.constant 0 : i32
    %c0_i32_0 = arith.constant 0 : i32
    %c0_i32_1 = arith.constant 0 : i32
    return %c0_i32, %c0_i32_0 : i32, i32
  }
  func.func @transform_18(%arg0: i32) -> (i32, i32) {
    %c0_i32 = arith.constant 0 : i32
    %c0_i32_0 = arith.constant 0 : i32
    %c0_i32_1 = arith.constant 0 : i32
    return %c0_i32, %c0_i32_0 : i32, i32
  }
  func.func @transform_19(%arg0: i32) -> (i32, i32) {
    %c0_i32 = arith.constant 0 : i32
    %c0_i32_0 = arith.constant 0 : i32
    %c0_i32_1 = arith.constant 0 : i32
    return %c0_i32, %c0_i32_0 : i32, i32
  }
  func.func @transform_20(%arg0: i32) -> (i32, i32) {
    %c0_i32 = arith.constant 0 : i32
    %c0_i32_0 = arith.constant 0 : i32
    %c0_i32_1 = arith.constant 0 : i32
    return %c0_i32, %c0_i32_0 : i32, i32
  }
  func.func @transform_21(%arg0: i32) -> (i32, i32) {
    %c0_i32 = arith.constant 0 : i32
    %c0_i32_0 = arith.constant 0 : i32
    %c0_i32_1 = arith.constant 0 : i32
    return %c0_i32, %c0_i32_0 : i32, i32
  }
  func.func @transform_22(%arg0: i32) -> (i32, i32) {
    %c0_i32 = arith.constant 0 : i32
    %c0_i32_0 = arith.constant 0 : i32
    %c0_i32_1 = arith.constant 0 : i32
    return %c0_i32, %c0_i32_0 : i32, i32
  }
  func.func @transform_23(%arg0: i32) -> (i32, i32) {
    %c0_i32 = arith.constant 0 : i32
    %c0_i32_0 = arith.constant 0 : i32
    %c0_i32_1 = arith.constant 0 : i32
    return %c0_i32, %c0_i32_0 : i32, i32
  }
  func.func @transform_24(%arg0: i32) -> (i32, i32) {
    %c0_i32 = arith.constant 0 : i32
    %c0_i32_0 = arith.constant 0 : i32
    %c0_i32_1 = arith.constant 0 : i32
    return %c0_i32, %c0_i32_0 : i32, i32
  }
  func.func @transform_25(%arg0: i32) -> (i32, i32) {
    %c0_i32 = arith.constant 0 : i32
    %c0_i32_0 = arith.constant 0 : i32
    %c0_i32_1 = arith.constant 0 : i32
    return %c0_i32, %c0_i32_0 : i32, i32
  }
  func.func @transform_26(%arg0: i32) -> (i32, i32) {
    %c0_i32 = arith.constant 0 : i32
    %c0_i32_0 = arith.constant 0 : i32
    %c0_i32_1 = arith.constant 0 : i32
    return %c0_i32, %c0_i32_0 : i32, i32
  }
  func.func @transform_27(%arg0: i32) -> (i32, i32) {
    %c0_i32 = arith.constant 0 : i32
    %c0_i32_0 = arith.constant 0 : i32
    %c0_i32_1 = arith.constant 0 : i32
    return %c0_i32, %c0_i32_0 : i32, i32
  }
  func.func @transform_28(%arg0: i32) -> (i32, i32) {
    %c0_i32 = arith.constant 0 : i32
    %c0_i32_0 = arith.constant 0 : i32
    %c0_i32_1 = arith.constant 0 : i32
    return %c0_i32, %c0_i32_0 : i32, i32
  }
  func.func @transform_29(%arg0: i32) -> (i32, i32) {
    %c0_i32 = arith.constant 0 : i32
    %c0_i32_0 = arith.constant 0 : i32
    %c0_i32_1 = arith.constant 0 : i32
    return %c0_i32, %c0_i32_0 : i32, i32
  }
  func.func @transform_30(%arg0: i32) -> (i32, i32) {
    %c0_i32 = arith.constant 0 : i32
    %c0_i32_0 = arith.constant 0 : i32
    %c0_i32_1 = arith.constant 0 : i32
    return %c0_i32, %c0_i32_0 : i32, i32
  }
  func.func @transform_31(%arg0: i32) -> (i32, i32) {
    %c0_i32 = arith.constant 0 : i32
    %c0_i32_0 = arith.constant 0 : i32
    %c0_i32_1 = arith.constant 0 : i32
    return %c0_i32, %c0_i32_0 : i32, i32
  }
  func.func @transform_32(%arg0: i32) -> (i32, i32) {
    %c0_i32 = arith.constant 0 : i32
    %c0_i32_0 = arith.constant 0 : i32
    %c0_i32_1 = arith.constant 0 : i32
    return %c0_i32, %c0_i32_0 : i32, i32
  }
  func.func @transform_33(%arg0: i32) -> (i32, i32) {
    %c0_i32 = arith.constant 0 : i32
    %c0_i32_0 = arith.constant 0 : i32
    %c0_i32_1 = arith.constant 0 : i32
    return %c0_i32, %c0_i32_0 : i32, i32
  }
  func.func @transform_34(%arg0: i32) -> (i32, i32, i32) {
    %c0_i32 = arith.constant 0 : i32
    %c0_i32_0 = arith.constant 0 : i32
    %c0_i32_1 = arith.constant 0 : i32
    return %arg0, %c0_i32, %c0_i32_0 : i32, i32, i32
  }
}

</mosaic_0001>

<bundles_post_ra>
// kernel: remoteclip_text_forward.1
= control target key start
LH: loop header
LB: loop body
LE: loop exit
PB: predicated region body
PF: predicated region fallthrough
CT: control target
= control target key end

     0   :  { %s10492_s6 = smov 1   ;;  %s10493_s10 = smov 2   ;;  %s11949_s0 = inlined_call_operand.smem [shape: u32[35], index: -1, kind: input, shape index: {}] }
   0x1   :  { %s10563_s5 = sld [smem:[%s11949_s0]]   ;;  %s10494_s14 = smov 3  }
   0x2   :  { %s10568_s9 = sld [smem:[%s11949_s0 + %s10492_s6]]   ;;  %s10495_s18 = smov 4  }
   0x3   :  { %s10573_s13 = sld [smem:[%s11949_s0 + %s10493_s10]]   ;;  %s10496_s22 = smov 5  }
   0x4   :  { %s10578_s17 = sld [smem:[%s11949_s0 + %s10494_s14]]   ;;  %s10497_s26 = smov 6  }
   0x5   :  { %s10583_s21 = sld [smem:[%s11949_s0 + %s10495_s18]]   ;;  %s10498_s30 = smov 7  }
   0x6   :  { %s10588_s25 = sld [smem:[%s11949_s0 + %s10496_s22]]   ;;  %s10499_s4 = smov 8  }
   0x7   :  { %12002 = sst [smem:[#allocation2_spill]] %s10563_s5  ;;  %s10500_s10 = smov 9  }
   0x8   :  { %12003 = sst [smem:[#allocation3_spill]] %s10568_s9  ;;  %s10501_s15 = smov 10  }
   0x9   :  { %12004 = sst [smem:[#allocation4_spill]] %s10573_s13  ;;  %s10502_s20 = smov 11  }
   0xa   :  { %12005 = sst [smem:[#allocation5_spill]] %s10578_s17  ;;  %s10504_s1 = smov 13  }
   0xb   :  { %12006 = sst [smem:[#allocation6_spill]] %s10583_s21  ;;  %s10505_s7 = smov 14  }
   0xc   :  { %s10593_s29 = sld [smem:[%s11949_s0 + %s10497_s26]]   ;;  %s10503_s26 = smov 12  }
   0xd   :  { %s10598_s3 = sld [smem:[%s11949_s0 + %s10498_s30]]   ;;  %s10507_s22 = smov 16  }
   0xe   :  { %s10603_s8 = sld [smem:[%s11949_s0 + %s10499_s4]]   ;;  %s10508_s28 = smov 17  }
   0xf   :  { %s10608_s14 = sld [smem:[%s11949_s0 + %s10500_s10]]  }
  0x10   :  { %s10613_s19 = sld [smem:[%s11949_s0 + %s10501_s15]]   ;;  %s10506_s15 = smov 15  }
  0x11   :  { %s10618_s24 = sld [smem:[%s11949_s0 + %s10502_s20]]  }
  0x12   :  { %s10623_s30 = sld [smem:[%s11949_s0 + %s10503_s26]]  }
  0x13   :  { %12007 = sst [smem:[#allocation7_spill]] %s10598_s3 }
  0x14   :  { %s10628_s6 = sld [smem:[%s11949_s0 + %s10504_s1]]  }
  0x15   :  { %12008 = sst [smem:[#allocation8_spill]] %s10608_s14 }
  0x16   :  { %s10633_s12 = sld [smem:[%s11949_s0 + %s10505_s7]]   ;;  %s10509_s7 = smov 18  }
  0x17   :  { %12009 = sst [smem:[#allocation9_spill]] %s10618_s24 }
  0x18   :  { %s10638_s20 = sld [smem:[%s11949_s0 + %s10506_s15]]   ;;  %s10510_s15 = smov 19  }
  0x19   :  { %s10643_s27 = sld [smem:[%s11949_s0 + %s10507_s22]]   ;;  %s10511_s22 = smov 20  }
  0x1a   :  { %12010 = sst [smem:[#allocation10_spill]] %s10628_s6 }
  0x1b   :  { %s10648_s4 = sld [smem:[%s11949_s0 + %s10508_s28]]   ;;  %s10512_s28 = smov 21  }
  0x1c   :  { %12011 = sst [smem:[#allocation11_spill]] %s10633_s12 }
  0x1d   :  { %s10653_s24 = sld [smem:[%s11949_s0 + %s10509_s7]]   ;;  %s10513_s7 = smov 22  }
  0x1e   :  { %12012 = sst [smem:[#allocation12_spill]] %s10638_s20 }
  0x1f   :  { %s10658_s14 = sld [smem:[%s11949_s0 + %s10510_s15]]   ;;  %s10514_s15 = smov 23  }
  0x20   :  { %s10663_s20 = sld [smem:[%s11949_s0 + %s10511_s22]]   ;;  %s10515_s22 = smov 24  }
  0x21   :  { %12013 = sst [smem:[#allocation13_spill]] %s10648_s4 }
  0x22   :  { %s10668_s4 = sld [smem:[%s11949_s0 + %s10512_s28]]   ;;  %s10516_s28 = smov 25  }
  0x23   :  { %12014 = sst [smem:[#allocation14_spill]] %s10653_s24 }
  0x24   :  { %s10673_s24 = sld [smem:[%s11949_s0 + %s10513_s7]]   ;;  %s10517_s7 = smov 26  }
  0x25   :  { %12015 = sst [smem:[#allocation15_spill]] %s10658_s14 }
  0x26   :  { %12016 = sst [smem:[#allocation16_spill]] %s10663_s20 }
  0x27   :  { %s10678_s14 = sld [smem:[%s11949_s0 + %s10514_s15]]   ;;  %s10518_s15 = smov 27  }
  0x28   :  { %12017 = sst [smem:[#allocation17_spill]] %s10668_s4 }
  0x29   :  { %s10683_s20 = sld [smem:[%s11949_s0 + %s10515_s22]]   ;;  %s10519_s22 = smov 28  }
  0x2a   :  { %12018 = sst [smem:[#allocation18_spill]] %s10673_s24 }
  0x2b   :  { %s10688_s4 = sld [smem:[%s11949_s0 + %s10516_s28]]   ;;  %s10520_s28 = smov 29  }
  0x2c   :  { %s10693_s24 = sld [smem:[%s11949_s0 + %s10517_s7]]   ;;  %s10521_s7 = smov 30  }
  0x2d   :  { %12019 = sst [smem:[#allocation19_spill]] %s10678_s14 }
  0x2e   :  { %s10698_s14 = sld [smem:[%s11949_s0 + %s10518_s15]]   ;;  %s10522_s15 = smov 31  }
  0x2f   :  { %12020 = sst [smem:[#allocation20_spill]] %s10683_s20 }
  0x30   :  { %s10703_s20 = sld [smem:[%s11949_s0 + %s10519_s22]]   ;;  %s10523_s22 = smov 32  }
  0x31   :  { %12021 = sst [smem:[#allocation21_spill]] %s10688_s4 }
  0x32   :  { %12022 = sst [smem:[#allocation22_spill]] %s10693_s24 }
  0x33   :  { %s10708_s4 = sld [smem:[%s11949_s0 + %s10520_s28]]   ;;  %s10524_s28 = smov 33  }
  0x34   :  { %12023 = sst [smem:[#allocation23_spill]] %s10698_s14 }
  0x35   :  { %s10713_s24 = sld [smem:[%s11949_s0 + %s10521_s7]]   ;;  %s10525_s7 = smov 34  }
  0x36   :  { %12024 = sst [smem:[#allocation24_spill]] %s10703_s20 }
  0x37   :  { %s10718_s14 = sld [smem:[%s11949_s0 + %s10522_s15]]   ;;  %s10735_s15 = smov 0  }
  0x38   :  { %s10723_s20 = sld [smem:[%s11949_s0 + %s10523_s22]]  }
  0x39   :  { %12025 = sst [smem:[#allocation25_spill]] %s10708_s4 }
  0x3a   :  { %s10728_s4 = sld [smem:[%s11949_s0 + %s10524_s28]]  }
  0x3b   :  { %12026 = sst [smem:[#allocation26_spill]] %s10713_s24 }
  0x3c   :  { %s10733_s24 = sld [smem:[%s11949_s0 + %s10525_s7]]  }
  0x3d LB: > { %s12027_s3 = sld [smem:[#allocation7_spill]]  ;;  %s9613_s16 = sadd.s32 4294967295, %s10490_s15   ;;  %s10490_s15 = sphi %s10735_s15, %s79_s15  }
  0x3e   : > { %s12028_s17 = sld [smem:[#allocation5_spill]]  ;;  %p9617_p0 = scmp.ge.s32.totalorder %s10490_s15, 1 }
  0x3f   : > { %s12029_s12 = sld [smem:[#allocation11_spill]]  ;;  %p947_p1 = scmp.lt.s32.totalorder %s10490_s15, 3 }
  0x40   : > { %s12030_s9 = sld [smem:[#allocation3_spill]] }
  0x41   : > { %s12031_s6 = sld [smem:[#allocation10_spill]]  ;;  %p948_p2 = pnand %p9617_p0, %p947_p1 }
  0x42   : > { %p1031_p3 = scmp.lt.s32.totalorder (!%p948_p2), %s9613_s16, 1  ;;  %s12032_s5 = sld [smem:[#allocation2_spill]] (!%p948_p2) }
  0x43   : > { %951 = sbr.rel (%p948_p2) target bundleno = 8334 (0x208e), region = 156  ;;  %s10527_s22 = smov (!%p948_p2), 16  }
  0x44   : > { %s10528_s23 = smov (!%p948_p2), 17   ;;  %s12033_s13 = sld [smem:[#allocation4_spill]] (!%p948_p2) }
  0x45   : > { %s11964_s26 = smov (!%p948_p2), 1   ;;  %s11972_s28 = smov (!%p948_p2), 127  }
  0x46   : > { %s12034_s21 = sld [smem:[#allocation6_spill]] (!%p948_p2)  ;;  %s10532_s1 = smov (!%p948_p2), 15  }
  0x47   : > { %s10533_s2 = smov (!%p948_p2), 113   ;;  %s10534_s7 = smov (!%p948_p2), 112  }
  0x48   : > { %s12069_s16 = smov (!%p1031_p3, %s9613_s16), 1  ;;  %v10526_v0 = vmov 0.0   ;;  %v10530_v7 = vmov 0   ;;  %v1055_v9 = vlaneseq  ;;  %v9622_v13 = vld [vmem:[%s12031_s6 + $0x2] sm:$0x3]  ;;  %vm1077_vm0 = vcmask 130048  }
  0x49   : > { %1174 = vmatprep.mubr.f32.mxu0 %v10526_v0  ;;  %1254 = vmatprep.mubr.f32.mxu1 %v10526_v0  ;;  %s9874_s0 = sshll.u32 %s12069_s16, 5  ;;  %v9630_v18 = vld [vmem:[%s12031_s6 + $0x4] sm:$0x3]  ;;  %v1053_v19 = vld [vmem:[%s12031_s6] sm:$0x3]  ;;  %vm1103_vm1 = vcmask 1042432  }
  0x4a   : > { %s10749_s18 = scalar_lea.vmem %s12032_s5, %s9874_s0  ;;  %10442 = vset.pattern.permute.xlu0 %v10530_v7  ;;  %10443 = vset.pattern.permute.xlu1 %v10530_v7  ;;  %v1921_v8 = vld [vmem:[%s12033_s13] sm:$0xff]  ;;  %v10796_v10 = vshrl.u32 %v1055_v9, 7  ;;  %vm1048_vm2 = vcmask 138240   ;;  %v9623_v31 = vld [vmem:[%s12030_s9 + $0x8] sm:$0xff]  ;;  %vm1099_vm3 = vcmask 23552   ;;  %vm1378_vm4 = vcmask 7168  }
  0x4b   : > { %v10752_v1 = vld [vmem:[%s10749_s18 + $0x10] sm:$0x77]  ;;  %v10755_v2 = vld [vmem:[%s10749_s18 + $0x18] sm:$0x77]  ;;  %v10774_v5 = vld [vmem:[%s10749_s18 + $0x8] sm:$0x77] }
  0x4c   : > { %1075 = vrot.lane.b32.xlu0 %v10752_v1, %s10527_s22  ;;  %1046 = vrot.lane.b32.xlu1 %v10755_v2, %s10528_s23  ;;  %v10763_v3 = vcombine.high %v10752_v1, %v10752_v1  ;;  %v10771_v4 = vcombine.high %v10755_v2, %v10755_v2  ;;  %v10782_v6 = vcombine.high %v10774_v5, %v10774_v5  ;;  %v10799_v11 = vsub.s32 0, %v10796_v10  ;;  %v9636_v26 = vld [vmem:[%s12031_s6 + $0x6] sm:$0x3]  ;;  %v9649_v45 = vld [vmem:[%s12031_s6 + $0xc] sm:$0x3]  ;;  %s10535_s10 = smov 111  }
  0x4d   : > { %v10802_v12 = vsub.s32 1, %v10796_v10  ;;  %v1482_v36 = vld [vmem:[%s10749_s18] sm:$0x77]  ;;  %v9631_v47 = vld [vmem:[%s12030_s9 + $0x10] sm:$0xff]  ;;  %v9637_v57 = vld [vmem:[%s12030_s9 + $0x18] sm:$0xff]  ;;  %vm1984_vm5 = vcmask 64512  }
  0x4e   : > { %v1088_v16 = vrot.slane %v9622_v13, %v10799_v11  ;;  %v1276_v24 = vrot.slane %v9630_v18, %v10799_v11  ;;  %v1058_v29 = vrot.slane %v1053_v19, %v10799_v11  ;;  %v1389_v34 = vrot.slane %v9636_v26, %v10799_v11  ;;  %v1067_v46 = vld [vmem:[%s12030_s9] sm:$0xff]  ;;  %s11989_s11 = smov 8   ;;  %s11991_s0 = smov 72  }
  0x4f   : > { %v1092_v17 = vrot.slane %v9622_v13, %v10802_v12  ;;  %v1280_v25 = vrot.slane %v9630_v18, %v10802_v12  ;;  %v1062_v30 = vrot.slane %v1053_v19, %v10802_v12  ;;  %v1393_v35 = vrot.slane %v9636_v26, %v10802_v12  ;;  %v9641_v58 = vld [vmem:[%s12030_s9 + $0x20] sm:$0xff]  ;;  %v9645_v13 = vld [vmem:[%s12030_s9 + $0x28] sm:$0xff]  ;;  %s11993_s18 = smov 9   ;;  %s12045_s5 = smov 121  }
  0x50   : > { %1072 = vrot.lane.b32.xlu0 %v10763_v3, %s10527_s22  ;;  %1264 = vrot.lane.b32.xlu1 %v10755_v2, %s10527_s22  ;;  %v1486_v48 = vcombine.high %v1482_v36, %v1482_v36  ;;  %v1664_v53 = vrot.slane %v9649_v45, %v10799_v11  ;;  %v1668_v56 = vrot.slane %v9649_v45, %v10802_v12  ;;  %vm2138_vm6 = vcmask 121856   ;;  %s12048_s6 = smov 55   ;;  %s12051_s13 = smov 72  }
  0x51   : > { %vm2420_vm7 = vcmask 1039360   ;;  %vm2523_vm8 = vcmask 924672   ;;  %vm2626_vm9 = vcmask 916480   ;;  %vm2729_vm10 = vcmask 908288  }
  0x52   : > { %vm10536_vm11 = vmmov 0   ;;  %vm3944_vm12 = vcmask 72704   ;;  %vm4125_vm13 = vcmask 56320   ;;  %vm4386_vm14 = vcmask 515072  }
  0x53   : > { %vm4479_vm15 = vcmask 465920  }
  0x54   : > { %1261 = vrot.lane.b32.xlu0 %v10771_v4, %s10527_s22  ;;  %1043 = vrot.lane.b32.xlu1 %v10771_v4, %s10528_s23 }
  0x58   : > { %1373 = vrot.lane.b32.xlu0 %v10782_v6, %s11964_s26  ;;  %1376 = vrot.lane.b32.xlu1 %v10774_v5, %s11964_s26 }
  0x5c   : > { %1649 = vrot.lane.b32.xlu0 %v10771_v4, %s11964_s26  ;;  %1652 = vrot.lane.b32.xlu1 %v10755_v2, %s11964_s26 }
  0x60   : > { %1924 = vperm.xlu0 %10442, %v1921_v8  }
  0xbe   : > { %v1076_v14 = vpop.permute.xlu0 %1075  ;;  %v1047_v15 = vpop.permute.xlu1 %1046 }
  0xc2   : > { %v1073_v20 = vpop.permute.xlu0 %1072  ;;  %v1265_v21 = vpop.permute.xlu1 %1264 }
  0xc3   : > { %v1081_v22 = vsel %vm1077_vm0, %v1073_v20, %v1076_v14  ;;  %v1078_v23 = vsel %vm1077_vm0, %v1076_v14, %v1073_v20  ;;  %v9650_v14 = vld [vmem:[%s12030_s9 + $0x30] sm:$0xff] }
  0xc4   : > { %v1096_v27 = vmul.f32 %v1092_v17, %v1078_v23  ;;  %v1095_v28 = vmul.f32 %v1088_v16, %v1081_v22 }
  0xc6   : > { %9624 = vmatprep.subr.msk.mxu0 %vm1103_vm1, %v1096_v27  ;;  %v1262_v32 = vpop.permute.xlu0 %1261  ;;  %v1044_v33 = vpop.permute.xlu1 %1043 }
  0xc7   : > { %v1266_v37 = vsel %vm1077_vm0, %v1265_v21, %v1262_v32  ;;  %v1269_v38 = vsel %vm1077_vm0, %v1262_v32, %v1265_v21  ;;  %v1052_v39 = vsel %vm1048_vm2, %v1044_v33, %v1047_v15  ;;  %9625 = vmatpush1.msk.msra.mxu0 %vm1103_vm1, %v1095_v28  ;;  %v1049_v40 = vsel %vm1048_vm2, %v1047_v15, %v1044_v33  ;;  %v9658_v15 = vld [vmem:[%s12030_s9 + $0x40] sm:$0xff] }
  0xc8   : > { %v1283_v41 = vmul.f32 %v1276_v24, %v1269_v38  ;;  %v1284_v42 = vmul.f32 %v1280_v25, %v1266_v37  ;;  %9626 = vmatmul.mubr.msk.f32.vlgmr.msra.gmra.mxu0 %vm1099_vm3, %v9623_v31  ;;  %v1066_v43 = vmul.f32 %v1062_v30, %v1049_v40  ;;  %v1065_v44 = vmul.f32 %v1058_v29, %v1052_v39 }
  0xc9   : > { %1360 = vmatprep.mubr.f32.mxu0 %v10526_v0 }
  0xca   : > { %9632 = vmatprep.subr.msk.mxu0 %vm1103_vm1, %v1284_v42  ;;  %v1374_v49 = vpop.permute.xlu0 %1373  ;;  %9627 = vmatprep.subr.msk.mxu1 %vm1103_vm1, %v1066_v43  ;;  %v1377_v50 = vpop.permute.xlu1 %1376 }
  0xcb   : > { %v1379_v51 = vsel %vm1378_vm4, %v1377_v50, %v1374_v49  ;;  %v1382_v52 = vsel %vm1378_vm4, %v1374_v49, %v1377_v50  ;;  %9628 = vmatpush1.msk.msra.mxu1 %vm1103_vm1, %v1065_v44  ;;  %9633 = vmatpush1.msk.msra.mxu0 %vm1103_vm1, %v1283_v41  ;;  %v1931_v50 = vld [vmem:[%s12034_s21] sm:$0xff]  ;;  %s12053_s21 = smov 73  }
  0xcc   : > { %v1396_v54 = vmul.f32 %v1389_v34, %v1382_v52  ;;  %v1397_v55 = vmul.f32 %v1393_v35, %v1379_v51  ;;  %9629 = vmatmul.mubr.msk.f32.vlgmr.msra.gmra.mxu1 %vm1099_vm3, %v1067_v46  ;;  %9634 = vmatmul.mubr.msk.f32.vlgmr.msra.gmra.mxu0 %vm1099_vm3, %v9631_v47  ;;  %v1943_v51 = vld [vmem:[%s12029_s12] sm:$0x3] }
  0xcd   : > { %9642 = vmatprep.subr.msk.mxu0 %vm1103_vm1, %v1486_v48  ;;  %1473 = vmatprep.mubr.f32.mxu1 %v10526_v0 }
  0xce   : > { %v1650_v59 = vpop.permute.xlu0 %1649  ;;  %9638 = vmatprep.subr.msk.mxu1 %vm1103_vm1, %v1397_v55  ;;  %v1653_v60 = vpop.permute.xlu1 %1652  ;;  %9643 = vmatpush1.msk.msra.mxu0 %vm1103_vm1, %v1482_v36  ;;  %v10923_v55 = vrot.slane %v1943_v51, %v10802_v12 }
  0xcf   : > { %v1654_v61 = vsel %vm1378_vm4, %v1653_v60, %v1650_v59  ;;  %v1657_v62 = vsel %vm1378_vm4, %v1650_v59, %v1653_v60  ;;  %9639 = vmatpush1.msk.msra.mxu1 %vm1103_vm1, %v1396_v54  ;;  %1558 = vmatprep.mubr.f32.mxu0 %v10526_v0  ;;  %v10920_v54 = vrot.slane %v1943_v51, %v10799_v11 }
  0xd0   : > { %v1671_v63 = vmul.f32 %v1664_v53, %v1657_v62  ;;  %v1672_v8 = vmul.f32 %v1668_v56, %v1654_v61  ;;  %9640 = vmatmul.mubr.msk.f32.vlgmr.msra.gmra.mxu1 %vm1099_vm3, %v9637_v57  ;;  %9644 = vmatmul.mubr.msk.f32.vlgmr.msra.gmra.mxu0 %vm1099_vm3, %v9641_v58  ;;  %v9669_v62 = vld [vmem:[%s12029_s12 + $0x6] sm:$0x3] }
  0xd1   : > { %9646 = vmatprep.subr.msk.mxu1 %vm1103_vm1, %v10782_v6  ;;  %1640 = vmatprep.mubr.f32.mxu1 %v10526_v0  ;;  %v9654_v6 = vld [vmem:[%s12030_s9 + $0x38] sm:$0xff]  ;;  %s12049_s9 = smov 119  }
  0xd2   : > { %9651 = vmatprep.subr.msk.mxu0 %vm1103_vm1, %v1672_v8  ;;  %9647 = vmatpush1.msk.msra.mxu1 %vm1103_vm1, %v10774_v5 }
  0xd3   : > { %9652 = vmatpush1.msk.msra.mxu0 %vm1103_vm1, %v1671_v63  ;;  %1748 = vmatprep.mubr.f32.mxu0 %v10526_v0  ;;  %v1957_v63 = vld [vmem:[%s12028_s17] sm:$0xff] }
  0xd4   : > { %9648 = vmatmul.mubr.msk.f32.vlgmr.msra.gmra.mxu1 %vm1099_vm3, %v9645_v13  ;;  %9653 = vmatmul.mubr.msk.f32.vlgmr.msra.gmra.mxu0 %vm1099_vm3, %v9650_v14  ;;  %v10932_v14 = vrot.slane %v9669_v62, %v10799_v11 }
  0xd5   : > { %9655 = vmatprep.subr.msk.mxu1 %vm1103_vm1, %v10763_v3  ;;  %9659 = vmatprep.subr.msk.mxu0 %vm1103_vm1, %v10771_v4 }
  0xd6   : > { %9656 = vmatpush1.msk.msra.mxu1 %vm1103_vm1, %v10752_v1  ;;  %1830 = vmatprep.mubr.f32.mxu1 %v10526_v0 }
  0xd7   : > { %9660 = vmatpush1.msk.msra.mxu0 %vm1103_vm1, %v10755_v2  ;;  %1912 = vmatprep.mubr.f32.mxu0 %v10526_v0 }
  0xd8   : > { %9657 = vmatmul.mubr.msk.f32.vlgmr.msra.gmra.mxu1 %vm1099_vm3, %v9654_v6  ;;  %9661 = vmatmul.mubr.msk.f32.vlgmr.msra.gmra.mxu0 %vm1099_vm3, %v9658_v15  ;;  %v10935_v6 = vrot.slane %v9669_v62, %v10802_v12  ;;  %v9662_v15 = vld [vmem:[%s12029_s12 + $0x2] sm:$0x3]  ;;  %vm4665_vm3 = vcmask 449536  }
  0xd9   : > { %2126 = vmatprep.mubr.f32.mxu0 %v10526_v0  ;;  %2052 = vmatprep.mubr.f32.mxu1 %v10526_v0 }
  0xdb   : > { %v1925_v41 = vpop.permute.xlu0 %1924 }
 0x188   : > { %v1176_v3 = vpop.f32.mrf.mxu0 }
 0x18a   : > { %v1178_v4 = vpop.f32.mrf.mxu0 }
 0x18c   : > { %v1256_v5 = vpop.f32.mrf.mxu1  ;;  %v1362_v16 = vpop.f32.mrf.mxu0 }
 0x18d   : > { %v1257_v1 = vadd.f32 %v1256_v5, %v1176_v3  ;;  %v9666_v5 = vld [vmem:[%s12029_s12 + $0x4] sm:$0x3] }
 0x18e   : > { %v1258_v17 = vpop.f32.mrf.mxu1  ;;  %v1364_v18 = vpop.f32.mrf.mxu0 }
 0x18f   : > { %v1367_v19 = vadd.f32 %v1362_v16, %v1257_v1  ;;  %v1259_v20 = vadd.f32 %v1258_v17, %v1178_v4 }
 0x190   : > { %v1475_v2 = vpop.f32.mrf.mxu1  ;;  %v1560_v21 = vpop.f32.mrf.mxu0 }
 0x191   : > { %v1368_v22 = vadd.f32 %v1364_v18, %v1259_v20  ;;  %v1480_v23 = vadd.f32 %v1475_v2, %v1367_v19  ;;  %v10946_v19 = vrot.slane %v9662_v15, %v10799_v11  ;;  %v10949_v20 = vrot.slane %v9662_v15, %v10802_v12  ;;  %v9674_v2 = vld [vmem:[%s12029_s12 + $0xa] sm:$0x3] }
 0x192   : > { %v1477_v24 = vpop.f32.mrf.mxu1  ;;  %v1562_v25 = vpop.f32.mrf.mxu0 }
 0x193   : > { %v1565_v26 = vadd.f32 %v1560_v21, %v1480_v23  ;;  %v1481_v27 = vadd.f32 %v1477_v24, %v1368_v22  ;;  %v9670_v21 = vld [vmem:[%s12028_s17 + $0x18] sm:$0xff]  ;;  %v10954_v22 = vrot.slane %v9666_v5, %v10799_v11  ;;  %v10957_v24 = vrot.slane %v9666_v5, %v10802_v12 }
 0x194   : > { %v1642_v28 = vpop.f32.mrf.mxu1  ;;  %v1750_v29 = vpop.f32.mrf.mxu0 }
 0x195   : > { %v1566_v30 = vadd.f32 %v1562_v25, %v1481_v27  ;;  %v1647_v31 = vadd.f32 %v1642_v28, %v1565_v26  ;;  %v10963_v28 = vrot.slane %v9674_v2, %v10799_v11 }
 0x196   : > { %v1644_v32 = vpop.f32.mrf.mxu1  ;;  %v1752_v33 = vpop.f32.mrf.mxu0 }
 0x197   : > { %v1755_v34 = vadd.f32 %v1750_v29, %v1647_v31  ;;  %v1648_v35 = vadd.f32 %v1644_v32, %v1566_v30  ;;  %v10969_v32 = vrot.slane %v9674_v2, %v10802_v12 }
 0x198   : > { %v1832_v36 = vpop.f32.mrf.mxu1  ;;  %v1914_v37 = vpop.f32.mrf.mxu0 }
 0x199   : > { %v1756_v38 = vadd.f32 %v1752_v33, %v1648_v35  ;;  %v1837_v39 = vadd.f32 %v1832_v36, %v1755_v34  ;;  %v9663_v33 = vld [vmem:[%s12028_s17 + $0x8] sm:$0xff] }
 0x19a   : > { %v1834_v40 = vpop.f32.mrf.mxu1  ;;  %v1916_v44 = vpop.f32.mrf.mxu0  ;;  %v9677_v34 = vld [vmem:[%s12029_s12 + $0xc] sm:$0x3] }
 0x19b   : > { %v1919_v42 = vadd.f32 %v1914_v37, %v1837_v39  ;;  %v1838_v43 = vadd.f32 %v1834_v40, %v1756_v38 }
 0x19d   : > { %v1920_v45 = vadd.f32 %v1916_v44, %v1838_v43  ;;  %v1927_v46 = vadd.f32 %v1925_v41, %v1919_v42  ;;  %v10983_v43 = vrot.slane %v9677_v34, %v10802_v12  ;;  %v9680_v44 = vld [vmem:[%s12029_s12 + $0xe] sm:$0x3] }
 0x19f   : > { %v1928_v47 = vadd.f32 %v1925_v41, %v1920_v45  ;;  %v10881_v48 = vmax.f32 %v1927_v46, 0.0  ;;  %v9667_v45 = vld [vmem:[%s12028_s17 + $0x10] sm:$0xff]  ;;  %v9675_v46 = vld [vmem:[%s12028_s17 + $0x28] sm:$0xff] }
 0x1a1   : > { %2416 = vrot.lane.b32.xlu0 %v10881_v48, %s11972_s28  ;;  %1961 = vrot.lane.b32.xlu1 %v10881_v48, %s10527_s22  ;;  %v10887_v49 = vmax.f32 %v1928_v47, 0.0 }
 0x1a5   : > { %1937 = vrot.lane.b32.xlu1 %v10881_v48, %s10528_s23  ;;  %1933 = vrot.lane.b32.xlu0 %v10887_v49, %s10528_s23 }
 0x1a9   : > { %2136 = vrot.lane.b32.xlu1 %v10881_v48, %s10532_s1  ;;  %2133 = vrot.lane.b32.xlu0 %v10887_v49, %s10532_s1 }
 0x1ad   : > { %2239 = vrot.lane.b32.xlu1 %v10881_v48, %s11964_s26  ;;  %2236 = vrot.lane.b32.xlu0 %v10887_v49, %s11964_s26 }
 0x1b1   : > { %2519 = vrot.lane.b32.xlu0 %v10881_v48, %s10533_s2  ;;  %1958 = vrot.lane.b32.xlu1 %v10887_v49, %s10527_s22 }
 0x1b5   : > { %2622 = vrot.lane.b32.xlu0 %v10881_v48, %s10534_s7  ;;  %2418 = vrot.lane.b32.xlu1 %v10887_v49, %s11972_s28 }
 0x1b9   : > { %2725 = vrot.lane.b32.xlu0 %v10881_v48, %s10535_s10  ;;  %2521 = vrot.lane.b32.xlu1 %v10887_v49, %s10533_s2 }
 0x1bd   : > { %2830 = vperm.xlu0 %10442, %v1931_v50   ;;  %2624 = vrot.lane.b32.xlu1 %v10887_v49, %s10534_s7  ;;  %v10991_v50 = vrot.slane %v9677_v34, %v10799_v11 }
 0x1c1   : > { %2727 = vrot.lane.b32.xlu1 %v10887_v49, %s10535_s10 }
 0x213   : > { %v2417_v52 = vpop.permute.xlu0 %2416  ;;  %v1962_v53 = vpop.permute.xlu1 %1961 }
 0x217   : > { %v1938_v56 = vpop.permute.xlu1 %1937  ;;  %v1934_v57 = vpop.permute.xlu0 %1933 }
 0x218   : > { %v1939_v58 = vsel %vm1048_vm2, %v1938_v56, %v1934_v57  ;;  %v1942_v59 = vsel %vm1048_vm2, %v1934_v57, %v1938_v56  ;;  %v11002_v57 = vrot.slane %v9680_v44, %v10802_v12 }
 0x219   : > { %v1955_v60 = vmul.f32 %v10920_v54, %v1942_v59  ;;  %v1956_v61 = vmul.f32 %v10923_v55, %v1939_v58  ;;  %v9672_v58 = vld [vmem:[%s12028_s17 + $0x20] sm:$0xff]  ;;  %v9683_v59 = vld [vmem:[%s12029_s12 + $0x10] sm:$0x3]  ;;  %s12050_s12 = smov 8  }
 0x21a   : > { %v11019_v15 = vrot.slane %v9683_v59, %v10802_v12 }
 0x21b   : > { %v2137_v8 = vpop.permute.xlu1 %2136  ;;  %2092 = vmatprep.subr.mxu0 %v1956_v61  ;;  %v2134_v13 = vpop.permute.xlu0 %2133 }
 0x21c   : > { %2093 = vmatpush1.msra.mxu0 %v1955_v60  ;;  %v2139_v25 = vsel %vm2138_vm6, %v2137_v8, %v2134_v13  ;;  %v2142_v29 = vsel %vm2138_vm6, %v2134_v13, %v2137_v8  ;;  %v11016_v13 = vrot.slane %v9683_v59, %v10799_v11 }
 0x21d   : > { %9665 = vmatmul.mubr.msk.f32.vlgmr.msra.gmra.mxu0 %vm1984_vm5, %v1957_v63  ;;  %v2157_v37 = vmul.f32 %v10957_v24, %v2139_v25  ;;  %v2156_v38 = vmul.f32 %v10954_v22, %v2142_v29 }
 0x21e   : > { %2329 = vmatprep.mubr.f32.mxu0 %v10526_v0 }
 0x21f   : > { %v2240_v3 = vpop.permute.xlu1 %2239  ;;  %v2237_v4 = vpop.permute.xlu0 %2236 }
 0x220   : > { %v2241_v16 = vsel %vm1378_vm4, %v2240_v3, %v2237_v4  ;;  %v2244_v1 = vsel %vm1378_vm4, %v2237_v4, %v2240_v3  ;;  %v9678_v3 = vld [vmem:[%s12028_s17 + $0x30] sm:$0xff]  ;;  %v9681_v4 = vld [vmem:[%s12028_s17 + $0x38] sm:$0xff] }
 0x221   : > { %v2258_v17 = vmul.f32 %v10932_v14, %v2244_v1  ;;  %v2259_v18 = vmul.f32 %v10935_v6, %v2241_v16 }
 0x223   : > { %2295 = vmatprep.subr.mxu0 %v2259_v18  ;;  %v1959_v23 = vpop.permute.xlu1 %1958  ;;  %v2520_v35 = vpop.permute.xlu0 %2519 }
 0x224   : > { %v1963_v26 = vsel %vm1077_vm0, %v1962_v53, %v1959_v23  ;;  %v1966_v27 = vsel %vm1077_vm0, %v1959_v23, %v1962_v53  ;;  %2296 = vmatpush1.msra.mxu0 %v2258_v17 }
 0x225   : > { %v1980_v30 = vmul.f32 %v10946_v19, %v1966_v27  ;;  %v1981_v31 = vmul.f32 %v10949_v20, %v1963_v26  ;;  %9671 = vmatmul.mubr.msk.f32.vlgmr.msra.gmra.mxu0 %vm1984_vm5, %v9670_v21  ;;  %v9684_v21 = vld [vmem:[%s12028_s17 + $0x40] sm:$0xff]  ;;  %s12052_s17 = smov 9  }
 0x226   : > { %2510 = vmatprep.mubr.f32.mxu0 %v10526_v0 }
 0x227   : > { %2018 = vmatprep.subr.mxu1 %v1981_v31  ;;  %v2419_v36 = vpop.permute.xlu1 %2418  ;;  %v2623_v53 = vpop.permute.xlu0 %2622 }
 0x228   : > { %v2421_v39 = vsel %vm2420_vm7, %v2417_v52, %v2419_v36  ;;  %v2425_v40 = vsel %vm2420_vm7, %v2419_v36, %v2417_v52  ;;  %2019 = vmatpush1.msra.mxu1 %v1980_v30  ;;  %v10995_v52 = vrot.slane %v9680_v44, %v10799_v11 }
 0x229   : > { %v2439_v41 = vmul.f32 %v10963_v28, %v2421_v39  ;;  %9664 = vmatmul.mubr.msk.f32.vlgmr.msra.gmra.mxu1 %vm1984_vm5, %v9663_v33  ;;  %2193 = vmatprep.subr.mxu1 %v2157_v37  ;;  %v2440_v42 = vmul.f32 %v10969_v32, %v2425_v40 }
 0x22a   : > { %2194 = vmatpush1.msra.mxu1 %v2156_v38  ;;  %2227 = vmatprep.mubr.f32.mxu1 %v10526_v0 }
 0x22b   : > { %2373 = vmatprep.subr.mxu1 %v10887_v49  ;;  %2476 = vmatprep.subr.mxu0 %v2440_v42  ;;  %v2522_v47 = vpop.permute.xlu1 %2521  ;;  %v2726_v5 = vpop.permute.xlu0 %2725 }
 0x22c   : > { %v2528_v51 = vsel %vm2523_vm8, %v2522_v47, %v2520_v35  ;;  %2477 = vmatpush1.msra.mxu0 %v2439_v41  ;;  %v2524_v56 = vsel %vm2523_vm8, %v2520_v35, %v2522_v47 }
 0x22d   : > { %9668 = vmatmul.mubr.msk.f32.vlgmr.msra.gmra.mxu1 %vm1984_vm5, %v9667_v45  ;;  %v2543_v49 = vmul.f32 %v10983_v43, %v2528_v51  ;;  %9676 = vmatmul.mubr.msk.f32.vlgmr.msra.gmra.mxu0 %vm1984_vm5, %v9675_v46  ;;  %v2542_v61 = vmul.f32 %v10991_v50, %v2524_v56 }
 0x22e   : > { %2374 = vmatpush1.msra.mxu1 %v10881_v48  ;;  %2407 = vmatprep.mubr.f32.mxu1 %v10526_v0 }
 0x22f   : > { %2579 = vmatprep.subr.mxu1 %v2543_v49  ;;  %v2625_v60 = vpop.permute.xlu1 %2624  ;;  %2716 = vmatprep.mubr.f32.mxu0 %v10526_v0 }
 0x230   : > { %v2627_v62 = vsel %vm2626_vm9, %v2623_v53, %v2625_v60  ;;  %v2631_v63 = vsel %vm2626_vm9, %v2625_v60, %v2623_v53 }
 0x231   : > { %v2645_v8 = vmul.f32 %v10995_v52, %v2627_v62  ;;  %9673 = vmatmul.mubr.msk.f32.vlgmr.msra.gmra.mxu1 %vm1984_vm5, %v9672_v58  ;;  %v2646_v48 = vmul.f32 %v11002_v57, %v2631_v63 }
 0x232   : > { %2580 = vmatpush1.msra.mxu1 %v2542_v61  ;;  %2613 = vmatprep.mubr.f32.mxu1 %v10526_v0 }
 0x233   : > { %2682 = vmatprep.subr.mxu0 %v2646_v48  ;;  %v2728_v16 = vpop.permute.xlu1 %2727 }
 0x234   : > { %v2730_v1 = vsel %vm2729_vm10, %v2726_v5, %v2728_v16  ;;  %v2734_v17 = vsel %vm2729_vm10, %v2728_v16, %v2726_v5  ;;  %2683 = vmatpush1.msra.mxu0 %v2645_v8 }
 0x235   : > { %v2748_v18 = vmul.f32 %v11016_v13, %v2730_v1  ;;  %9679 = vmatmul.mubr.msk.f32.vlgmr.msra.gmra.mxu1 %vm1984_vm5, %v9678_v3  ;;  %9682 = vmatmul.mubr.msk.f32.vlgmr.msra.gmra.mxu0 %vm1984_vm5, %v9681_v4  ;;  %v2749_v2 = vmul.f32 %v11019_v15, %v2734_v17 }
 0x236   : > { %2819 = vmatprep.mubr.f32.mxu1 %v10526_v0  ;;  %2938 = vmatprep.mubr.f32.mxu0 %v10526_v0 }
 0x237   : > { %2785 = vmatprep.subr.mxu1 %v2749_v2  ;;  %v2837_v2 = vld [vmem:[%s10593_s29] sm:$0xff] }
 0x238   : > { %2786 = vmatpush1.msra.mxu1 %v2748_v18  ;;  %v2831_v48 = vpop.permute.xlu0 %2830  ;;  %v2838_v18 = vld [vmem:[%s10593_s29 + $0x8] sm:$0xff] }
 0x239   : > { %9685 = vmatmul.mubr.msk.f32.vlgmr.msra.gmra.mxu1 %vm1984_vm5, %v9684_v21  ;;  %v3856_v21 = vld [vmem:[%s10603_s8] sm:$0xff] }
 0x23a   : > { %3021 = vmatprep.mubr.f32.mxu1 %v10526_v0 }
 0x2dd   : > { %v2128_v23 = vpop.f32.mrf.mxu0 }
 0x2df   : > { %v2130_v25 = vpop.f32.mrf.mxu0 }
 0x2e5   : > { %v2331_v26 = vpop.f32.mrf.mxu0 }
 0x2e7   : > { %v2333_v29 = vpop.f32.mrf.mxu0 }
 0x2e9   : > { %v2054_v27 = vpop.f32.mrf.mxu1 }
 0x2ea   : > { %v2129_v31 = vadd.f32 %v2128_v23, %v2054_v27 }
 0x2eb   : > { %v2056_v30 = vpop.f32.mrf.mxu1 }
 0x2ec   : > { %v2131_v35 = vadd.f32 %v2130_v25, %v2056_v30 }
 0x2ed   : > { %v2229_v33 = vpop.f32.mrf.mxu1  ;;  %v2512_v34 = vpop.f32.mrf.mxu0 }
 0x2ee   : > { %v2234_v36 = vadd.f32 %v2229_v33, %v2129_v31  ;;  %v9686_v33 = vld [vmem:[%s10588_s25 + $0x10] sm:$0xff] }
 0x2ef   : > { %v2231_v37 = vpop.f32.mrf.mxu1  ;;  %v2514_v41 = vpop.f32.mrf.mxu0 }
 0x2f0   : > { %v2336_v38 = vadd.f32 %v2331_v26, %v2234_v36  ;;  %v2235_v39 = vadd.f32 %v2231_v37, %v2131_v35 }
 0x2f1   : > { %v2409_v40 = vpop.f32.mrf.mxu1 }
 0x2f2   : > { %v2337_v42 = vadd.f32 %v2333_v29, %v2235_v39  ;;  %v2414_v44 = vadd.f32 %v2409_v40, %v2336_v38 }
 0x2f3   : > { %v2411_v45 = vpop.f32.mrf.mxu1 }
 0x2f4   : > { %v2517_v46 = vadd.f32 %v2512_v34, %v2414_v44  ;;  %v2415_v47 = vadd.f32 %v2411_v45, %v2337_v42  ;;  %v2853_v45 = vld [vmem:[%s10588_s25 + $0x8] sm:$0xff] }
 0x2f5   : > { %v2615_v51 = vpop.f32.mrf.mxu1  ;;  %v2718_v53 = vpop.f32.mrf.mxu0 }
 0x2f6   : > { %v2518_v56 = vadd.f32 %v2514_v41, %v2415_v47  ;;  %v2620_v49 = vadd.f32 %v2615_v51, %v2517_v46  ;;  %v9692_v46 = vld [vmem:[%s10588_s25 + $0x20] sm:$0xff] }
 0x2f7   : > { %v2617_v58 = vpop.f32.mrf.mxu1  ;;  %v2720_v61 = vpop.f32.mrf.mxu0 }
 0x2f8   : > { %v2723_v59 = vadd.f32 %v2718_v53, %v2620_v49  ;;  %v2621_v60 = vadd.f32 %v2617_v58, %v2518_v56  ;;  %v9693_v49 = vld [vmem:[%s10588_s25 + $0x28] sm:$0xff]  ;;  %v9696_v58 = vld [vmem:[%s10588_s25 + $0x30] sm:$0xff] }
 0x2f9   : > { %v2821_v62 = vpop.f32.mrf.mxu1 }
 0x2fa   : > { %v2724_v63 = vadd.f32 %v2720_v61, %v2621_v60  ;;  %v2826_v8 = vadd.f32 %v2821_v62, %v2723_v59 }
 0x2fb   : > { %v2823_v3 = vpop.f32.mrf.mxu1 }
 0x2fc   : > { %v2833_v4 = vadd.f32 %v2831_v48, %v2826_v8  ;;  %v2827_v5 = vadd.f32 %v2823_v3, %v2724_v63  ;;  %v9697_v63 = vld [vmem:[%s10588_s25 + $0x38] sm:$0xff]  ;;  %v9700_v8 = vld [vmem:[%s10588_s25 + $0x40] sm:$0xff] }
 0x2fe   : > { %v11035_v16 = vmax.f32 %v2833_v4, 0.0  ;;  %v2834_v1 = vadd.f32 %v2831_v48, %v2827_v5 }
 0x300   : > { %v11037_v17 = vmax.f32 %v2834_v1, 0.0  ;;  %2857 = vrot.lane.b32.xlu0 %v11035_v16, %s10527_s22  ;;  %v9704_v1 = vld [vmem:[%s10588_s25 + $0x50] sm:$0xff] }
 0x302   : > { %2854 = vrot.lane.b32.xlu1 %v11037_v17, %s10527_s22  ;;  %s11995_s22 = smov 73  }
 0x304   : > { %2844 = vrot.lane.b32.xlu0 %v11035_v16, %s10528_s23 }
 0x306   : > { %2840 = vrot.lane.b32.xlu1 %v11037_v17, %s10528_s23  ;;  %s11970_s23 = smov 7  }
 0x308   : > { %3037 = vrot.lane.b32.xlu0 %v11035_v16, %s10532_s1 }
 0x30a   : > { %3034 = vrot.lane.b32.xlu1 %v11037_v17, %s10532_s1  ;;  %s11968_s1 = smov 71  }
 0x30c   : > { %3138 = vrot.lane.b32.xlu0 %v11035_v16, %s11964_s26 }
 0x30e   : > { %3135 = vrot.lane.b32.xlu1 %v11037_v17, %s11964_s26 }
 0x310   : > { %3328 = vrot.lane.b32.xlu0 %v11037_v17, %s11972_s28 }
 0x312   : > { %3326 = vrot.lane.b32.xlu1 %v11035_v16, %s11972_s28 }
 0x314   : > { %3429 = vrot.lane.b32.xlu0 %v11037_v17, %s10533_s2 }
 0x316   : > { %3427 = vrot.lane.b32.xlu1 %v11035_v16, %s10533_s2  ;;  %s11966_s2 = smov 65  }
 0x318   : > { %3530 = vrot.lane.b32.xlu0 %v11037_v17, %s10534_s7 }
 0x31a   : > { %3528 = vrot.lane.b32.xlu1 %v11035_v16, %s10534_s7  ;;  %s11974_s7 = smov 63  }
 0x31c   : > { %3631 = vrot.lane.b32.xlu0 %v11037_v17, %s10535_s10 }
 0x31e   : > { %3629 = vrot.lane.b32.xlu1 %v11035_v16, %s10535_s10  ;;  %s11976_s10 = smov 57  }
 0x320   : > { %3737 = vperm.xlu0 %10442, %v2838_v18  }
 0x322   : > { %3732 = vperm.xlu1 %10443, %v2837_v2  }
 0x326   : > { %3859 = vperm.xlu1 %10443, %v3856_v21   ;;  %v9705_v21 = vld [vmem:[%s10588_s25 + $0x58] sm:$0xff] }
 0x372   : > { %v2858_v23 = vpop.permute.xlu0 %2857 }
 0x374   : > { %v2855_v25 = vpop.permute.xlu1 %2854 }
 0x375   : > { %v2859_v26 = vsel %vm1077_vm0, %v2858_v23, %v2855_v25  ;;  %v2862_v27 = vsel %vm1077_vm0, %v2855_v25, %v2858_v23  ;;  %v9708_v23 = vld [vmem:[%s10588_s25 + $0x60] sm:$0xff] }
 0x376   : > { %v2863_v29 = vmul.f32 %v2862_v27, %v10946_v19  ;;  %v2845_v30 = vpop.permute.xlu0 %2844  ;;  %v2864_v31 = vmul.f32 %v2859_v26, %v10949_v20  ;;  %v9687_v19 = vld [vmem:[%s10588_s25 + $0x18] sm:$0xff]  ;;  %v2852_v20 = vld [vmem:[%s10588_s25] sm:$0xff] }
 0x378   : > { %2904 = vmatprep.subr.mxu0 %v2864_v31  ;;  %v2841_v34 = vpop.permute.xlu1 %2840  ;;  %v9712_v31 = vld [vmem:[%s10588_s25 + $0x70] sm:$0xff] }
 0x379   : > { %v2846_v35 = vsel %vm1048_vm2, %v2845_v30, %v2841_v34  ;;  %v2849_v36 = vsel %vm1048_vm2, %v2841_v34, %v2845_v30  ;;  %2905 = vmatpush1.msra.mxu0 %v2863_v29  ;;  %v9709_v30 = vld [vmem:[%s10588_s25 + $0x68] sm:$0xff]  ;;  %v3779_v34 = vld [vmem:[%s10643_s27 + $0xf8] sm:$0xff]  ;;  %vm4572_vm2 = vcmask 457728  }
 0x37a   : > { %v2850_v37 = vmul.f32 %v2849_v36, %v10920_v54  ;;  %v3038_v38 = vpop.permute.xlu0 %3037  ;;  %9688 = vmatmul.mubr.msk.f32.vlgmr.msra.gmra.mxu0 %vm1984_vm5, %v9686_v33  ;;  %v2851_v39 = vmul.f32 %v2846_v35, %v10923_v55  ;;  %v9717_v33 = vld [vmem:[%s10588_s25 + $0x88] sm:$0xff]  ;;  %v3763_v35 = vld [vmem:[%s10643_s27 + $0x78] sm:$0xff]  ;;  %v3778_v36 = vld [vmem:[%s10643_s27 + $0xf0] sm:$0xff] }
 0x37b   : > { %2944 = vmatprep.mubr.f32.mxu0 %v10526_v0 }
 0x37c   : > { %2987 = vmatprep.subr.mxu1 %v2851_v39  ;;  %v3035_v40 = vpop.permute.xlu1 %3034  ;;  %v3761_v39 = vld [vmem:[%s10643_s27 + $0x68] sm:$0xff] }
 0x37d   : > { %v3039_v41 = vsel %vm2138_vm6, %v3038_v38, %v3035_v40  ;;  %v3042_v42 = vsel %vm2138_vm6, %v3035_v40, %v3038_v38  ;;  %2988 = vmatpush1.msra.mxu1 %v2850_v37  ;;  %v3762_v37 = vld [vmem:[%s10643_s27 + $0x70] sm:$0xff]  ;;  %v3777_v38 = vld [vmem:[%s10643_s27 + $0xe8] sm:$0xff]  ;;  %v3775_v40 = vld [vmem:[%s10643_s27 + $0xd8] sm:$0xff]  ;;  %vm8353_vm6 = vcmask 125952  }
 0x37e   : > { %v3043_v54 = vmul.f32 %v3042_v42, %v10954_v22  ;;  %v3139_v44 = vpop.permute.xlu0 %3138  ;;  %9689 = vmatmul.mubr.msk.f32.gmra.mxu0 %vm1984_vm5, %v9687_v19  ;;  %9690 = vmatmul.mubr.msk.f32.vlgmr.msra.gmra.mxu1 %vm1984_vm5, %v2852_v20  ;;  %v3044_v55 = vmul.f32 %v3039_v41, %v10957_v24  ;;  %v3776_v19 = vld [vmem:[%s10643_s27 + $0xe0] sm:$0xff]  ;;  %v3759_v41 = vld [vmem:[%s10643_s27 + $0x58] sm:$0xff]  ;;  %v3774_v42 = vld [vmem:[%s10643_s27 + $0xd0] sm:$0xff] }
 0x37f   : > { %3027 = vmatprep.mubr.f32.mxu1 %v10526_v0  ;;  %3118 = vmatprep.mubr.f32.mxu0 %v10526_v0  ;;  %v3760_v20 = vld [vmem:[%s10643_s27 + $0x60] sm:$0xff] }
 0x380   : > { %3084 = vmatprep.subr.mxu0 %v3044_v55  ;;  %v3136_v47 = vpop.permute.xlu1 %3135  ;;  %v3757_v55 = vld [vmem:[%s10643_s27 + $0x48] sm:$0xff] }
 0x381   : > { %v3140_v51 = vsel %vm1378_vm4, %v3139_v44, %v3136_v47  ;;  %v3143_v22 = vsel %vm1378_vm4, %v3136_v47, %v3139_v44  ;;  %3085 = vmatpush1.msra.mxu0 %v3043_v54  ;;  %v3758_v54 = vld [vmem:[%s10643_s27 + $0x50] sm:$0xff]  ;;  %v3773_v44 = vld [vmem:[%s10643_s27 + $0xc8] sm:$0xff]  ;;  %v3771_v47 = vld [vmem:[%s10643_s27 + $0xb8] sm:$0xff] }
 0x382   : > { %v3144_v53 = vmul.f32 %v3143_v22, %v10932_v14  ;;  %v3329_v56 = vpop.permute.xlu0 %3328  ;;  %9691 = vmatmul.mubr.msk.f32.gmra.mxu1 %vm1984_vm5, %v2853_v45  ;;  %9694 = vmatmul.mubr.msk.f32.vlgmr.msra.gmra.mxu0 %vm1984_vm5, %v9692_v46  ;;  %v3145_v24 = vmul.f32 %v3140_v51, %v10935_v6  ;;  %v3772_v45 = vld [vmem:[%s10643_s27 + $0xc0] sm:$0xff]  ;;  %v3755_v51 = vld [vmem:[%s10643_s27 + $0x38] sm:$0xff]  ;;  %v3770_v22 = vld [vmem:[%s10643_s27 + $0xb0] sm:$0xff] }
 0x383   : > { %3275 = vmatprep.subr.mxu0 %v11037_v17  ;;  %3124 = vmatprep.mubr.f32.mxu0 %v10526_v0  ;;  %v3756_v46 = vld [vmem:[%s10643_s27 + $0x40] sm:$0xff] }
 0x384   : > { %3276 = vmatpush1.msra.mxu0 %v11035_v16  ;;  %3185 = vmatprep.subr.mxu1 %v3145_v24  ;;  %v3327_v59 = vpop.permute.xlu1 %3326  ;;  %v9701_v16 = vld [vmem:[%s10588_s25 + $0x48] sm:$0xff] }
 0x385   : > { %v3330_v14 = vsel %vm2420_vm7, %v3327_v59, %v3329_v56  ;;  %v3334_v60 = vsel %vm2420_vm7, %v3329_v56, %v3327_v59  ;;  %3186 = vmatpush1.msra.mxu1 %v3144_v53  ;;  %3219 = vmatprep.mubr.f32.mxu1 %v10526_v0  ;;  %v3754_v53 = vld [vmem:[%s10643_s27 + $0x30] sm:$0xff]  ;;  %v3769_v56 = vld [vmem:[%s10643_s27 + $0xa8] sm:$0xff]  ;;  %v3767_v59 = vld [vmem:[%s10643_s27 + $0x98] sm:$0xff]  ;;  %vm8921_vm7 = vcmask 1040384  }
 0x386   : > { %v3335_v6 = vmul.f32 %v3330_v14, %v10963_v28  ;;  %v3430_v61 = vpop.permute.xlu0 %3429  ;;  %9695 = vmatmul.mubr.msk.f32.gmra.mxu0 %vm1984_vm5, %v9693_v49  ;;  %9698 = vmatmul.mubr.msk.f32.vlgmr.msra.gmra.mxu1 %vm1984_vm5, %v9696_v58  ;;  %v3336_v62 = vmul.f32 %v3334_v60, %v10969_v32  ;;  %v3753_v24 = vld [vmem:[%s10643_s27 + $0x28] sm:$0xff]  ;;  %v3768_v49 = vld [vmem:[%s10643_s27 + $0xa0] sm:$0xff]  ;;  %v3751_v14 = vld [vmem:[%s10643_s27 + $0x18] sm:$0xff] }
 0x387   : > { %3225 = vmatprep.mubr.f32.mxu1 %v10526_v0  ;;  %3309 = vmatprep.mubr.f32.mxu0 %v10526_v0  ;;  %v3752_v58 = vld [vmem:[%s10643_s27 + $0x20] sm:$0xff]  ;;  %v3766_v60 = vld [vmem:[%s10643_s27 + $0x90] sm:$0xff] }
 0x388   : > { %3376 = vmatprep.subr.mxu1 %v3336_v62  ;;  %v3428_v48 = vpop.permute.xlu1 %3427  ;;  %v3749_v62 = vld [vmem:[%s10643_s27 + $0x8] sm:$0xff] }
 0x389   : > { %v3431_v3 = vsel %vm2523_vm8, %v3428_v48, %v3430_v61  ;;  %v3435_v28 = vsel %vm2523_vm8, %v3430_v61, %v3428_v48  ;;  %3377 = vmatpush1.msra.mxu1 %v3335_v6  ;;  %v3750_v6 = vld [vmem:[%s10643_s27 + $0x10] sm:$0xff]  ;;  %v3765_v61 = vld [vmem:[%s10643_s27 + $0x88] sm:$0xff]  ;;  %vm8923_vm8 = vcmask 1041408  }
 0x38a   : > { %v3436_v4 = vmul.f32 %v3431_v3, %v10991_v50  ;;  %v3531_v5 = vpop.permute.xlu0 %3530  ;;  %9699 = vmatmul.mubr.msk.f32.gmra.mxu1 %vm1984_vm5, %v9697_v63  ;;  %9702 = vmatmul.mubr.msk.f32.vlgmr.msra.gmra.mxu0 %vm1984_vm5, %v9700_v8  ;;  %v3437_v32 = vmul.f32 %v3435_v28, %v10983_v43  ;;  %v3764_v63 = vld [vmem:[%s10643_s27 + $0x80] sm:$0xff] }
 0x38b   : > { %3315 = vmatprep.mubr.f32.mxu0 %v10526_v0  ;;  %3410 = vmatprep.mubr.f32.mxu1 %v10526_v0  ;;  %v3748_v8 = vld [vmem:[%s10643_s27] sm:$0xff] }
 0x38c   : > { %3477 = vmatprep.subr.mxu0 %v3437_v32  ;;  %v3529_v17 = vpop.permute.xlu1 %3528 }
 0x38d   : > { %v3532_v18 = vsel %vm2626_vm9, %v3529_v17, %v3531_v5  ;;  %v3536_v50 = vsel %vm2626_vm9, %v3531_v5, %v3529_v17  ;;  %3478 = vmatpush1.msra.mxu0 %v3436_v4 }
 0x38e   : > { %v3537_v2 = vmul.f32 %v3532_v18, %v10995_v52  ;;  %9703 = vmatmul.mubr.msk.f32.gmra.mxu0 %vm1984_vm5, %v9701_v16  ;;  %9706 = vmatmul.mubr.msk.f32.vlgmr.msra.gmra.mxu1 %vm1984_vm5, %v9704_v1  ;;  %v3538_v43 = vmul.f32 %v3536_v50, %v11002_v57  ;;  %v3632_v25 = vpop.permute.xlu0 %3631 }
 0x38f   : > { %3416 = vmatprep.mubr.f32.mxu1 %v10526_v0  ;;  %3511 = vmatprep.mubr.f32.mxu0 %v10526_v0 }
 0x390   : > { %3578 = vmatprep.subr.mxu1 %v3538_v43  ;;  %v3630_v26 = vpop.permute.xlu1 %3629 }
 0x391   : > { %v3633_v27 = vsel %vm2729_vm10, %v3630_v26, %v3632_v25  ;;  %v3637_v52 = vsel %vm2729_vm10, %v3632_v25, %v3630_v26  ;;  %3579 = vmatpush1.msra.mxu1 %v3537_v2 }
 0x392   : > { %v3638_v57 = vmul.f32 %v3633_v27, %v11016_v13  ;;  %9707 = vmatmul.mubr.msk.f32.gmra.mxu1 %vm1984_vm5, %v9705_v21  ;;  %9710 = vmatmul.mubr.msk.f32.vlgmr.msra.gmra.mxu0 %vm1984_vm5, %v9708_v23  ;;  %v3639_v29 = vmul.f32 %v3637_v52, %v11019_v15  ;;  %v9713_v13 = vld [vmem:[%s10588_s25 + $0x78] sm:$0xff]  ;;  %v9716_v15 = vld [vmem:[%s10588_s25 + $0x80] sm:$0xff] }
 0x393   : > { %3517 = vmatprep.mubr.f32.mxu0 %v10526_v0  ;;  %3612 = vmatprep.mubr.f32.mxu1 %v10526_v0 }
 0x394   : > { %3679 = vmatprep.subr.mxu0 %v3639_v29  ;;  %9875 = vmatprep.subr.mxu1 %v3779_v34 }
 0x395   : > { %3680 = vmatpush1.msra.mxu0 %v3638_v57 }
 0x396   : > { %9711 = vmatmul.mubr.msk.f32.gmra.mxu0 %vm1984_vm5, %v9709_v30  ;;  %9714 = vmatmul.mubr.msk.f32.vlgmr.msra.gmra.mxu1 %vm1984_vm5, %v9712_v31 }
 0x397   : > { %3618 = vmatprep.mubr.f32.mxu1 %v10526_v0  ;;  %3713 = vmatprep.mubr.f32.mxu0 %v10526_v0 }
 0x398   : > { %10051 = vmatprep.subr.mxu0 %v10526_v0  ;;  %9876 = vmatpush3.msra.mxu1 %v3763_v35 }
 0x399   : > { %9877 = vmatprep.subr.mxu1 %v3778_v36 }
 0x39a   : > { %9715 = vmatmul.mubr.msk.f32.gmra.mxu1 %vm1984_vm5, %v9713_v13  ;;  %9718 = vmatmul.mubr.msk.f32.vlgmr.msra.gmra.mxu0 %vm1984_vm5, %v9716_v15 }
 0x39b   : > { %3719 = vmatprep.mubr.f32.mxu0 %v10526_v0  ;;  %9878 = vmatpush3.msra.mxu1 %v3762_v37 }
 0x39c   : > { %9879 = vmatprep.subr.mxu1 %v3777_v38 }
 0x39d   : > { %9880 = vmatpush3.msra.mxu1 %v3761_v39 }
 0x39e   : > { %9719 = vmatmul.mubr.msk.f32.gmra.mxu0 %vm1984_vm5, %v9717_v33  ;;  %9881 = vmatprep.subr.mxu1 %v3776_v19 }
 0x39f   : > { %9882 = vmatpush3.msra.mxu1 %v3760_v20  ;;  %10055 = vmatprep.mubr.msk.f32.mxu0 %vm10536_vm11, %v10526_v0 }
 0x3a0   : > { %9883 = vmatprep.subr.mxu1 %v3775_v40 }
 0x3a1   : > { %9884 = vmatpush3.msra.mxu1 %v3759_v41 }
 0x3a2   : > { %9885 = vmatprep.subr.mxu1 %v3774_v42 }
 0x3a3   : > { %9886 = vmatpush3.msra.mxu1 %v3758_v54 }
 0x3a4   : > { %9887 = vmatprep.subr.mxu1 %v3773_v44 }
 0x3a5   : > { %9888 = vmatpush3.msra.mxu1 %v3757_v55 }
 0x3a6   : > { %9889 = vmatprep.subr.mxu1 %v3772_v45 }
 0x3a7   : > { %9890 = vmatpush3.msra.mxu1 %v3756_v46 }
 0x3a8   : > { %9891 = vmatprep.subr.mxu1 %v3771_v47 }
 0x3a9   : > { %9892 = vmatpush3.msra.mxu1 %v3755_v51 }
 0x3aa   : > { %9893 = vmatprep.subr.mxu1 %v3770_v22 }
 0x3ab   : > { %9894 = vmatpush3.msra.mxu1 %v3754_v53 }
 0x3ac   : > { %9895 = vmatprep.subr.mxu1 %v3769_v56 }
 0x3ad   : > { %9896 = vmatpush3.msra.mxu1 %v3753_v24 }
 0x3ae   : > { %9897 = vmatprep.subr.mxu1 %v3768_v49 }
 0x3af   : > { %9898 = vmatpush3.msra.mxu1 %v3752_v58 }
 0x3b0   : > { %9899 = vmatprep.subr.mxu1 %v3767_v59 }
 0x3b1   : > { %9900 = vmatpush3.msra.mxu1 %v3751_v14 }
 0x3b2   : > { %9901 = vmatprep.subr.mxu1 %v3766_v60 }
 0x3b3   : > { %9902 = vmatpush3.msra.mxu1 %v3750_v6 }
 0x3b4   : > { %9903 = vmatprep.subr.mxu1 %v3765_v61 }
 0x3b5   : > { %9904 = vmatpush3.msra.mxu1 %v3749_v62 }
 0x3b6   : > { %9905 = vmatprep.subr.mxu1 %v3764_v63 }
 0x3b7   : > { %9906 = vmatpush3.msra.mxu1 %v3748_v8 }
 0x3b8   : > { %10088 = vmatprep.subr.mxu1 %v10526_v0 }
 0x43a   : > { %v2940_v48 = vpop.f32.mrf.mxu0 }
 0x43c   : > { %v2942_v3 = vpop.f32.mrf.mxu0 }
 0x43e   : > { %v2946_v28 = vpop.f32.mrf.mxu0  ;;  %v3023_v4 = vpop.f32.mrf.mxu1 }
 0x43f   : > { %v3024_v52 = vadd.f32 %v3023_v4, %v2940_v48 }
 0x440   : > { %v2948_v5 = vpop.f32.mrf.mxu0  ;;  %v3025_v32 = vpop.f32.mrf.mxu1 }
 0x441   : > { %v3026_v30 = vadd.f32 %v3025_v32, %v2942_v3  ;;  %v3733_v32 = vpop.permute.xlu1 %3732 }
 0x442   : > { %v3029_v16 = vpop.f32.mrf.mxu1  ;;  %v3120_v1 = vpop.f32.mrf.mxu0 }
 0x443   : > { %v3131_v31 = vadd.f32 %v3120_v1, %v3024_v52  ;;  %v3030_v33 = vadd.f32 %v3029_v16, %v2946_v28 }
 0x444   : > { %v3031_v17 = vpop.f32.mrf.mxu1  ;;  %v3122_v18 = vpop.f32.mrf.mxu0 }
 0x445   : > { %v3132_v34 = vadd.f32 %v3122_v18, %v3026_v30  ;;  %v3032_v38 = vadd.f32 %v3031_v17, %v2948_v5 }
 0x446   : > { %v3126_v50 = vpop.f32.mrf.mxu0  ;;  %v3221_v2 = vpop.f32.mrf.mxu1 }
 0x447   : > { %v3232_v35 = vadd.f32 %v3221_v2, %v3131_v31  ;;  %v3133_v39 = vadd.f32 %v3126_v50, %v3030_v33 }
 0x448   : > { %v3128_v43 = vpop.f32.mrf.mxu0  ;;  %v3223_v21 = vpop.f32.mrf.mxu1 }
 0x449   : > { %v3233_v19 = vadd.f32 %v3223_v21, %v3132_v34  ;;  %v3134_v42 = vadd.f32 %v3128_v43, %v3032_v38  ;;  %v3738_v43 = vpop.permute.xlu0 %3737  ;;  %v3855_v34 = vld [vmem:[%s12027_s3] sm:$0xff] }
 0x44a   : > { %v3227_v23 = vpop.f32.mrf.mxu1  ;;  %v3311_v25 = vpop.f32.mrf.mxu0 }
 0x44b   : > { %v3322_v20 = vadd.f32 %v3311_v25, %v3232_v35  ;;  %v3234_v54 = vadd.f32 %v3227_v23, %v3133_v39  ;;  %v3860_v35 = vpop.permute.xlu1 %3859 }
 0x44c   : > { %v3229_v26 = vpop.f32.mrf.mxu1  ;;  %v3313_v27 = vpop.f32.mrf.mxu0 }
 0x44d   : > { %v3323_v44 = vadd.f32 %v3313_v27, %v3233_v19  ;;  %v3235_v47 = vadd.f32 %v3229_v26, %v3134_v42  ;;  %v4762_v19 = vld [vmem:[%s10623_s30 + $0x8] sm:$0xff] }
 0x44e   : > { %v3317_v57 = vpop.f32.mrf.mxu0  ;;  %v3412_v29 = vpop.f32.mrf.mxu1 }
 0x44f   : > { %v3423_v55 = vadd.f32 %v3412_v29, %v3322_v20  ;;  %v3324_v51 = vadd.f32 %v3317_v57, %v3234_v54  ;;  %v3936_v20 = vld [vmem:[%s10613_s19] sm:$0xff] }
 0x450   : > { %v3319_v13 = vpop.f32.mrf.mxu0  ;;  %v3414_v15 = vpop.f32.mrf.mxu1 }
 0x451   : > { %v3424_v22 = vadd.f32 %v3414_v15, %v3323_v44  ;;  %v3325_v49 = vadd.f32 %v3319_v13, %v3235_v47 }
 0x452   : > { %v3418_v36 = vpop.f32.mrf.mxu1  ;;  %v3513_v37 = vpop.f32.mrf.mxu0 }
 0x453   : > { %v3524_v53 = vadd.f32 %v3513_v37, %v3423_v55  ;;  %v3425_v58 = vadd.f32 %v3418_v36, %v3324_v51 }
 0x454   : > { %v3420_v40 = vpop.f32.mrf.mxu1  ;;  %v3515_v41 = vpop.f32.mrf.mxu0 }
 0x455   : > { %v3525_v59 = vadd.f32 %v3515_v41, %v3424_v22  ;;  %v3426_v61 = vadd.f32 %v3420_v40, %v3325_v49  ;;  %v9756_v40 = vld [vmem:[%s10603_s8 + $0x8] sm:$0xff]  ;;  %v4761_v41 = vld [vmem:[%s10623_s30] sm:$0xff] }
 0x456   : > { %v3519_v45 = vpop.f32.mrf.mxu0  ;;  %v3614_v46 = vpop.f32.mrf.mxu1 }
 0x457   : > { %v3625_v14 = vadd.f32 %v3614_v46, %v3524_v53  ;;  %v3526_v62 = vadd.f32 %v3519_v45, %v3425_v58 }
 0x458   : > { %v3521_v56 = vpop.f32.mrf.mxu0  ;;  %v3616_v24 = vpop.f32.mrf.mxu1 }
 0x459   : > { %v3626_v63 = vadd.f32 %v3616_v24, %v3525_v59  ;;  %v3527_v28 = vadd.f32 %v3521_v56, %v3426_v61 }
 0x45a   : > { %v3620_v60 = vpop.f32.mrf.mxu1  ;;  %v3715_v6 = vpop.f32.mrf.mxu0 }
 0x45b   : > { %v3726_v8 = vadd.f32 %v3715_v6, %v3625_v14  ;;  %v3627_v4 = vadd.f32 %v3620_v60, %v3526_v62 }
 0x45c   : > { %v3622_v48 = vpop.f32.mrf.mxu1  ;;  %v3717_v3 = vpop.f32.mrf.mxu0 }
 0x45d   : > { %v3727_v5 = vadd.f32 %v3717_v3, %v3626_v63  ;;  %v3740_v16 = vadd.f32 %v3733_v32, %v3726_v8  ;;  %v3628_v17 = vadd.f32 %v3622_v48, %v3527_v28 }
 0x45e   : > { %v3721_v1 = vpop.f32.mrf.mxu0 }
 0x45f   : > { %v3741_v18 = vadd.f32 %v3733_v32, %v3727_v5  ;;  %v3728_v50 = vadd.f32 %v3721_v1, %v3627_v4  ;;  %v3744_v25 = vmax.f32 %v3740_v16, 0.0 }
 0x460   : > { %v3723_v2 = vpop.f32.mrf.mxu0 }
 0x461   : > { %v3729_v21 = vadd.f32 %v3723_v2, %v3628_v17  ;;  %v3745_v23 = vmax.f32 %v3741_v18, 0.0  ;;  %v3742_v26 = vadd.f32 %v3738_v43, %v3728_v50 }
 0x463   : > { %v3743_v27 = vadd.f32 %v3738_v43, %v3729_v21  ;;  %3844 = vmatprep.mubr.f32.mxu1 %v3745_v23  ;;  %v3746_v57 = vmax.f32 %v3742_v26, 0.0 }
 0x464   : > { %3845 = vmatmul.mubr.f32.vlgmr.msra.gmra.mxu1 %v3744_v25 }
 0x465   : > { %v3747_v52 = vmax.f32 %v3743_v27, 0.0 }
 0x467   : > { %3849 = vmatprep.mubr.f32.mxu1 %v3747_v52 }
 0x468   : > { %3850 = vmatmul.mubr.f32.gmra.mxu1 %v3746_v57 }
 0x469   : > { %10090 = vmatprep.mubr.msk.f32.mxu1 %vm10536_vm11, %v10526_v0 }
 0x524   : > { %v9907_v29 = vpop.f32.mrf.mxu1 }
 0x526   : > { %v9908_v30 = vpop.f32.mrf.mxu1 }
 0x527   : > { %v11200_v33 = vadd.f32 %v9908_v30, %v9907_v29 }
 0x528   : > { %v9910_v31 = vpop.f32.mrf.mxu1 }
 0x52a   : > { %v9911_v13 = vpop.f32.mrf.mxu1 }
 0x52b   : > { %v11198_v15 = vadd.f32 %v9911_v13, %v9910_v31 }
 0x52d   : > { %10052 = vmatpush3.msra.mxu0 %v11198_v15 }
 0x52e   : > { %10053 = vmatprep.subr.mxu0 %v10526_v0 }
 0x52f   : > { %10054 = vmatpush3.msra.mxu0 %v11200_v33 }
 0x530   : > { %10056 = vmatmul.mubr.msk.f32.vlgmr.msra.gmra.mxu0 %vm1077_vm0, %v3855_v34  ;;  %10058 = vmatprep.subr.mxu0 %v10526_v0 }
 0x531   : > { %10060 = vmatprep.mubr.msk.f32.mxu0 %vm10536_vm11, %v10526_v0 }
 0x5f0   : > { %v3931_v36 = vpop.f32.mrf.mxu0 }
 0x5f1   : > { %v3932_v37 = vadd.f32 %v3931_v36, %v3860_v35 }
 0x5f2   : > { %v10057_v38 = vpop.f32.mrf.mxu0 }
 0x5f3   : > { %v11210_v39 = vmax.f32 %v3932_v37, 0.0 }
 0x5f5   : > { %3958 = vrot.lane.b32.xlu1 %v11210_v39, %s11989_s11  ;;  %3955 = vrot.lane.b32.xlu0 %v11210_v39, %s11991_s0 }
 0x5f9   : > { %3941 = vrot.lane.b32.xlu1 %v11210_v39, %s11993_s18  ;;  %3938 = vrot.lane.b32.xlu0 %v11210_v39, %s11995_s22 }
 0x5fd   : > { %4122 = vrot.lane.b32.xlu1 %v11210_v39, %s11970_s23  ;;  %4119 = vrot.lane.b32.xlu0 %v11210_v39, %s11968_s1  ;;  %s12035_s1 = sld [smem:[#allocation12_spill]]  ;;  %s11982_s23 = smov 120  }
 0x601   : > { %4215 = vrot.lane.b32.xlu1 %v11210_v39, %s11964_s26  ;;  %4212 = vrot.lane.b32.xlu0 %v11210_v39, %s11966_s2  ;;  %s11986_s26 = smov 121   ;;  %s11984_s2 = smov 56  }
 0x603   : > { %v11249_v42 = vld [vmem:[%s12035_s1 + $0x1] ss:$0 sm:$0xff]  ;;  %v11255_v47 = vld [vmem:[%s12035_s1] ss:$0 sm:$0xff]  ;;  %v11265_v49 = vld [vmem:[%s12035_s1 + $0x2] ss:$0 sm:$0xff] }
 0x604   : > { %v11275_v61 = vld [vmem:[%s12035_s1 + $0x3] ss:$0 sm:$0xff]  ;;  %v11285_v28 = vld [vmem:[%s12035_s1 + $0x5] ss:$0 sm:$0xff]  ;;  %v11297_v17 = vld [vmem:[%s12035_s1 + $0x6] ss:$0 sm:$0xff] }
 0x605   : > { %4383 = vrot.lane.b32.xlu1 %v11210_v39, %s11974_s7  ;;  %4380 = vrot.lane.b32.xlu0 %v11210_v39, %s11972_s28  ;;  %s11980_s28 = smov 55   ;;  %s11978_s7 = smov 119   ;;  %v11307_v25 = vld [vmem:[%s12035_s1 + $0x7] ss:$0 sm:$0xff]  ;;  %v11319_v30 = vld [vmem:[%s12035_s1 + $0x8] ss:$0 sm:$0xff] }
 0x606   : > { %s12042_s1 = smov 63  }
 0x609   : > { %4476 = vrot.lane.b32.xlu1 %v11210_v39, %s11976_s10  ;;  %4473 = vrot.lane.b32.xlu0 %v11210_v39, %s11986_s26  ;;  %s12036_s10 = sld [smem:[#allocation8_spill]]  ;;  %s12041_s26 = smov 65  }
 0x60d   : > { %4569 = vrot.lane.b32.xlu1 %v11210_v39, %s11984_s2  ;;  %4566 = vrot.lane.b32.xlu0 %v11210_v39, %s11982_s23  ;;  %s12039_s23 = smov 71   ;;  %s12040_s2 = smov 1  }
 0x60f   : > { %v9724_v46 = vld [vmem:[%s12036_s10 + $0x8] sm:$0xff]  ;;  %v3954_v24 = vld [vmem:[%s12036_s10] sm:$0xff]  ;;  %v9729_v6 = vld [vmem:[%s12036_s10 + $0x10] sm:$0xff] }
 0x610   : > { %v9733_v3 = vld [vmem:[%s12036_s10 + $0x18] sm:$0xff]  ;;  %v9735_v1 = vld [vmem:[%s12036_s10 + $0x20] sm:$0xff]  ;;  %v9739_v21 = vld [vmem:[%s12036_s10 + $0x28] sm:$0xff] }
 0x611   : > { %4662 = vrot.lane.b32.xlu1 %v11210_v39, %s11980_s28  ;;  %4659 = vrot.lane.b32.xlu0 %v11210_v39, %s11978_s7  ;;  %v9743_v23 = vld [vmem:[%s12036_s10 + $0x30] sm:$0xff]  ;;  %s12037_s7 = sld [smem:[#allocation9_spill]]  ;;  %v9747_v29 = vld [vmem:[%s12036_s10 + $0x38] sm:$0xff]  ;;  %s12038_s28 = smov 7  }
 0x612   : > { %v9751_v36 = vld [vmem:[%s12036_s10 + $0x40] sm:$0xff] }
 0x615   : > { %4770 = vperm.xlu1 %10443, %v4762_v19   ;;  %4754 = vperm.xlu0 %10442, %v3936_v20  }
 0x617   : > { %v4759_v37 = vld [vmem:[%s12037_s7] sm:$0xff] }
 0x619   : > { %4864 = vperm.xlu1 %10443, %v9756_v40   ;;  %4765 = vperm.xlu0 %10442, %v4761_v41  }
 0x667   : > { %v3959_v54 = vpop.permute.xlu1 %3958  ;;  %v3956_v44 = vpop.permute.xlu0 %3955 }
 0x668   : > { %v3961_v55 = vsel %vm1984_vm5, %v3956_v44, %v3959_v54 }
 0x669   : > { %v3970_v45 = vmul.f32 %v11249_v42, %v3961_v55 }
 0x66b   : > { %v3942_v51 = vpop.permute.xlu1 %3941  ;;  %10059 = vmatpush3.msra.mxu0 %v3970_v45  ;;  %v3939_v22 = vpop.permute.xlu0 %3938 }
 0x66c   : > { %v3945_v53 = vsel %vm3944_vm12, %v3939_v22, %v3942_v51  ;;  %10061 = vmatmul.mubr.msk.f32.vlgmr.msra.gmra.mxu0 %vm1984_vm5, %v9724_v46  ;;  %10063 = vmatprep.subr.mxu0 %v10526_v0 }
 0x66d   : > { %v3953_v56 = vmul.f32 %v11255_v47, %v3945_v53  ;;  %10065 = vmatprep.mubr.msk.f32.mxu0 %vm10536_vm11, %v10526_v0 }
 0x66f   : > { %v4123_v58 = vpop.permute.xlu1 %4122  ;;  %10064 = vmatpush3.msra.mxu0 %v3953_v56  ;;  %v4120_v59 = vpop.permute.xlu0 %4119 }
 0x670   : > { %v4126_v14 = vsel %vm4125_vm13, %v4120_v59, %v4123_v58  ;;  %10066 = vmatmul.mubr.msk.f32.vlgmr.msra.gmra.mxu0 %vm1984_vm5, %v3954_v24  ;;  %10068 = vmatprep.subr.mxu0 %v10526_v0 }
 0x671   : > { %v4135_v60 = vmul.f32 %v11265_v49, %v4126_v14  ;;  %10070 = vmatprep.mubr.msk.f32.mxu0 %vm10536_vm11, %v10526_v0 }
 0x673   : > { %v4216_v62 = vpop.permute.xlu1 %4215  ;;  %10069 = vmatpush3.msra.mxu0 %v4135_v60  ;;  %v4213_v63 = vpop.permute.xlu0 %4212 }
 0x674   : > { %v4218_v8 = vsel %vm1378_vm4, %v4213_v63, %v4216_v62  ;;  %10071 = vmatmul.mubr.msk.f32.vlgmr.msra.gmra.mxu0 %vm1984_vm5, %v9729_v6  ;;  %10073 = vmatprep.subr.mxu0 %v10526_v0 }
 0x675   : > { %v4227_v48 = vmul.f32 %v11275_v61, %v4218_v8  ;;  %10075 = vmatprep.mubr.msk.f32.mxu0 %vm10536_vm11, %v10526_v0 }
 0x677   : > { %v4384_v4 = vpop.permute.xlu1 %4383  ;;  %10074 = vmatpush3.msra.mxu0 %v4227_v48  ;;  %v4381_v5 = vpop.permute.xlu0 %4380 }
 0x678   : > { %v4387_v32 = vsel %vm4386_vm14, %v4381_v5, %v4384_v4  ;;  %10076 = vmatmul.mubr.msk.f32.vlgmr.msra.gmra.mxu0 %vm1984_vm5, %v9733_v3  ;;  %10078 = vmatprep.subr.mxu0 %v10526_v0 }
 0x679   : > { %v4396_v16 = vmul.f32 %v11285_v28, %v4387_v32  ;;  %10079 = vmatpush3.msra.mxu0 %v11210_v39  ;;  %10080 = vmatprep.mubr.msk.f32.mxu0 %vm10536_vm11, %v10526_v0 }
 0x67a   : > { %10083 = vmatprep.subr.mxu0 %v10526_v0 }
 0x67b   : > { %v4477_v18 = vpop.permute.xlu1 %4476  ;;  %v4474_v50 = vpop.permute.xlu0 %4473 }
 0x67c   : > { %v4480_v2 = vsel %vm4479_vm15, %v4474_v50, %v4477_v18  ;;  %10081 = vmatmul.mubr.msk.f32.vlgmr.msra.gmra.mxu0 %vm1984_vm5, %v9735_v1 }
 0x67d   : > { %v4489_v43 = vmul.f32 %v11297_v17, %v4480_v2  ;;  %10084 = vmatpush3.msra.mxu0 %v4396_v16  ;;  %10085 = vmatprep.mubr.msk.f32.mxu0 %vm10536_vm11, %v10526_v0  ;;  %v4760_v16 = vld [vmem:[%s12037_s7 + $0x8] sm:$0xff] }
 0x67e   : > { %10093 = vmatprep.subr.mxu0 %v10526_v0 }
 0x67f   : > { %v4570_v26 = vpop.permute.xlu1 %4569  ;;  %10089 = vmatpush3.msra.mxu1 %v4489_v43  ;;  %v4567_v27 = vpop.permute.xlu0 %4566 }
 0x680   : > { %v4573_v52 = vsel %vm4572_vm2, %v4567_v27, %v4570_v26  ;;  %10086 = vmatmul.mubr.msk.f32.vlgmr.msra.gmra.mxu0 %vm1984_vm5, %v9739_v21  ;;  %10091 = vmatmul.mubr.msk.f32.vlgmr.msra.gmra.mxu1 %vm1984_vm5, %v9743_v23 }
 0x681   : > { %v4582_v57 = vmul.f32 %v11307_v25, %v4573_v52  ;;  %10095 = vmatprep.mubr.msk.f32.mxu0 %vm10536_vm11, %v10526_v0  ;;  %10098 = vmatprep.subr.mxu1 %v10526_v0 }
 0x682   : > { %10100 = vmatprep.mubr.msk.f32.mxu1 %vm10536_vm11, %v10526_v0 }
 0x683   : > { %v4663_v31 = vpop.permute.xlu1 %4662  ;;  %10094 = vmatpush3.msra.mxu0 %v4582_v57  ;;  %v4660_v13 = vpop.permute.xlu0 %4659  ;;  %v9755_v57 = vld [vmem:[%s12027_s3 + $0x8] sm:$0xff] }
 0x684   : > { %v4666_v34 = vsel %vm4665_vm3, %v4660_v13, %v4663_v31  ;;  %10096 = vmatmul.mubr.msk.f32.vlgmr.msra.gmra.mxu0 %vm1984_vm5, %v9747_v29 }
 0x685   : > { %v4675_v35 = vmul.f32 %v11319_v30, %v4666_v34  ;;  %10105 = vmatprep.mubr.msk.f32.mxu0 %vm1984_vm5, %v4759_v37  ;;  %v9780_v34 = vld [vmem:[%s10623_s30 + $0x18] sm:$0xff]  ;;  %v9779_v37 = vld [vmem:[%s10623_s30 + $0x10] sm:$0xff] }
 0x687   : > { %10099 = vmatpush3.msra.mxu1 %v4675_v35  ;;  %v9758_v35 = vld [vmem:[%s10613_s19 + $0x8] sm:$0xff] }
 0x688   : > { %10101 = vmatmul.mubr.msk.f32.vlgmr.msra.gmra.mxu1 %vm1984_vm5, %v9751_v36  ;;  %10108 = vmatprep.subr.mxu1 %v10526_v0  ;;  %v9784_v36 = vld [vmem:[%s10603_s8 + $0x10] sm:$0xff] }
 0x689   : > { %10112 = vmatprep.mubr.msk.f32.mxu1 %vm10536_vm11, %v10526_v0 }
 0x690   : > { %v4755_v3 = vpop.permute.xlu0 %4754  ;;  %v4771_v1 = vpop.permute.xlu1 %4770 }
 0x694   : > { %v4766_v2 = vpop.permute.xlu0 %4765 }
 0x72c   : > { %v4042_v38 = vpop.f32.mrf.mxu0 }
 0x72e   : > { %v10062_v39 = vpop.f32.mrf.mxu0 }
 0x730   : > { %v4115_v19 = vpop.f32.mrf.mxu0 }
 0x731   : > { %v4116_v44 = vadd.f32 %v4115_v19, %v4042_v38 }
 0x732   : > { %v10067_v20 = vpop.f32.mrf.mxu0 }
 0x734   : > { %v4207_v40 = vpop.f32.mrf.mxu0 }
 0x735   : > { %v4211_v45 = vadd.f32 %v4207_v40, %v4116_v44  ;;  %v9760_v40 = vld [vmem:[%s12036_s10 + $0x50] sm:$0xff] }
 0x736   : > { %v10072_v41 = vpop.f32.mrf.mxu0 }
 0x738   : > { %v4299_v54 = vpop.f32.mrf.mxu0 }
 0x739   : > { %v4303_v51 = vadd.f32 %v4299_v54, %v4211_v45  ;;  %v9759_v45 = vld [vmem:[%s12036_s10 + $0x48] sm:$0xff] }
 0x73a   : > { %v10077_v55 = vpop.f32.mrf.mxu0 }
 0x73c   : > { %v4375_v46 = vpop.f32.mrf.mxu0 }
 0x73d   : > { %v4379_v53 = vadd.f32 %v4375_v46, %v4303_v51 }
 0x73e   : > { %v10082_v22 = vpop.f32.mrf.mxu0 }
 0x740   : > { %v4468_v56 = vpop.f32.mrf.mxu0  ;;  %v4561_v24 = vpop.f32.mrf.mxu1 }
 0x741   : > { %v4472_v58 = vadd.f32 %v4468_v56, %v4379_v53  ;;  %v9763_v56 = vld [vmem:[%s12036_s10 + $0x58] sm:$0xff] }
 0x742   : > { %v10087_v59 = vpop.f32.mrf.mxu0  ;;  %v10092_v14 = vpop.f32.mrf.mxu1 }
 0x743   : > { %v4565_v60 = vadd.f32 %v4561_v24, %v4472_v58 }
 0x744   : > { %v4654_v6 = vpop.f32.mrf.mxu0 }
 0x745   : > { %v4658_v63 = vadd.f32 %v4654_v6, %v4565_v60  ;;  %v9765_v60 = vld [vmem:[%s12036_s10 + $0x60] sm:$0xff]  ;;  %v9767_v6 = vld [vmem:[%s12036_s10 + $0x68] sm:$0xff] }
 0x746   : > { %v10097_v62 = vpop.f32.mrf.mxu0 }
 0x748   : > { %v4747_v8 = vpop.f32.mrf.mxu1 }
 0x749   : > { %v4751_v48 = vadd.f32 %v4747_v8, %v4658_v63 }
 0x74a   : > { %v10102_v4 = vpop.f32.mrf.mxu1 }
 0x74b   : > { %v4757_v5 = vadd.f32 %v4755_v3, %v4751_v48  ;;  %v9769_v3 = vld [vmem:[%s12036_s10 + $0x70] sm:$0xff] }
 0x74d   : > { %v4758_v32 = vmax.f32 %v4757_v5, 0.0 }
 0x74f   : > { %10103 = vmatprep.subr.mxu0 %v4758_v32 }
 0x750   : > { %10104 = vmatpush3.msra.mxu0 %v4758_v32 }
 0x751   : > { %10106 = vmatmul.mubr.msk.f32.vlgmr.msra.gmra.mxu0 %vm1984_vm5, %v4760_v16  ;;  %10115 = vmatprep.subr.mxu0 %v10526_v0 }
 0x752   : > { %10117 = vmatprep.mubr.msk.f32.mxu0 %vm10536_vm11, %v10526_v0 }
 0x811   : > { %v10107_v18 = vpop.f32.mrf.mxu0 }
 0x812   : > { %v4851_v50 = vadd.f32 %v10107_v18, %v4771_v1  ;;  %v9771_v1 = vld [vmem:[%s12036_s10 + $0x78] sm:$0xff] }
 0x813   : > { %v4845_v43 = vpop.f32.mrf.mxu0 }
 0x814   : > { %v11339_v21 = vadd.f32 %v11198_v15, %v4851_v50  ;;  %v4846_v23 = vadd.f32 %v4845_v43, %v4766_v2  ;;  %v4865_v15 = vpop.permute.xlu1 %4864 }
 0x816   : > { %v4857_v26 = vmax.f32 %v11339_v21, 0.0  ;;  %v11343_v27 = vadd.f32 %v11200_v33, %v4846_v23  ;;  %v9773_v23 = vld [vmem:[%s12036_s10 + $0x80] sm:$0xff] }
 0x818   : > { %v4856_v52 = vmax.f32 %v11343_v27, 0.0  ;;  %10109 = vmatpush3.msra.mxu1 %v4857_v26 }
 0x819   : > { %10110 = vmatprep.subr.mxu1 %v10526_v0 }
 0x81a   : > { %10111 = vmatpush3.msra.mxu1 %v4856_v52 }
 0x81b   : > { %10113 = vmatmul.mubr.msk.f32.vlgmr.msra.gmra.mxu1 %vm1077_vm0, %v9755_v57  ;;  %10120 = vmatprep.subr.mxu1 %v10526_v0 }
 0x81c   : > { %10122 = vmatprep.mubr.msk.f32.mxu1 %vm10536_vm11, %v10526_v0 }
 0x8db   : > { %v4936_v33 = vpop.f32.mrf.mxu1 }
 0x8dc   : > { %v4937_v29 = vadd.f32 %v4936_v33, %v4865_v15 }
 0x8dd   : > { %v10114_v31 = vpop.f32.mrf.mxu1 }
 0x8de   : > { %v4940_v13 = vmax.f32 %v4937_v29, 0.0  ;;  %v9775_v31 = vld [vmem:[%s12036_s10 + $0x88] sm:$0xff] }
 0x8e0   : > { %4957 = vrot.lane.b32.xlu1 %v4940_v13, %s11989_s11  ;;  %4954 = vrot.lane.b32.xlu0 %v4940_v13, %s11991_s0  ;;  %s12043_s11 = smov 127   ;;  %s12044_s0 = smov 57  }
 0x8e4   : > { %4947 = vrot.lane.b32.xlu1 %v4940_v13, %s11993_s18  ;;  %4944 = vrot.lane.b32.xlu0 %v4940_v13, %s11995_s22  ;;  %s12046_s18 = smov 56   ;;  %s12047_s22 = smov 120  }
 0x8e8   : > { %5113 = vrot.lane.b32.xlu1 %v4940_v13, %s12038_s28  ;;  %5110 = vrot.lane.b32.xlu0 %v4940_v13, %s12039_s23 }
 0x8ec   : > { %5197 = vrot.lane.b32.xlu1 %v4940_v13, %s12040_s2  ;;  %5194 = vrot.lane.b32.xlu0 %v4940_v13, %s12041_s26 }
 0x8f0   : > { %5357 = vrot.lane.b32.xlu1 %v4940_v13, %s12042_s1  ;;  %5354 = vrot.lane.b32.xlu0 %v4940_v13, %s12043_s11 }
 0x8f4   : > { %5441 = vrot.lane.b32.xlu1 %v4940_v13, %s12044_s0  ;;  %5438 = vrot.lane.b32.xlu0 %v4940_v13, %s12045_s5 }
 0x8f8   : > { %5525 = vrot.lane.b32.xlu1 %v4940_v13, %s12046_s18  ;;  %5522 = vrot.lane.b32.xlu0 %v4940_v13, %s12047_s22 }
 0x8fc   : > { %5609 = vrot.lane.b32.xlu1 %v4940_v13, %s12048_s6  ;;  %5606 = vrot.lane.b32.xlu0 %v4940_v13, %s12049_s9 }
 0x900   : > { %5710 = vperm.xlu1 %10443, %v9780_v34   ;;  %5692 = vperm.xlu0 %10442, %v9758_v35  }
 0x904   : > { %5804 = vperm.xlu1 %10443, %v9784_v36   ;;  %5705 = vperm.xlu0 %10442, %v9779_v37  }
 0x952   : > { %v4958_v38 = vpop.permute.xlu1 %4957  ;;  %v4955_v39 = vpop.permute.xlu0 %4954 }
 0x953   : > { %v4960_v19 = vsel %vm1984_vm5, %v4955_v39, %v4958_v38 }
 0x954   : > { %v4961_v20 = vmul.f32 %v11249_v42, %v4960_v19 }
 0x956   : > { %v4948_v41 = vpop.permute.xlu1 %4947  ;;  %10116 = vmatpush3.msra.mxu0 %v4961_v20  ;;  %v4945_v54 = vpop.permute.xlu0 %4944 }
 0x957   : > { %v4950_v44 = vsel %vm3944_vm12, %v4945_v54, %v4948_v41  ;;  %10118 = vmatmul.mubr.msk.f32.vlgmr.msra.gmra.mxu0 %vm1984_vm5, %v9760_v40  ;;  %10125 = vmatprep.subr.mxu0 %v10526_v0 }
 0x958   : > { %v4951_v55 = vmul.f32 %v11255_v47, %v4950_v44  ;;  %10127 = vmatprep.mubr.msk.f32.mxu0 %vm10536_vm11, %v10526_v0 }
 0x95a   : > { %v5114_v46 = vpop.permute.xlu1 %5113  ;;  %10121 = vmatpush3.msra.mxu1 %v4951_v55  ;;  %v5111_v51 = vpop.permute.xlu0 %5110 }
 0x95b   : > { %v5116_v22 = vsel %vm4125_vm13, %v5111_v51, %v5114_v46  ;;  %10130 = vmatprep.subr.mxu1 %v10526_v0  ;;  %10123 = vmatmul.mubr.msk.f32.vlgmr.msra.gmra.mxu1 %vm1984_vm5, %v9759_v45 }
 0x95c   : > { %v5117_v53 = vmul.f32 %v11265_v49, %v5116_v22  ;;  %10132 = vmatprep.mubr.msk.f32.mxu1 %vm10536_vm11, %v10526_v0 }
 0x95e   : > { %v5198_v24 = vpop.permute.xlu1 %5197  ;;  %10126 = vmatpush3.msra.mxu0 %v5117_v53  ;;  %v5195_v58 = vpop.permute.xlu0 %5194 }
 0x95f   : > { %v5200_v59 = vsel %vm1378_vm4, %v5195_v58, %v5198_v24  ;;  %10135 = vmatprep.subr.mxu0 %v10526_v0  ;;  %10128 = vmatmul.mubr.msk.f32.vlgmr.msra.gmra.mxu0 %vm1984_vm5, %v9763_v56 }
 0x960   : > { %v5201_v14 = vmul.f32 %v11275_v61, %v5200_v59  ;;  %10136 = vmatpush3.msra.mxu0 %v4940_v13  ;;  %10137 = vmatprep.mubr.msk.f32.mxu0 %vm10536_vm11, %v10526_v0  ;;  %v9777_v13 = vld [vmem:[%s12037_s7 + $0x10] sm:$0xff] }
 0x961   : > { %10145 = vmatprep.subr.mxu0 %v10526_v0 }
 0x962   : > { %v5358_v62 = vpop.permute.xlu1 %5357  ;;  %10131 = vmatpush3.msra.mxu1 %v5201_v14  ;;  %v5355_v63 = vpop.permute.xlu0 %5354 }
 0x963   : > { %v5360_v8 = vsel %vm4386_vm14, %v5355_v63, %v5358_v62  ;;  %10140 = vmatprep.subr.mxu1 %v10526_v0  ;;  %10133 = vmatmul.mubr.msk.f32.vlgmr.msra.gmra.mxu1 %vm1984_vm5, %v9765_v60 }
 0x964   : > { %v5361_v48 = vmul.f32 %v11285_v28, %v5360_v8  ;;  %10138 = vmatmul.mubr.msk.f32.vlgmr.msra.gmra.mxu0 %vm1984_vm5, %v9767_v6  ;;  %10142 = vmatprep.mubr.msk.f32.mxu1 %vm10536_vm11, %v10526_v0 }
 0x965   : > { %10147 = vmatprep.mubr.msk.f32.mxu0 %vm10536_vm11, %v10526_v0 }
 0x966   : > { %v5442_v4 = vpop.permute.xlu1 %5441  ;;  %10141 = vmatpush3.msra.mxu1 %v5361_v48  ;;  %v5439_v5 = vpop.permute.xlu0 %5438 }
 0x967   : > { %v5444_v32 = vsel %vm4479_vm15, %v5439_v5, %v5442_v4  ;;  %10143 = vmatmul.mubr.msk.f32.vlgmr.msra.gmra.mxu1 %vm1984_vm5, %v9769_v3  ;;  %10150 = vmatprep.subr.mxu1 %v10526_v0  ;;  %v9778_v3 = vld [vmem:[%s12037_s7 + $0x18] sm:$0xff] }
 0x968   : > { %v5445_v16 = vmul.f32 %v11297_v17, %v5444_v32  ;;  %10152 = vmatprep.mubr.msk.f32.mxu1 %vm10536_vm11, %v10526_v0 }
 0x96a   : > { %v5526_v18 = vpop.permute.xlu1 %5525  ;;  %10146 = vmatpush3.msra.mxu0 %v5445_v16  ;;  %v5523_v50 = vpop.permute.xlu0 %5522 }
 0x96b   : > { %v5528_v2 = vsel %vm4572_vm2, %v5523_v50, %v5526_v18  ;;  %10148 = vmatmul.mubr.msk.f32.vlgmr.msra.gmra.mxu0 %vm1984_vm5, %v9771_v1  ;;  %10155 = vmatprep.subr.mxu0 %v10526_v0 }
 0x96c   : > { %v5529_v43 = vmul.f32 %v11307_v25, %v5528_v2  ;;  %10157 = vmatprep.mubr.msk.f32.mxu0 %vm10536_vm11, %v10526_v0 }
 0x96e   : > { %v5610_v57 = vpop.permute.xlu1 %5609  ;;  %10151 = vmatpush3.msra.mxu1 %v5529_v43  ;;  %v5607_v15 = vpop.permute.xlu0 %5606 }
 0x96f   : > { %v5612_v33 = vsel %vm4665_vm3, %v5607_v15, %v5610_v57  ;;  %10153 = vmatmul.mubr.msk.f32.vlgmr.msra.gmra.mxu1 %vm1984_vm5, %v9773_v23  ;;  %v9783_v57 = vld [vmem:[%s12027_s3 + $0x10] sm:$0xff] }
 0x970   : > { %v5613_v29 = vmul.f32 %v11319_v30, %v5612_v33  ;;  %10162 = vmatprep.mubr.msk.f32.mxu1 %vm1984_vm5, %v9777_v13  ;;  %v9808_v33 = vld [vmem:[%s10623_s30 + $0x28] sm:$0xff]  ;;  %v9807_v13 = vld [vmem:[%s10623_s30 + $0x20] sm:$0xff] }
 0x972   : > { %10156 = vmatpush3.msra.mxu0 %v5613_v29  ;;  %v9786_v29 = vld [vmem:[%s10613_s19 + $0x10] sm:$0xff] }
 0x973   : > { %10158 = vmatmul.mubr.msk.f32.vlgmr.msra.gmra.mxu0 %vm1984_vm5, %v9775_v31  ;;  %10165 = vmatprep.subr.mxu0 %v10526_v0  ;;  %v9812_v31 = vld [vmem:[%s10603_s8 + $0x18] sm:$0xff] }
 0x974   : > { %10169 = vmatprep.mubr.msk.f32.mxu0 %vm10536_vm11, %v10526_v0 }
 0x97b   : > { %v5693_v62 = vpop.permute.xlu0 %5692  ;;  %v5711_v4 = vpop.permute.xlu1 %5710 }
 0x97f   : > { %v5706_v16 = vpop.permute.xlu0 %5705  ;;  %v5805_v21 = vpop.permute.xlu1 %5804 }
 0xa17   : > { %v5033_v34 = vpop.f32.mrf.mxu0 }
 0xa19   : > { %v10119_v35 = vpop.f32.mrf.mxu0 }
 0xa1b   : > { %v5106_v36 = vpop.f32.mrf.mxu1 }
 0xa1c   : > { %v5107_v37 = vadd.f32 %v5106_v36, %v5033_v34 }
 0xa1d   : > { %v10124_v38 = vpop.f32.mrf.mxu1 }
 0xa1e   : > { %v9788_v38 = vld [vmem:[%s12036_s10 + $0x98] sm:$0xff] }
 0xa1f   : > { %v5189_v39 = vpop.f32.mrf.mxu0 }
 0xa20   : > { %v5193_v19 = vadd.f32 %v5189_v39, %v5107_v37 }
 0xa21   : > { %v10129_v20 = vpop.f32.mrf.mxu0 }
 0xa23   : > { %v5273_v40 = vpop.f32.mrf.mxu1 }
 0xa24   : > { %v5277_v41 = vadd.f32 %v5273_v40, %v5193_v19  ;;  %v5349_v54 = vpop.f32.mrf.mxu0 }
 0xa25   : > { %v10134_v44 = vpop.f32.mrf.mxu1 }
 0xa26   : > { %v5353_v55 = vadd.f32 %v5349_v54, %v5277_v41  ;;  %v10139_v45 = vpop.f32.mrf.mxu0  ;;  %v9787_v41 = vld [vmem:[%s12036_s10 + $0x90] sm:$0xff] }
 0xa27   : > { %v5433_v46 = vpop.f32.mrf.mxu1 }
 0xa28   : > { %v5437_v22 = vadd.f32 %v5433_v46, %v5353_v55  ;;  %v9791_v46 = vld [vmem:[%s12036_s10 + $0xa0] sm:$0xff] }
 0xa29   : > { %v10144_v51 = vpop.f32.mrf.mxu1 }
 0xa2b   : > { %v5517_v53 = vpop.f32.mrf.mxu0 }
 0xa2c   : > { %v5521_v24 = vadd.f32 %v5517_v53, %v5437_v22 }
 0xa2d   : > { %v10149_v56 = vpop.f32.mrf.mxu0 }
 0xa2f   : > { %v5601_v58 = vpop.f32.mrf.mxu1 }
 0xa30   : > { %v5605_v14 = vadd.f32 %v5601_v58, %v5521_v24  ;;  %v9793_v24 = vld [vmem:[%s12036_s10 + $0xa8] sm:$0xff]  ;;  %v9795_v58 = vld [vmem:[%s12036_s10 + $0xb0] sm:$0xff] }
 0xa31   : > { %v10154_v59 = vpop.f32.mrf.mxu1 }
 0xa33   : > { %v5685_v60 = vpop.f32.mrf.mxu0 }
 0xa34   : > { %v5689_v6 = vadd.f32 %v5685_v60, %v5605_v14 }
 0xa35   : > { %v10159_v63 = vpop.f32.mrf.mxu0 }
 0xa36   : > { %v5695_v8 = vadd.f32 %v5693_v62, %v5689_v6  ;;  %v9797_v62 = vld [vmem:[%s12036_s10 + $0xb8] sm:$0xff] }
 0xa38   : > { %v5696_v48 = vmax.f32 %v5695_v8, 0.0 }
 0xa3a   : > { %10160 = vmatprep.subr.mxu1 %v5696_v48 }
 0xa3b   : > { %10161 = vmatpush3.msra.mxu1 %v5696_v48 }
 0xa3c   : > { %10163 = vmatmul.mubr.msk.f32.vlgmr.msra.gmra.mxu1 %vm1984_vm5, %v9778_v3  ;;  %10172 = vmatprep.subr.mxu1 %v10526_v0 }
 0xa3d   : > { %10174 = vmatprep.mubr.msk.f32.mxu1 %vm10536_vm11, %v10526_v0 }
 0xafc   : > { %v10164_v5 = vpop.f32.mrf.mxu1 }
 0xafd   : > { %v5791_v32 = vadd.f32 %v10164_v5, %v5711_v4  ;;  %v9799_v4 = vld [vmem:[%s12036_s10 + $0xc0] sm:$0xff] }
 0xafe   : > { %v5785_v1 = vpop.f32.mrf.mxu1 }
 0xaff   : > { %v11443_v18 = vadd.f32 %v5791_v32, %v4857_v26  ;;  %v5786_v50 = vadd.f32 %v5785_v1, %v5706_v16 }
 0xb01   : > { %v5797_v2 = vmax.f32 %v11443_v18, 0.0  ;;  %v11448_v43 = vadd.f32 %v5786_v50, %v4856_v52  ;;  %v9801_v50 = vld [vmem:[%s12036_s10 + $0xc8] sm:$0xff] }
 0xb03   : > { %v5796_v23 = vmax.f32 %v11448_v43, 0.0  ;;  %10166 = vmatpush3.msra.mxu0 %v5797_v2 }
 0xb04   : > { %10167 = vmatprep.subr.mxu0 %v10526_v0 }
 0xb05   : > { %10168 = vmatpush3.msra.mxu0 %v5796_v23 }
 0xb06   : > { %10170 = vmatmul.mubr.msk.f32.vlgmr.msra.gmra.mxu0 %vm1077_vm0, %v9783_v57  ;;  %10177 = vmatprep.subr.mxu0 %v10526_v0 }
 0xb07   : > { %10179 = vmatprep.mubr.msk.f32.mxu0 %vm10536_vm11, %v10526_v0 }
 0xbc6   : > { %v5876_v26 = vpop.f32.mrf.mxu0 }
 0xbc7   : > { %v5877_v27 = vadd.f32 %v5876_v26, %v5805_v21 }
 0xbc8   : > { %v10171_v52 = vpop.f32.mrf.mxu0 }
 0xbc9   : > { %v5880_v15 = vmax.f32 %v5877_v27, 0.0  ;;  %v9803_v52 = vld [vmem:[%s12036_s10 + $0xd0] sm:$0xff] }
 0xbcb   : > { %5897 = vrot.lane.b32.xlu1 %v5880_v15, %s12050_s12  ;;  %5894 = vrot.lane.b32.xlu0 %v5880_v15, %s12051_s13 }
 0xbcf   : > { %5887 = vrot.lane.b32.xlu1 %v5880_v15, %s12052_s17  ;;  %5884 = vrot.lane.b32.xlu0 %v5880_v15, %s12053_s21 }
 0xbd3   : > { %6053 = vrot.lane.b32.xlu1 %v5880_v15, %s12038_s28  ;;  %6050 = vrot.lane.b32.xlu0 %v5880_v15, %s12039_s23 }
 0xbd7   : > { %6137 = vrot.lane.b32.xlu1 %v5880_v15, %s12040_s2  ;;  %6134 = vrot.lane.b32.xlu0 %v5880_v15, %s12041_s26 }
 0xbdb   : > { %6297 = vrot.lane.b32.xlu1 %v5880_v15, %s12042_s1  ;;  %6294 = vrot.lane.b32.xlu0 %v5880_v15, %s12043_s11 }
 0xbdf   : > { %6381 = vrot.lane.b32.xlu1 %v5880_v15, %s12044_s0  ;;  %6378 = vrot.lane.b32.xlu0 %v5880_v15, %s12045_s5 }
 0xbe3   : > { %6465 = vrot.lane.b32.xlu1 %v5880_v15, %s12046_s18  ;;  %6462 = vrot.lane.b32.xlu0 %v5880_v15, %s12047_s22 }
 0xbe7   : > { %6549 = vrot.lane.b32.xlu1 %v5880_v15, %s12048_s6  ;;  %6546 = vrot.lane.b32.xlu0 %v5880_v15, %s12049_s9 }
 0xbeb   : > { %6650 = vperm.xlu1 %10443, %v9808_v33   ;;  %6632 = vperm.xlu0 %10442, %v9786_v29  }
 0xbef   : > { %6744 = vperm.xlu1 %10443, %v9812_v31   ;;  %6645 = vperm.xlu0 %10442, %v9807_v13  }
 0xc3d   : > { %v5898_v34 = vpop.permute.xlu1 %5897  ;;  %v5895_v35 = vpop.permute.xlu0 %5894 }
 0xc3e   : > { %v5900_v36 = vsel %vm1984_vm5, %v5895_v35, %v5898_v34 }
 0xc3f   : > { %v5901_v37 = vmul.f32 %v11249_v42, %v5900_v36 }
 0xc41   : > { %v5888_v39 = vpop.permute.xlu1 %5887  ;;  %10173 = vmatpush3.msra.mxu1 %v5901_v37  ;;  %v5885_v19 = vpop.permute.xlu0 %5884 }
 0xc42   : > { %v5890_v20 = vsel %vm3944_vm12, %v5885_v19, %v5888_v39  ;;  %10175 = vmatmul.mubr.msk.f32.vlgmr.msra.gmra.mxu1 %vm1984_vm5, %v9788_v38  ;;  %10182 = vmatprep.subr.mxu1 %v10526_v0 }
 0xc43   : > { %v5891_v40 = vmul.f32 %v11255_v47, %v5890_v20  ;;  %10184 = vmatprep.mubr.msk.f32.mxu1 %vm10536_vm11, %v10526_v0 }
 0xc45   : > { %v6054_v54 = vpop.permute.xlu1 %6053  ;;  %10178 = vmatpush3.msra.mxu0 %v5891_v40  ;;  %v6051_v44 = vpop.permute.xlu0 %6050 }
 0xc46   : > { %v6056_v55 = vsel %vm4125_vm13, %v6051_v44, %v6054_v54  ;;  %10187 = vmatprep.subr.mxu0 %v10526_v0  ;;  %10180 = vmatmul.mubr.msk.f32.vlgmr.msra.gmra.mxu0 %vm1984_vm5, %v9787_v41 }
 0xc47   : > { %v6057_v45 = vmul.f32 %v11265_v49, %v6056_v55  ;;  %10189 = vmatprep.mubr.msk.f32.mxu0 %vm10536_vm11, %v10526_v0 }
 0xc49   : > { %v6138_v51 = vpop.permute.xlu1 %6137  ;;  %10183 = vmatpush3.msra.mxu1 %v6057_v45  ;;  %v6135_v22 = vpop.permute.xlu0 %6134 }
 0xc4a   : > { %v6140_v53 = vsel %vm1378_vm4, %v6135_v22, %v6138_v51  ;;  %10192 = vmatprep.subr.mxu1 %v10526_v0  ;;  %10185 = vmatmul.mubr.msk.f32.vlgmr.msra.gmra.mxu1 %vm1984_vm5, %v9791_v46 }
 0xc4b   : > { %v6141_v56 = vmul.f32 %v11275_v61, %v6140_v53  ;;  %10193 = vmatpush3.msra.mxu1 %v5880_v15  ;;  %10194 = vmatprep.mubr.msk.f32.mxu1 %vm10536_vm11, %v10526_v0  ;;  %v9805_v15 = vld [vmem:[%s12037_s7 + $0x20] sm:$0xff] }
 0xc4c   : > { %10202 = vmatprep.subr.mxu1 %v10526_v0 }
 0xc4d   : > { %v6298_v59 = vpop.permute.xlu1 %6297  ;;  %10188 = vmatpush3.msra.mxu0 %v6141_v56  ;;  %v6295_v14 = vpop.permute.xlu0 %6294 }
 0xc4e   : > { %v6300_v60 = vsel %vm4386_vm14, %v6295_v14, %v6298_v59  ;;  %10197 = vmatprep.subr.mxu0 %v10526_v0  ;;  %10190 = vmatmul.mubr.msk.f32.vlgmr.msra.gmra.mxu0 %vm1984_vm5, %v9793_v24 }
 0xc4f   : > { %v6301_v6 = vmul.f32 %v11285_v28, %v6300_v60  ;;  %10195 = vmatmul.mubr.msk.f32.vlgmr.msra.gmra.mxu1 %vm1984_vm5, %v9795_v58  ;;  %10199 = vmatprep.mubr.msk.f32.mxu0 %vm10536_vm11, %v10526_v0 }
 0xc50   : > { %10204 = vmatprep.mubr.msk.f32.mxu1 %vm10536_vm11, %v10526_v0 }
 0xc51   : > { %v6382_v63 = vpop.permute.xlu1 %6381  ;;  %10198 = vmatpush3.msra.mxu0 %v6301_v6  ;;  %v6379_v8 = vpop.permute.xlu0 %6378 }
 0xc52   : > { %v6384_v48 = vsel %vm4479_vm15, %v6379_v8, %v6382_v63  ;;  %10200 = vmatmul.mubr.msk.f32.vlgmr.msra.gmra.mxu0 %vm1984_vm5, %v9797_v62  ;;  %10207 = vmatprep.subr.mxu0 %v10526_v0  ;;  %v9806_v62 = vld [vmem:[%s12037_s7 + $0x28] sm:$0xff] }
 0xc53   : > { %v6385_v3 = vmul.f32 %v11297_v17, %v6384_v48  ;;  %10209 = vmatprep.mubr.msk.f32.mxu0 %vm10536_vm11, %v10526_v0 }
 0xc55   : > { %v6466_v5 = vpop.permute.xlu1 %6465  ;;  %10203 = vmatpush3.msra.mxu1 %v6385_v3  ;;  %v6463_v32 = vpop.permute.xlu0 %6462 }
 0xc56   : > { %v6468_v16 = vsel %vm4572_vm2, %v6463_v32, %v6466_v5  ;;  %10205 = vmatmul.mubr.msk.f32.vlgmr.msra.gmra.mxu1 %vm1984_vm5, %v9799_v4  ;;  %10212 = vmatprep.subr.mxu1 %v10526_v0 }
 0xc57   : > { %v6469_v1 = vmul.f32 %v11307_v25, %v6468_v16  ;;  %10214 = vmatprep.mubr.msk.f32.mxu1 %vm10536_vm11, %v10526_v0 }
 0xc59   : > { %v6550_v57 = vpop.permute.xlu1 %6549  ;;  %10208 = vmatpush3.msra.mxu0 %v6469_v1  ;;  %v6547_v21 = vpop.permute.xlu0 %6546 }
 0xc5a   : > { %v6552_v26 = vsel %vm4665_vm3, %v6547_v21, %v6550_v57  ;;  %10210 = vmatmul.mubr.msk.f32.vlgmr.msra.gmra.mxu0 %vm1984_vm5, %v9801_v50  ;;  %v9811_v57 = vld [vmem:[%s12027_s3 + $0x18] sm:$0xff]  ;;  %s12054_s3 = sld [smem:[#allocation22_spill]] }
 0xc5b   : > { %v6553_v27 = vmul.f32 %v11319_v30, %v6552_v26  ;;  %10219 = vmatprep.mubr.msk.f32.mxu0 %vm1984_vm5, %v9805_v15  ;;  %v9835_v26 = vld [vmem:[%s10623_s30 + $0x30] sm:$0xff]  ;;  %v9836_v15 = vld [vmem:[%s10623_s30 + $0x38] sm:$0xff] }
 0xc5d   : > { %10213 = vmatpush3.msra.mxu1 %v6553_v27  ;;  %v9814_v27 = vld [vmem:[%s10613_s19 + $0x18] sm:$0xff] }
 0xc5e   : > { %10215 = vmatmul.mubr.msk.f32.vlgmr.msra.gmra.mxu1 %vm1984_vm5, %v9803_v52  ;;  %10222 = vmatprep.subr.mxu1 %v10526_v0 }
 0xc5f   : > { %10226 = vmatprep.mubr.msk.f32.mxu1 %vm10536_vm11, %v10526_v0 }
 0xc60   : > { %v7985_v52 = vld [vmem:[%s12054_s3 + $0x8] sm:$0xff] }
 0xc66   : > { %v6633_v59 = vpop.permute.xlu0 %6632  ;;  %v6651_v63 = vpop.permute.xlu1 %6650 }
 0xc6a   : > { %v6646_v3 = vpop.permute.xlu0 %6645  ;;  %v6745_v18 = vpop.permute.xlu1 %6744 }
 0xd02   : > { %v5973_v33 = vpop.f32.mrf.mxu1 }
 0xd04   : > { %v10176_v29 = vpop.f32.mrf.mxu1 }
 0xd05   : > { %v7984_v29 = vld [vmem:[%s12054_s3] sm:$0xff] }
 0xd06   : > { %v6046_v31 = vpop.f32.mrf.mxu0 }
 0xd07   : > { %v6047_v13 = vadd.f32 %v6046_v31, %v5973_v33 }
 0xd08   : > { %v10181_v34 = vpop.f32.mrf.mxu0 }
 0xd0a   : > { %v6129_v35 = vpop.f32.mrf.mxu1 }
 0xd0b   : > { %v6133_v36 = vadd.f32 %v6129_v35, %v6047_v13 }
 0xd0c   : > { %v10186_v37 = vpop.f32.mrf.mxu1 }
 0xd0e   : > { %v6213_v38 = vpop.f32.mrf.mxu0 }
 0xd0f   : > { %v6217_v39 = vadd.f32 %v6213_v38, %v6133_v36  ;;  %v6289_v19 = vpop.f32.mrf.mxu1 }
 0xd10   : > { %v10191_v20 = vpop.f32.mrf.mxu0 }
 0xd11   : > { %v6293_v40 = vadd.f32 %v6289_v19, %v6217_v39  ;;  %v10196_v41 = vpop.f32.mrf.mxu1  ;;  %v9816_v39 = vld [vmem:[%s12036_s10 + $0xe0] sm:$0xff] }
 0xd12   : > { %v6373_v54 = vpop.f32.mrf.mxu0 }
 0xd13   : > { %v6377_v55 = vadd.f32 %v6373_v54, %v6293_v40  ;;  %v9815_v54 = vld [vmem:[%s12036_s10 + $0xd8] sm:$0xff] }
 0xd14   : > { %v10201_v44 = vpop.f32.mrf.mxu0 }
 0xd16   : > { %v6457_v45 = vpop.f32.mrf.mxu1 }
 0xd17   : > { %v6461_v51 = vadd.f32 %v6457_v45, %v6377_v55 }
 0xd18   : > { %v10206_v46 = vpop.f32.mrf.mxu1 }
 0xd19   : > { %v9819_v46 = vld [vmem:[%s12036_s10 + $0xe8] sm:$0xff] }
 0xd1a   : > { %v6541_v22 = vpop.f32.mrf.mxu0 }
 0xd1b   : > { %v6545_v56 = vadd.f32 %v6541_v22, %v6461_v51 }
 0xd1c   : > { %v10211_v53 = vpop.f32.mrf.mxu0 }
 0xd1e   : > { %v6625_v24 = vpop.f32.mrf.mxu1 }
 0xd1f   : > { %v6629_v58 = vadd.f32 %v6625_v24, %v6545_v56  ;;  %v9821_v56 = vld [vmem:[%s12036_s10 + $0xf0] sm:$0xff] }
 0xd20   : > { %v10216_v14 = vpop.f32.mrf.mxu1 }
 0xd21   : > { %v6635_v60 = vadd.f32 %v6633_v59, %v6629_v58  ;;  %v9825_v14 = vld [vmem:[%s12036_s10 + $0x100] sm:$0xff] }
 0xd23   : > { %v6636_v6 = vmax.f32 %v6635_v60, 0.0 }
 0xd25   : > { %10217 = vmatprep.subr.mxu0 %v6636_v6 }
 0xd26   : > { %10218 = vmatpush3.msra.mxu0 %v6636_v6 }
 0xd27   : > { %10220 = vmatmul.mubr.msk.f32.vlgmr.msra.gmra.mxu0 %vm1984_vm5, %v9806_v62  ;;  %10229 = vmatprep.subr.mxu0 %v10526_v0 }
 0xd28   : > { %10231 = vmatprep.mubr.msk.f32.mxu0 %vm10536_vm11, %v10526_v0 }
 0xde7   : > { %v10221_v8 = vpop.f32.mrf.mxu0 }
 0xde8   : > { %v6731_v48 = vadd.f32 %v10221_v8, %v6651_v63  ;;  %v9827_v63 = vld [vmem:[%s12036_s10 + $0x108] sm:$0xff] }
 0xde9   : > { %v6725_v4 = vpop.f32.mrf.mxu0 }
 0xdea   : > { %v11548_v5 = vadd.f32 %v6731_v48, %v5797_v2  ;;  %v6726_v32 = vadd.f32 %v6725_v4, %v6646_v3 }
 0xdec   : > { %v6737_v16 = vmax.f32 %v11548_v5, 0.0  ;;  %v11553_v1 = vadd.f32 %v6726_v32, %v5796_v23 }
 0xdee   : > { %v6736_v50 = vmax.f32 %v11553_v1, 0.0  ;;  %10223 = vmatpush3.msra.mxu1 %v6737_v16 }
 0xdef   : > { %10224 = vmatprep.subr.mxu1 %v10526_v0 }
 0xdf0   : > { %10225 = vmatpush3.msra.mxu1 %v6736_v50 }
 0xdf1   : > { %10227 = vmatmul.mubr.msk.f32.vlgmr.msra.gmra.mxu1 %vm1077_vm0, %v9811_v57  ;;  %10234 = vmatprep.subr.mxu1 %v10526_v0 }
 0xdf2   : > { %10236 = vmatprep.mubr.msk.f32.mxu1 %vm10536_vm11, %v10526_v0 }
 0xeb1   : > { %v6816_v2 = vpop.f32.mrf.mxu1 }
 0xeb2   : > { %v6817_v43 = vadd.f32 %v6816_v2, %v6745_v18 }
 0xeb3   : > { %v10228_v23 = vpop.f32.mrf.mxu1 }
 0xeb4   : > { %v11566_v21 = vmax.f32 %v6817_v43, 0.0  ;;  %v9831_v43 = vld [vmem:[%s12036_s10 + $0x118] sm:$0xff] }
 0xeb6   : > { %6837 = vrot.lane.b32.xlu1 %v11566_v21, %s12050_s12  ;;  %6834 = vrot.lane.b32.xlu0 %v11566_v21, %s12051_s13  ;;  %s12055_s13 = sld [smem:[#allocation14_spill]] }
 0xeb7   : > { %s12061_s12 = sld [smem:[#allocation17_spill]] }
 0xeba   : > { %6827 = vrot.lane.b32.xlu1 %v11566_v21, %s12052_s17  ;;  %6824 = vrot.lane.b32.xlu0 %v11566_v21, %s12053_s21  ;;  %s12056_s17 = sld [smem:[#allocation16_spill]] }
 0xebb   : > { %s12059_s21 = sld [smem:[#allocation15_spill]] }
 0xebc   : > { %v8074_v33 = vld [vmem:[%s12055_s13 + $0x8] sm:$0xff]  ;;  %v8073_v13 = vld [vmem:[%s12055_s13] sm:$0xff] }
 0xebe   : > { %6993 = vrot.lane.b32.xlu1 %v11566_v21, %s12038_s28  ;;  %6990 = vrot.lane.b32.xlu0 %v11566_v21, %s12039_s23  ;;  %s12063_s28 = sld [smem:[#allocation25_spill]] }
 0xebf   : > { %s12067_s23 = sld [smem:[#allocation20_spill]] }
 0xec0   : > { %v7785_v31 = vld [vmem:[%s12056_s17 + $0x8] sm:$0xff]  ;;  %v7784_v34 = vld [vmem:[%s12056_s17] sm:$0xff] }
 0xec2   : > { %7077 = vrot.lane.b32.xlu1 %v11566_v21, %s12040_s2  ;;  %7074 = vrot.lane.b32.xlu0 %v11566_v21, %s12041_s26  ;;  %s12062_s26 = sld [smem:[#allocation13_spill]] }
 0xec6   : > { %7237 = vrot.lane.b32.xlu1 %v11566_v21, %s12042_s1  ;;  %7234 = vrot.lane.b32.xlu0 %v11566_v21, %s12043_s11  ;;  %s10552_s11 = smov 64   ;;  %s1038_s1 = scalar_lea.vmem %s10733_s24, %s12069_s16 }
 0xeca   : > { %7321 = vrot.lane.b32.xlu1 %v11566_v21, %s12044_s0  ;;  %7318 = vrot.lane.b32.xlu0 %v11566_v21, %s12045_s5  ;;  %s12057_s5 = sld [smem:[#allocation24_spill]] }
 0xecb   : > { %s12064_s0 = sld [smem:[#allocation26_spill]] }
 0xece   : > { %7405 = vrot.lane.b32.xlu1 %v11566_v21, %s12046_s18  ;;  %7402 = vrot.lane.b32.xlu0 %v11566_v21, %s12047_s22  ;;  %s12065_s18 = sld [smem:[#allocation18_spill]] }
 0xecf   : > { %s12066_s22 = sld [smem:[#allocation19_spill]] }
 0xed0   : > { %v7693_v23 = vld [vmem:[%s12057_s5 + $0x78] sm:$0xff] }
 0xed2   : > { %7489 = vrot.lane.b32.xlu1 %v11566_v21, %s12048_s6  ;;  %7486 = vrot.lane.b32.xlu0 %v11566_v21, %s12049_s9  ;;  %s12058_s9 = sld [smem:[#allocation21_spill]] }
 0xed3   : > { %s12060_s6 = sld [smem:[#allocation23_spill]] }
 0xed6   : > { %7585 = vperm.xlu1 %10443, %v9835_v26   ;;  %7572 = vperm.xlu0 %10442, %v9814_v27   ;;  %v7691_v26 = vld [vmem:[%s12057_s5 + $0x68] sm:$0xff]  ;;  %v7690_v27 = vld [vmem:[%s12057_s5 + $0x60] sm:$0xff] }
 0xeda   : > { %7993 = vperm.xlu1 %10443, %v7985_v52   ;;  %7590 = vperm.xlu0 %10442, %v9836_v15   ;;  %v7689_v52 = vld [vmem:[%s12057_s5 + $0x58] sm:$0xff]  ;;  %v7688_v15 = vld [vmem:[%s12057_s5 + $0x50] sm:$0xff] }
 0xede   : > { %8082 = vperm.xlu1 %10443, %v8074_v33   ;;  %7988 = vperm.xlu0 %10442, %v7984_v29  }
 0xee2   : > { %7793 = vperm.xlu1 %10443, %v7785_v31   ;;  %8077 = vperm.xlu0 %10442, %v8073_v13  }
 0xee6   : > { %7788 = vperm.xlu0 %10442, %v7784_v34  }
 0xf28   : > { %v6838_v35 = vpop.permute.xlu1 %6837  ;;  %v6835_v36 = vpop.permute.xlu0 %6834 }
 0xf29   : > { %v6840_v37 = vsel %vm1984_vm5, %v6835_v36, %v6838_v35 }
 0xf2a   : > { %v6841_v38 = vmul.f32 %v11249_v42, %v6840_v37 }
 0xf2c   : > { %v6828_v19 = vpop.permute.xlu1 %6827  ;;  %10230 = vmatpush3.msra.mxu0 %v6841_v38  ;;  %v6825_v20 = vpop.permute.xlu0 %6824 }
 0xf2d   : > { %v6830_v40 = vsel %vm3944_vm12, %v6825_v20, %v6828_v19  ;;  %10232 = vmatmul.mubr.msk.f32.vlgmr.msra.gmra.mxu0 %vm1984_vm5, %v9816_v39  ;;  %10239 = vmatprep.subr.mxu0 %v10526_v0 }
 0xf2e   : > { %v6831_v41 = vmul.f32 %v11255_v47, %v6830_v40  ;;  %10241 = vmatprep.mubr.msk.f32.mxu0 %vm10536_vm11, %v10526_v0 }
 0xf30   : > { %v6994_v44 = vpop.permute.xlu1 %6993  ;;  %10235 = vmatpush3.msra.mxu1 %v6831_v41  ;;  %v6991_v42 = vpop.permute.xlu0 %6990 }
 0xf31   : > { %v6996_v55 = vsel %vm4125_vm13, %v6991_v42, %v6994_v44  ;;  %10244 = vmatprep.subr.mxu1 %v10526_v0  ;;  %10237 = vmatmul.mubr.msk.f32.vlgmr.msra.gmra.mxu1 %vm1984_vm5, %v9815_v54  ;;  %vm9314_vm13 = vcmask 322560  }
 0xf32   : > { %v6997_v45 = vmul.f32 %v11265_v49, %v6996_v55  ;;  %10246 = vmatprep.mubr.msk.f32.mxu1 %vm10536_vm11, %v10526_v0  ;;  %v9823_v49 = vld [vmem:[%s12036_s10 + $0xf8] sm:$0xff] }
 0xf34   : > { %v7078_v47 = vpop.permute.xlu1 %7077  ;;  %10240 = vmatpush3.msra.mxu0 %v6997_v45  ;;  %v7075_v51 = vpop.permute.xlu0 %7074 }
 0xf35   : > { %v7080_v22 = vsel %vm1378_vm4, %v7075_v51, %v7078_v47  ;;  %10249 = vmatprep.subr.mxu0 %v10526_v0  ;;  %10242 = vmatmul.mubr.msk.f32.vlgmr.msra.gmra.mxu0 %vm1984_vm5, %v9819_v46  ;;  %vm7698_vm4 = vcmask 523264  }
 0xf36   : > { %v7081_v53 = vmul.f32 %v11275_v61, %v7080_v22  ;;  %10250 = vmatpush3.msra.mxu0 %v11566_v21  ;;  %10251 = vmatprep.mubr.msk.f32.mxu0 %vm10536_vm11, %v10526_v0  ;;  %v7692_v21 = vld [vmem:[%s12057_s5 + $0x70] sm:$0xff] }
 0xf37   : > { %10259 = vmatprep.subr.mxu0 %v10526_v0 }
 0xf38   : > { %v7238_v24 = vpop.permute.xlu1 %7237  ;;  %10245 = vmatpush3.msra.mxu1 %v7081_v53  ;;  %v7235_v58 = vpop.permute.xlu0 %7234 }
 0xf39   : > { %v7240_v59 = vsel %vm4386_vm14, %v7235_v58, %v7238_v24  ;;  %10254 = vmatprep.subr.mxu1 %v10526_v0  ;;  %10247 = vmatmul.mubr.msk.f32.vlgmr.msra.gmra.mxu1 %vm1984_vm5, %v9821_v56 }
 0xf3a   : > { %v7241_v61 = vmul.f32 %v11285_v28, %v7240_v59  ;;  %10252 = vmatmul.mubr.msk.f32.vlgmr.msra.gmra.mxu0 %vm1984_vm5, %v9823_v49  ;;  %10256 = vmatprep.mubr.msk.f32.mxu1 %vm10536_vm11, %v10526_v0 }
 0xf3b   : > { %10261 = vmatprep.mubr.msk.f32.mxu0 %vm10536_vm11, %v10526_v0 }
 0xf3c   : > { %v7322_v60 = vpop.permute.xlu1 %7321  ;;  %10255 = vmatpush3.msra.mxu1 %v7241_v61  ;;  %v7319_v6 = vpop.permute.xlu0 %7318  ;;  %v9834_v61 = vld [vmem:[%s12037_s7 + $0x38] sm:$0xff] }
 0xf3d   : > { %v7324_v62 = vsel %vm4479_vm15, %v7319_v6, %v7322_v60  ;;  %10257 = vmatmul.mubr.msk.f32.vlgmr.msra.gmra.mxu1 %vm1984_vm5, %v9825_v14  ;;  %10264 = vmatprep.subr.mxu1 %v10526_v0  ;;  %v7686_v14 = vld [vmem:[%s12057_s5 + $0x40] sm:$0xff]  ;;  %v7685_v60 = vld [vmem:[%s12057_s5 + $0x38] sm:$0xff]  ;;  %v7684_v6 = vld [vmem:[%s12057_s5 + $0x30] sm:$0xff]  ;;  %vm9351_vm15 = vcmask 326656  }
 0xf3e   : > { %v7325_v28 = vmul.f32 %v11297_v17, %v7324_v62  ;;  %10266 = vmatprep.mubr.msk.f32.mxu1 %vm10536_vm11, %v10526_v0  ;;  %v9829_v17 = vld [vmem:[%s12036_s10 + $0x110] sm:$0xff]  ;;  %v7683_v62 = vld [vmem:[%s12057_s5 + $0x28] sm:$0xff] }
 0xf40   : > { %v7406_v8 = vpop.permute.xlu1 %7405  ;;  %10260 = vmatpush3.msra.mxu0 %v7325_v28  ;;  %v7403_v48 = vpop.permute.xlu0 %7402  ;;  %v7682_v28 = vld [vmem:[%s12057_s5 + $0x20] sm:$0xff] }
 0xf41   : > { %v7408_v3 = vsel %vm4572_vm2, %v7403_v48, %v7406_v8  ;;  %10262 = vmatmul.mubr.msk.f32.vlgmr.msra.gmra.mxu0 %vm1984_vm5, %v9827_v63  ;;  %10269 = vmatprep.subr.mxu0 %v10526_v0  ;;  %v7681_v63 = vld [vmem:[%s12057_s5 + $0x18] sm:$0xff]  ;;  %v7680_v8 = vld [vmem:[%s12057_s5 + $0x10] sm:$0xff]  ;;  %v7679_v48 = vld [vmem:[%s12057_s5 + $0x8] sm:$0xff] }
 0xf42   : > { %v7409_v4 = vmul.f32 %v11307_v25, %v7408_v3  ;;  %10271 = vmatprep.mubr.msk.f32.mxu0 %vm10536_vm11, %v10526_v0  ;;  %v9833_v25 = vld [vmem:[%s12037_s7 + $0x30] sm:$0xff]  ;;  %v7678_v3 = vld [vmem:[%s12057_s5] sm:$0xff] }
 0xf44   : > { %v7490_v32 = vpop.permute.xlu1 %7489  ;;  %10265 = vmatpush3.msra.mxu1 %v7409_v4  ;;  %v7487_v57 = vpop.permute.xlu0 %7486 }
 0xf45   : > { %v7492_v18 = vsel %vm4665_vm3, %v7487_v57, %v7490_v32  ;;  %10267 = vmatmul.mubr.msk.f32.vlgmr.msra.gmra.mxu1 %vm1984_vm5, %v9829_v17  ;;  %vm9429_vm3 = vcmask 31744  }
 0xf46   : > { %v7493_v2 = vmul.f32 %v11319_v30, %v7492_v18  ;;  %10276 = vmatprep.mubr.msk.f32.mxu1 %vm1984_vm5, %v9833_v25  ;;  %v7687_v30 = vld [vmem:[%s12057_s5 + $0x48] sm:$0xff] }
 0xf48   : > { %10270 = vmatpush3.msra.mxu0 %v7493_v2 }
 0xf49   : > { %10272 = vmatmul.mubr.msk.f32.vlgmr.msra.gmra.mxu0 %vm1984_vm5, %v9831_v43  ;;  %7721 = vmatprep.subr.mxu0 %v7693_v23 }
 0xf4a   : > { %7769 = vmatprep.mubr.f32.mxu0 %v10526_v0  ;;  %7722 = vmatpush1.msra.mxu0 %v7692_v21 }
 0xf4b   : > { %7723 = vmatprep.subr.mxu0 %v7691_v26 }
 0xf4c   : > { %7724 = vmatpush1.msra.mxu0 %v7690_v27 }
 0xf4d   : > { %7725 = vmatprep.subr.mxu0 %v7689_v52  ;;  %v7697_v52 = vld [vmem:[%s12058_s9 + $0x18] sm:$0xff] }
 0xf4e   : > { %7726 = vmatpush1.msra.mxu0 %v7688_v15  ;;  %v7695_v15 = vld [vmem:[%s12058_s9 + $0x8] sm:$0xff] }
 0xf4f   : > { %7727 = vmatprep.subr.mxu0 %v7687_v30 }
 0xf50   : > { %7728 = vmatpush1.msra.mxu0 %v7686_v14  ;;  %v8072_v14 = vld [vmem:[%s12062_s26 + $0x8] sm:$0xff] }
 0xf51   : > { %v7573_v49 = vpop.permute.xlu0 %7572  ;;  %7729 = vmatprep.subr.mxu0 %v7685_v60  ;;  %v7586_v17 = vpop.permute.xlu1 %7585  ;;  %v10551_v60 = vmov 1  }
 0xf52   : > { %7730 = vmatpush1.msra.mxu0 %v7684_v6  ;;  %10444 = vset.pattern.permute.xlu1 %v10551_v60 }
 0xf53   : > { %7731 = vmatprep.subr.mxu0 %v7683_v62  ;;  %10445 = vset.pattern.permute.xlu0 %v10551_v60 }
 0xf54   : > { %7732 = vmatpush1.msra.mxu0 %v7682_v28 }
 0xf55   : > { %7733 = vmatprep.subr.mxu0 %v7681_v63  ;;  %v7591_v32 = vpop.permute.xlu0 %7590 }
 0xf56   : > { %7734 = vmatpush1.msra.mxu0 %v7680_v8 }
 0xf57   : > { %7735 = vmatprep.subr.mxu0 %v7679_v48 }
 0xf58   : > { %7736 = vmatpush1.msra.mxu0 %v7678_v3 }
 0xfed   : > { %v6913_v33 = vpop.f32.mrf.mxu0 }
 0xfef   : > { %v10233_v29 = vpop.f32.mrf.mxu0 }
 0xff1   : > { %v6986_v31 = vpop.f32.mrf.mxu1 }
 0xff2   : > { %v6987_v13 = vadd.f32 %v6986_v31, %v6913_v33 }
 0xff3   : > { %v10238_v34 = vpop.f32.mrf.mxu1 }
 0xff4   : > { %v7783_v34 = vld [vmem:[%s12059_s21 + $0x8] sm:$0xff] }
 0xff5   : > { %v7069_v35 = vpop.f32.mrf.mxu0 }
 0xff6   : > { %v7073_v36 = vadd.f32 %v7069_v35, %v6987_v13  ;;  %v7782_v13 = vld [vmem:[%s12059_s21] sm:$0xff]  ;;  %v7983_v35 = vld [vmem:[%s12060_s6 + $0x38] sm:$0xff] }
 0xff7   : > { %v10243_v37 = vpop.f32.mrf.mxu0 }
 0xff8   : > { %v7982_v37 = vld [vmem:[%s12060_s6 + $0x30] sm:$0xff] }
 0xff9   : > { %v7153_v38 = vpop.f32.mrf.mxu1 }
 0xffa   : > { %v7157_v39 = vadd.f32 %v7153_v38, %v7073_v36  ;;  %v7229_v19 = vpop.f32.mrf.mxu0  ;;  %v7879_v36 = vld [vmem:[%s12061_s12] sm:$0xff]  ;;  %v7981_v38 = vld [vmem:[%s12060_s6 + $0x28] sm:$0xff] }
 0xffb   : > { %v10248_v20 = vpop.f32.mrf.mxu1 }
 0xffc   : > { %v7233_v40 = vadd.f32 %v7229_v19, %v7157_v39  ;;  %v10253_v41 = vpop.f32.mrf.mxu0  ;;  %v7880_v39 = vld [vmem:[%s12061_s12 + $0x8] sm:$0xff]  ;;  %v7980_v19 = vld [vmem:[%s12060_s6 + $0x20] sm:$0xff]  ;;  %v7979_v20 = vld [vmem:[%s12060_s6 + $0x18] sm:$0xff] }
 0xffd   : > { %v7313_v54 = vpop.f32.mrf.mxu1  ;;  %v7977_v41 = vld [vmem:[%s12060_s6 + $0x8] sm:$0xff] }
 0xffe   : > { %v7317_v42 = vadd.f32 %v7313_v54, %v7233_v40  ;;  %v7978_v40 = vld [vmem:[%s12060_s6 + $0x10] sm:$0xff]  ;;  %v7976_v54 = vld [vmem:[%s12060_s6] sm:$0xff] }
 0xfff   : > { %v10258_v44 = vpop.f32.mrf.mxu1 }
0x1000   : > { %v8071_v44 = vld [vmem:[%s12062_s26] sm:$0xff] }
0x1001   : > { %v7397_v55 = vpop.f32.mrf.mxu0 }
0x1002   : > { %v7401_v46 = vadd.f32 %v7397_v55, %v7317_v42 }
0x1003   : > { %v10263_v45 = vpop.f32.mrf.mxu0 }
0x1005   : > { %v7481_v47 = vpop.f32.mrf.mxu1 }
0x1006   : > { %v7485_v22 = vadd.f32 %v7481_v47, %v7401_v46 }
0x1007   : > { %v10268_v51 = vpop.f32.mrf.mxu1 }
0x1009   : > { %v7565_v53 = vpop.f32.mrf.mxu0 }
0x100a   : > { %v7569_v56 = vadd.f32 %v7565_v53, %v7485_v22 }
0x100b   : > { %v10273_v24 = vpop.f32.mrf.mxu0 }
0x100c   : > { %v7575_v58 = vadd.f32 %v7573_v49, %v7569_v56  ;;  %v7994_v56 = vpop.permute.xlu1 %7993 }
0x100e   : > { %v7576_v59 = vmax.f32 %v7575_v58, 0.0  ;;  %v7989_v58 = vpop.permute.xlu0 %7988 }
0x1010   : > { %10274 = vmatprep.subr.mxu1 %v7576_v59  ;;  %v8083_v6 = vpop.permute.xlu1 %8082 }
0x1011   : > { %10275 = vmatpush3.msra.mxu1 %v7576_v59 }
0x1012   : > { %10277 = vmatmul.mubr.msk.f32.vlgmr.msra.gmra.mxu1 %vm1984_vm5, %v9834_v61  ;;  %v8078_v63 = vpop.permute.xlu0 %8077  ;;  %vm8261_vm5 = vcmask 519168  }
0x1013   : > { %7866 = vmatprep.mubr.f32.mxu1 %v10526_v0 }
0x1014   : > { %v11754_v3 = vpop.permute.xlu1 %7793 }
0x10d2   : > { %v10278_v4 = vpop.f32.mrf.mxu1 }
0x10d3   : > { %v7671_v18 = vadd.f32 %v10278_v4, %v7591_v32  ;;  %v11756_v4 = vpop.permute.xlu0 %7788 }
0x10d4   : > { %v7665_v57 = vpop.f32.mrf.mxu1 }
0x10d5   : > { %v7666_v2 = vadd.f32 %v7665_v57, %v7586_v17  ;;  %v11691_v25 = vadd.f32 %v7671_v18, %v6737_v16  ;;  %v7694_v16 = vld [vmem:[%s12058_s9] sm:$0xff] }
0x10d7   : > { %v7674_v43 = vadd.f32 %v7666_v2, %v6736_v50  ;;  %v7677_v21 = vmax.f32 %v11691_v25, 0.0  ;;  %v7696_v50 = vld [vmem:[%s12058_s9 + $0x10] sm:$0xff] }
0x10d9   : > { %v7676_v23 = vmax.f32 %v7674_v43, 0.0 }
0x10db   : > { %9839 = vmatmul.mubr.msk.f32.vlgmr.msra.gmra.mxu0 %vm7698_vm4, %v7676_v23 }
0x10dc   : > { %7775 = vmatprep.mubr.f32.mxu0 %v10526_v0 }
0x10df   : > { %9840 = vmatmul.mubr.msk.f32.gmra.mxu0 %vm7698_vm4, %v7677_v21 }
0x10e0   : > { %10302 = vmatprep.mubr.msk.f32.mxu0 %vm1077_vm0, %v8071_v44 }
0x119b   : > { %v7771_v26 = vpop.f32.mrf.mxu0 }
0x119c   : > { %v7772_v31 = vadd.f32 %v7771_v26, %v7694_v16  ;;  %v11764_v26 = vld [vmem:[%s12063_s28] sm:$0xf] }
0x119d   : > { %v7773_v27 = vpop.f32.mrf.mxu0 }
0x119e   : > { %v7774_v29 = vadd.f32 %v7773_v27, %v7695_v15 }
0x119f   : > { %v7777_v1 = vpop.f32.mrf.mxu0 }
0x11a0   : > { %v7778_v33 = vadd.f32 %v7777_v1, %v7696_v50 }
0x11a1   : > { %v7779_v5 = vpop.f32.mrf.mxu0 }
0x11a2   : > { %v7780_v30 = vadd.f32 %v7779_v5, %v7697_v52  ;;  %v11778_v52 = vld [vmem:[%s12064_s0] ss:$0 sm:$0xff] }
0x11a4   : > { %7830 = vmatprep.subr.mxu1 %v7780_v30 }
0x11a5   : > { %7831 = vmatpush1.msra.mxu1 %v7778_v33 }
0x11a6   : > { %7832 = vmatprep.subr.mxu1 %v7774_v29 }
0x11a7   : > { %7833 = vmatpush1.msra.mxu1 %v7772_v31 }
0x11a8   : > { %9841 = vmatmul.mubr.msk.f32.vlgmr.msra.gmra.mxu1 %vm1077_vm0, %v7782_v13  ;;  %7927 = vmatprep.subr.mxu1 %v7780_v30 }
0x11a9   : > { %7928 = vmatpush1.msra.mxu1 %v7778_v33  ;;  %7872 = vmatprep.mubr.f32.mxu1 %v10526_v0  ;;  %v7882_v33 = vld [vmem:[%s12065_s18 + $0x8] sm:$0xff] }
0x11aa   : > { %7929 = vmatprep.subr.mxu1 %v7774_v29  ;;  %v10553_v29 = vmov 2  }
0x11ab   : > { %7930 = vmatpush1.msra.mxu1 %v7772_v31 }
0x11ac   : > { %9842 = vmatmul.mubr.msk.f32.gmra.mxu1 %vm1077_vm0, %v7783_v34  ;;  %10279 = vmatprep.subr.mxu1 %v7983_v35 }
0x11ad   : > { %7963 = vmatprep.mubr.f32.mxu1 %v10526_v0 }
0x11b0   : > { %9843 = vmatmul.mubr.msk.f32.vlgmr.msra.gmra.mxu1 %vm1077_vm0, %v7879_v36 }
0x11b1   : > { %10280 = vmatpush3.msra.mxu1 %v7983_v35  ;;  %7969 = vmatprep.mubr.f32.mxu1 %v10526_v0 }
0x11b2   : > { %10281 = vmatprep.subr.mxu1 %v7982_v37 }
0x11b3   : > { %10282 = vmatpush3.msra.mxu1 %v7982_v37  ;;  %v7881_v37 = vld [vmem:[%s12065_s18] sm:$0xff] }
0x11b4   : > { %10283 = vmatprep.subr.mxu1 %v7981_v38  ;;  %9844 = vmatmul.mubr.msk.f32.gmra.mxu1 %vm1077_vm0, %v7880_v39 }
0x11b5   : > { %10284 = vmatpush3.msra.mxu1 %v7981_v38  ;;  %10295 = vmatprep.mubr.msk.f32.mxu1 %vm7698_vm4, %v7676_v23  ;;  %v10554_v38 = vmov 3  }
0x11b6   : > { %10285 = vmatprep.subr.mxu1 %v7980_v19 }
0x11b7   : > { %10286 = vmatpush3.msra.mxu1 %v7980_v19 }
0x11b8   : > { %10287 = vmatprep.subr.mxu1 %v7979_v20 }
0x11b9   : > { %10288 = vmatpush3.msra.mxu1 %v7979_v20 }
0x11ba   : > { %10289 = vmatprep.subr.mxu1 %v7978_v40 }
0x11bb   : > { %10290 = vmatpush3.msra.mxu1 %v7978_v40 }
0x11bc   : > { %10291 = vmatprep.subr.mxu1 %v7977_v41 }
0x11bd   : > { %10292 = vmatpush3.msra.mxu1 %v7977_v41 }
0x11be   : > { %10293 = vmatprep.subr.mxu1 %v7976_v54 }
0x11bf   : > { %10294 = vmatpush3.msra.mxu1 %v7976_v54 }
0x11c0   : > { %10296 = vmatmul.mubr.msk.f32.vlgmr.msra.gmra.mxu1 %vm7698_vm4, %v7677_v21  ;;  %10319 = vmatprep.subr.mxu1 %v10526_v0 }
0x11c1   : > { %10323 = vmatprep.mubr.msk.f32.mxu1 %vm10536_vm11, %v10526_v0 }
0x1268   : > { %v7868_v42 = vpop.f32.mrf.mxu1 }
0x1269   : > { %v7869_v57 = vadd.f32 %v7868_v42, %v11756_v4 }
0x126a   : > { %v11727_v55 = vpop.f32.mrf.mxu1 }
0x126c   : > { %v7874_v45 = vpop.f32.mrf.mxu1 }
0x126d   : > { %v7875_v17 = vadd.f32 %v7874_v45, %v11754_v3 }
0x126e   : > { %v11729_v46 = vpop.f32.mrf.mxu1 }
0x1270   : > { %v11731_v47 = vpop.f32.mrf.mxu1 }
0x1272   : > { %v11733_v51 = vpop.f32.mrf.mxu1 }
0x1274   : > { %v11735_v22 = vpop.f32.mrf.mxu1 }
0x1276   : > { %v11737_v53 = vpop.f32.mrf.mxu1 }
0x1280   : > { %v10297_v49 = vpop.f32.mrf.mxu1 }
0x1281   : > { %v8068_v24 = vadd.f32 %v10297_v49, %v7994_v56 }
0x1282   : > { %v8062_v59 = vpop.f32.mrf.mxu1 }
0x1283   : > { %v8063_v61 = vadd.f32 %v8062_v59, %v7989_v58  ;;  %10298 = vmatprep.subr.mxu0 %v8068_v24 }
0x1284   : > { %10299 = vmatpush3.msra.mxu0 %v8068_v24  ;;  %v7877_v24 = vadd.f32 %v11729_v46, %v11754_v3 }
0x1285   : > { %10300 = vmatprep.subr.mxu0 %v8063_v61 }
0x1286   : > { %10301 = vmatpush3.msra.mxu0 %v8063_v61  ;;  %v7871_v61 = vadd.f32 %v11727_v55, %v11756_v4 }
0x1287   : > { %10303 = vmatmul.mubr.msk.f32.vlgmr.msra.gmra.mxu0 %vm1077_vm0, %v8072_v14  ;;  %10305 = vmatprep.subr.mxu0 %v10526_v0 }
0x1288   : > { %10309 = vmatprep.mubr.msk.f32.mxu0 %vm10536_vm11, %v10526_v0 }
0x1347   : > { %v10304_v62 = vpop.f32.mrf.mxu0 }
0x1348   : > { %v11744_v28 = vadd.f32 %v10304_v62, %v8083_v6 }
0x1349   : > { %v8157_v8 = vpop.f32.mrf.mxu0 }
0x134a   : > { %v11746_v48 = vadd.f32 %v8157_v8, %v8078_v63  ;;  %8366 = vperm.xlu1 %10444, %v11744_v28  }
0x134c   : > { %8362 = vperm.xlu0 %10445, %v11746_v48  }
0x134e   : > { %10446 = vset.pattern.permute.xlu1 %v10530_v7 }
0x134f   : > { %8175 = vperm.xlu1 %10446, %v11744_v28  }
0x1350   : > { %10447 = vset.pattern.permute.xlu0 %v10530_v7 }
0x1353   : > { %8170 = vperm.xlu1 %10446, %v11746_v48  }
0x13c5   : > { %v8367_v32 = vpop.permute.xlu1 %8366 }
0x13c6   : > { %v8370_v18 = vmul.f32 %v8367_v32, %v7875_v17 }
0x13c7   : > { %v8363_v2 = vpop.permute.xlu0 %8362 }
0x13c8   : > { %v8369_v43 = vmul.f32 %v8363_v2, %v7869_v57  ;;  %8375 = vrot.lane.b32.xlu0 %v8370_v18, %s10552_s11 }
0x13ca   : > { %v8176_v25 = vpop.permute.xlu1 %8175  ;;  %8373 = vrot.lane.b32.xlu1 %v8369_v43, %s10552_s11 }
0x13cb   : > { %v8179_v7 = vmul.f32 %v8176_v25, %v7875_v17 }
0x13cd   : > { %10306 = vmatpush3.msra.mxu0 %v8179_v7 }
0x13ce   : > { %v8171_v23 = vpop.permute.xlu1 %8170  ;;  %10307 = vmatprep.subr.mxu0 %v10526_v0 }
0x13cf   : > { %v8178_v21 = vmul.f32 %v8171_v23, %v7869_v57 }
0x13d1   : > { %10308 = vmatpush3.msra.mxu0 %v8178_v21 }
0x13d2   : > { %10310 = vmatmul.mubr.msk.f32.vlgmr.msra.gmra.mxu0 %vm1077_vm0, %v11764_v26  ;;  %10312 = vmatprep.subr.mxu0 %v10526_v0 }
0x13d3   : > { %10316 = vmatprep.mubr.msk.f32.mxu0 %vm10536_vm11, %v10526_v0 }
0x143a   : > { %v8376_v27 = vpop.permute.xlu0 %8375 }
0x143b   : > { %10320 = vmatpush3.msra.mxu1 %v8376_v27 }
0x143c   : > { %10321 = vmatprep.subr.mxu1 %v10526_v0  ;;  %v8374_v1 = vpop.permute.xlu1 %8373 }
0x143d   : > { %10322 = vmatpush3.msra.mxu1 %v8374_v1 }
0x143e   : > { %10324 = vmatmul.mubr.msk.f32.vlgmr.msra.gmra.mxu1 %vm1077_vm0, %v11764_v26  ;;  %10326 = vmatprep.subr.mxu1 %v10526_v0 }
0x143f   : > { %10330 = vmatprep.mubr.msk.f32.mxu1 %vm10536_vm11, %v10526_v0 }
0x1492   : > { %v8249_v50 = vpop.f32.mrf.mxu0 }
0x1493   : > { %v8253_v15 = vmul.f32 0.5, %v8249_v50 }
0x1494   : > { %v10311_v5 = vpop.f32.mrf.mxu0 }
0x1495   : > { %v8260_v16 = vadd.f32 %v11778_v52, %v8253_v15 }
0x1497   : > { %v8262_v30 = vsel %vm8261_vm5, %v8260_v16, -inf }
0x1498   : > { %8263 = vmax.xlane.f32.xlu0 %v8262_v30 }
0x14ae   : > { %7890 = vperm.xlu0 %10447, %v7882_v33  }
0x14b2   : > { %10449 = vset.pattern.permute.xlu0 %v10553_v29 }
0x14fe   : > { %v8445_v31 = vpop.f32.mrf.mxu1 }
0x14ff   : > { %v8449_v13 = vmul.f32 0.5, %v8445_v31 }
0x1500   : > { %v10325_v34 = vpop.f32.mrf.mxu1 }
0x1501   : > { %v8450_v35 = vadd.f32 %v11778_v52, %v8449_v13 }
0x1503   : > { %v8451_v36 = vsel %vm8261_vm5, %v8450_v35, -inf }
0x1504   : > { %8452 = vmax.xlane.f32.xlu1 %v8451_v36 }
0x1515   : > { %7885 = vperm.xlu1 %10446, %v7881_v37  }
0x1519   : > { %10448 = vset.pattern.permute.xlu1 %v10554_v38 }
0x151a   : > { %8736 = vperm.xlu1 %10448, %v11744_v28  }
0x151e   : > { %8732 = vperm.xlu1 %10448, %v11746_v48  }
0x1521   : > { %v8264_v39 = vpop.xlane.xlu0 %8263 }
0x1522   : > { %10450 = vset.pattern.permute.xlu1 %v10553_v29  ;;  %v8265_v40 = vsub.f32 %v8260_v16, %v8264_v39 }
0x1524   : > { %v8266_v41 = vmul.f32 1.442695, %v8265_v40 }
0x1526   : > { %10456 = vpow2.f32 %v8266_v41 }
0x1529   : > { %v7891_v19 = vpop.permute.xlu0 %7890 }
0x152a   : > { %v7972_v20 = vadd.f32 %v11735_v22, %v7891_v19  ;;  %v11815_v32 = vadd.f32 %v11737_v53, %v7891_v19 }
0x152c   : > { %8464 = vrot.lane.b32.xlu1 %v7972_v20, %s10552_s11  ;;  %10313 = vmatpush3.xpose.msk.msra.mxu0 %vm7698_vm4, %v7972_v20 }
0x152d   : > { %10314 = vmatprep.subr.mxu0 %v10526_v0 }
0x1533   : > { %v10457_v54 = vpop.eup %10456 }
0x1534   : > { %v8268_v44 = vsel %vm8261_vm5, %v10457_v54, 0.0 }
0x1550   : > { %8269 = vadd.xlane.f32.xlu1 %v8268_v44 }
0x1561   : > { %8552 = vperm.xlu1 %10450, %v11746_v48  }
0x158d   : > { %v8453_v42 = vpop.xlane.xlu1 %8452 }
0x158e   : > { %v8454_v45 = vsub.f32 %v8450_v35, %v8453_v42 }
0x1590   : > { %v8455_v56 = vmul.f32 1.442695, %v8454_v45 }
0x1591   : > { %v7886_v49 = vpop.permute.xlu1 %7885 }
0x1592   : > { %10458 = vpow2.f32 %v8455_v56  ;;  %v7966_v22 = vadd.f32 %v11731_v47, %v7886_v49  ;;  %v7968_v53 = vadd.f32 %v11733_v51, %v7886_v49 }
0x1594   : > { %8462 = vrot.lane.b32.xlu1 %v7966_v22, %s10552_s11  ;;  %10315 = vmatpush3.xpose.msk.msra.mxu0 %vm7698_vm4, %v7966_v22 }
0x1595   : > { %v8737_v58 = vpop.permute.xlu1 %8736  ;;  %10333 = vmatprep.subr.mxu0 %v10526_v0 }
0x1596   : > { %v8740_v59 = vmul.f32 %v8737_v58, %v7877_v24 }
0x1598   : > { %8745 = vrot.lane.b32.xlu1 %v8740_v59, %s10552_s11 }
0x1599   : > { %v8733_v14 = vpop.permute.xlu1 %8732 }
0x159a   : > { %v8739_v60 = vmul.f32 %v8733_v14, %v7871_v61 }
0x159c   : > { %8743 = vrot.lane.b32.xlu1 %v8739_v60, %s10552_s11 }
0x159e   : > { %v8465_v47 = vpop.permute.xlu1 %8464 }
0x159f   : > { %v10459_v6 = vpop.eup %10458  ;;  %10327 = vmatpush3.xpose.msk.msra.mxu1 %vm7698_vm4, %v8465_v47 }
0x15a0   : > { %v8457_v46 = vsel %vm8261_vm5, %v10459_v6, 0.0  ;;  %10328 = vmatprep.subr.mxu1 %v10526_v0 }
0x15a1   : > { %8458 = vadd.xlane.f32.xlu0 %v8457_v46 }
0x15b7   : > { %8556 = vperm.xlu0 %10449, %v11744_v28  }
0x15bb   : > { %10451 = vset.pattern.permute.xlu0 %v10554_v38 }
0x15d9   : > { %v8270_v62 = vpop.xlane.xlu1 %8269 }
0x15da   : > { %10460 = vrcp.f32 %v8270_v62 }
0x15dd   : > { %v8553_v8 = vpop.permute.xlu1 %8552 }
0x15de   : > { %v8559_v17 = vmul.f32 %v8553_v8, %v7871_v61 }
0x15e7   : > { %v10461_v55 = vpop.eup %10460 }
0x15e8   : > { %v8272_v63 = vmul.f32 %v10461_v55, %v10457_v54 }
0x15ea   : > { %10317 = vmatmul.mubr.msk.f32.vlgmr.msra.gmra.mxu0 %vm7698_vm4, %v8272_v63 }
0x15eb   : > { %10337 = vmatprep.mubr.msk.f32.mxu0 %vm10536_vm11, %v10526_v0 }
0x1606   : > { %v8463_v48 = vpop.permute.xlu1 %8462 }
0x1607   : > { %10329 = vmatpush3.xpose.msk.msra.mxu1 %vm7698_vm4, %v8463_v48 }
0x1608   : > { %10347 = vmatprep.subr.mxu1 %v10526_v0 }
0x160a   : > { %v8746_v57 = vpop.permute.xlu1 %8745 }
0x160e   : > { %v8744_v43 = vpop.permute.xlu1 %8743 }
0x162a   : > { %v8459_v3 = vpop.xlane.xlu0 %8458 }
0x162b   : > { %10462 = vrcp.f32 %v8459_v3 }
0x1632   : > { %v8557_v4 = vpop.permute.xlu0 %8556 }
0x1633   : > { %v8560_v28 = vmul.f32 %v8557_v4, %v7877_v24  ;;  %v8931_v4 = vld [vmem:[%s12066_s22 + $0x28] sm:$0xff] }
0x1635   : > { %10334 = vmatpush3.msra.mxu0 %v8560_v28  ;;  %v8930_v28 = vld [vmem:[%s12066_s22 + $0x20] sm:$0xff] }
0x1636   : > { %10335 = vmatprep.subr.mxu0 %v10526_v0 }
0x1637   : > { %10336 = vmatpush3.msra.mxu0 %v8559_v17  ;;  %v8927_v17 = vld [vmem:[%s12066_s22 + $0x8] sm:$0xff] }
0x1638   : > { %v10463_v18 = vpop.eup %10462  ;;  %10338 = vmatmul.mubr.msk.f32.vlgmr.msra.gmra.mxu0 %vm1077_vm0, %v11764_v26  ;;  %10340 = vmatprep.subr.mxu0 %v10526_v0 }
0x1639   : > { %10341 = vmatpush3.xpose.msk.msra.mxu0 %vm7698_vm4, %v11815_v32  ;;  %v8461_v2 = vmul.f32 %v10463_v18, %v10459_v6  ;;  %10344 = vmatprep.mubr.msk.f32.mxu0 %vm10536_vm11, %v10526_v0 }
0x163a   : > { %10342 = vmatprep.subr.mxu0 %v10526_v0 }
0x163b   : > { %10331 = vmatmul.mubr.msk.f32.vlgmr.msra.gmra.mxu1 %vm7698_vm4, %v8461_v2 }
0x163c   : > { %10348 = vmatpush3.msra.mxu1 %v8746_v57  ;;  %10351 = vmatprep.mubr.msk.f32.mxu1 %vm10536_vm11, %v10526_v0  ;;  %v8933_v57 = vld [vmem:[%s12066_s22 + $0x38] sm:$0xff] }
0x163d   : > { %10349 = vmatprep.subr.mxu1 %v10526_v0  ;;  %10343 = vmatpush3.xpose.msk.msra.mxu0 %vm7698_vm4, %v7968_v53 }
0x163e   : > { %10350 = vmatpush3.msra.mxu1 %v8744_v43  ;;  %8987 = vmatprep.subr.mxu0 %v8931_v4 }
0x163f   : > { %10352 = vmatmul.mubr.msk.f32.vlgmr.msra.gmra.mxu1 %vm1077_vm0, %v11764_v26  ;;  %10354 = vmatprep.subr.mxu1 %v10526_v0 }
0x1640   : > { %10358 = vmatprep.mubr.msk.f32.mxu1 %vm10536_vm11, %v10526_v0 }
0x16aa   : > { %v8348_v51 = vpop.f32.mrf.mxu0 }
0x16ab   : > { %v8352_v7 = vmul.f32 %v8348_v51, %v11764_v26 }
0x16ac   : > { %v10318_v25 = vpop.f32.mrf.mxu0 }
0x16ad   : > { %v8354_v23 = vsel %vm8353_vm6, %v8352_v7, 0.0 }
0x16ae   : > { %v8355_v21 = vrot.slane %v8354_v23, 4 }
0x16b0   : > { %v8356_v1 = vadd.f32 %v8355_v21, %v8354_v23 }
0x16b2   : > { %v8357_v33 = vrot.slane %v8356_v1, 2 }
0x16b4   : > { %v8358_v37 = vadd.f32 %v8357_v33, %v8356_v1 }
0x16b6   : > { %v8359_v41 = vrot.slane %v8358_v37, 1 }
0x16b8   : > { %v8360_v42 = vadd.f32 %v8359_v41, %v8358_v37  ;;  %v8928_v37 = vld [vmem:[%s12066_s22 + $0x10] sm:$0xff] }
0x16f8   : > { %v8627_v27 = vpop.f32.mrf.mxu0 }
0x16f9   : > { %v8631_v50 = vmul.f32 0.5, %v8627_v27 }
0x16fa   : > { %v10339_v15 = vpop.f32.mrf.mxu0 }
0x16fb   : > { %v8632_v5 = vadd.f32 %v11778_v52, %v8631_v50  ;;  %v8539_v16 = vpop.f32.mrf.mxu1 }
0x16fc   : > { %v8543_v30 = vmul.f32 %v8539_v16, %v11764_v26 }
0x16fd   : > { %v10332_v29 = vpop.f32.mrf.mxu1  ;;  %v8633_v31 = vsel %vm8261_vm5, %v8632_v5, -inf }
0x16fe   : > { %v8544_v13 = vsel %vm8353_vm6, %v8543_v30, 0.0  ;;  %8634 = vmax.xlane.f32.xlu1 %v8633_v31 }
0x16ff   : > { %v8545_v34 = vrot.slane %v8544_v13, 4  ;;  %v8815_v35 = vpop.f32.mrf.mxu1 }
0x1700   : > { %v8819_v36 = vmul.f32 0.5, %v8815_v35  ;;  %v8932_v35 = vld [vmem:[%s12066_s22 + $0x30] sm:$0xff] }
0x1701   : > { %v8546_v38 = vadd.f32 %v8545_v34, %v8544_v13  ;;  %v10353_v39 = vpop.f32.mrf.mxu1 }
0x1702   : > { %v8820_v19 = vadd.f32 %v11778_v52, %v8819_v36  ;;  %v8929_v36 = vld [vmem:[%s12066_s22 + $0x18] sm:$0xff] }
0x1703   : > { %v8547_v20 = vrot.slane %v8546_v38, 2 }
0x1704   : > { %v8821_v40 = vsel %vm8261_vm5, %v8820_v19, -inf }
0x1705   : > { %v8548_v54 = vadd.f32 %v8547_v20, %v8546_v38  ;;  %8822 = vmax.xlane.f32.xlu0 %v8821_v40  ;;  %v8934_v38 = vld [vmem:[%s12067_s23] sm:$0xf]  ;;  %v8950_v40 = vsub.s32 3, %v10796_v10 }
0x1706   : > { %v8939_v39 = vrot.slane %v8934_v38, %v10799_v11  ;;  %v8943_v20 = vrot.slane %v8934_v38, %v10802_v12 }
0x1707   : > { %v8549_v44 = vrot.slane %v8548_v54, 1 }
0x1709   : > { %v8550_v45 = vadd.f32 %v8549_v44, %v8548_v54 }
0x170b   : > { %v11844_v56 = vsel %vm8921_vm7, %v8360_v42, %v8550_v45 }
0x171b   : > { %8832 = vrot.lane.b32.xlu0 %v7968_v53, %s10552_s11 }
0x1787   : > { %v8635_v49 = vpop.xlane.xlu1 %8634 }
0x1788   : > { %v8636_v22 = vsub.f32 %v8632_v5, %v8635_v49  ;;  %v8951_v49 = vrot.slane %v8934_v38, %v8950_v40  ;;  %v9154_v40 = vld [vmem:[%s10728_s4 + $0x8] sm:$0xff] }
0x178a   : > { %v8637_v24 = vmul.f32 1.442695, %v8636_v22 }
0x178c   : > { %10464 = vpow2.f32 %v8637_v24 }
0x178e   : > { %v8823_v58 = vpop.xlane.xlu0 %8822 }
0x178f   : > { %v8824_v52 = vsub.f32 %v8820_v19, %v8823_v58  ;;  %v8946_v19 = vsub.s32 2, %v10796_v10 }
0x1791   : > { %v8825_v59 = vmul.f32 1.442695, %v8824_v52  ;;  %v8947_v44 = vrot.slane %v8934_v38, %v8946_v19  ;;  %v9158_v38 = vld [vmem:[%s10728_s4 + $0x28] sm:$0xff]  ;;  %v9157_v19 = vld [vmem:[%s10728_s4 + $0x20] sm:$0xff] }
0x1792   : > { %v8833_v63 = vpop.permute.xlu0 %8832 }
0x1793   : > { %10466 = vpow2.f32 %v8825_v59 }
0x1799   : > { %v10465_v61 = vpop.eup %10464 }
0x179a   : > { %v8639_v14 = vsel %vm8261_vm5, %v10465_v61, 0.0 }
0x179b   : > { %8640 = vadd.xlane.f32.xlu1 %v8639_v14 }
0x17a0   : > { %v10467_v60 = vpop.eup %10466 }
0x17a1   : > { %v8827_v47 = vsel %vm8261_vm5, %v10467_v60, 0.0 }
0x17a2   : > { %8828 = vadd.xlane.f32.xlu1 %v8827_v47 }
0x17b3   : > { %8834 = vrot.lane.b32.xlu1 %v11815_v32, %s10552_s11  ;;  %v8926_v32 = vld [vmem:[%s12066_s22] sm:$0xff] }
0x1824   : > { %v8641_v6 = vpop.xlane.xlu1 %8640 }
0x1825   : > { %10468 = vrcp.f32 %v8641_v6 }
0x182b   : > { %v8829_v46 = vpop.xlane.xlu1 %8828 }
0x182c   : > { %10470 = vrcp.f32 %v8829_v46 }
0x182f   : > { %v8835_v62 = vpop.permute.xlu1 %8834 }
0x1830   : > { %10355 = vmatpush3.xpose.msk.msra.mxu1 %vm7698_vm4, %v8835_v62 }
0x1831   : > { %10356 = vmatprep.subr.mxu1 %v10526_v0 }
0x1832   : > { %v10469_v55 = vpop.eup %10468 }
0x1833   : > { %v8643_v8 = vmul.f32 %v10469_v55, %v10465_v61 }
0x1834   : > { %10357 = vmatpush3.xpose.msk.msra.mxu1 %vm7698_vm4, %v8833_v63 }
0x1835   : > { %10345 = vmatmul.mubr.msk.f32.vlgmr.msra.gmra.mxu0 %vm7698_vm4, %v8643_v8 }
0x1836   : > { %9023 = vmatprep.mubr.f32.mxu0 %v10526_v0  ;;  %8988 = vmatpush1.msra.mxu0 %v8930_v28 }
0x1837   : > { %8989 = vmatprep.subr.mxu0 %v8927_v17 }
0x1838   : > { %8990 = vmatpush1.msra.mxu0 %v8926_v32 }
0x1839   : > { %v10471_v48 = vpop.eup %10470  ;;  %9058 = vmatprep.subr.mxu0 %v8933_v57 }
0x183a   : > { %v8831_v3 = vmul.f32 %v10471_v48, %v10467_v60 }
0x183c   : > { %10359 = vmatmul.mubr.msk.f32.vlgmr.msra.gmra.mxu1 %vm7698_vm4, %v8831_v3  ;;  %vm9508_vm4 = vcmask 521216  }
0x18f5   : > { %v8719_v18 = vpop.f32.mrf.mxu0 }
0x18f6   : > { %v8723_v2 = vmul.f32 %v8719_v18, %v11764_v26 }
0x18f7   : > { %v10346_v53 = vpop.f32.mrf.mxu0 }
0x18f8   : > { %v8724_v43 = vsel %vm8353_vm6, %v8723_v2, 0.0 }
0x18f9   : > { %v8725_v51 = vrot.slane %v8724_v43, 4 }
0x18fb   : > { %v8726_v25 = vadd.f32 %v8725_v51, %v8724_v43 }
0x18fc   : > { %v8909_v7 = vpop.f32.mrf.mxu1 }
0x18fd   : > { %v8727_v23 = vrot.slane %v8726_v25, 2  ;;  %v8913_v21 = vmul.f32 %v8909_v7, %v11764_v26 }
0x18fe   : > { %v10360_v27 = vpop.f32.mrf.mxu1 }
0x18ff   : > { %v8728_v1 = vadd.f32 %v8727_v23, %v8726_v25  ;;  %v8914_v50 = vsel %vm8353_vm6, %v8913_v21, 0.0 }
0x1900   : > { %v8915_v15 = vrot.slane %v8914_v50, 4 }
0x1901   : > { %v8729_v16 = vrot.slane %v8728_v1, 1 }
0x1902   : > { %v8916_v5 = vadd.f32 %v8915_v15, %v8914_v50 }
0x1903   : > { %v8730_v29 = vadd.f32 %v8729_v16, %v8728_v1  ;;  %v9172_v16 = vld [vmem:[%s10728_s4 + $0x98] sm:$0xff] }
0x1904   : > { %v8917_v30 = vrot.slane %v8916_v5, 2 }
0x1905   : > { %v8924_v34 = vsel %vm8923_vm8, %v11844_v56, %v8730_v29  ;;  %v9166_v29 = vld [vmem:[%s10728_s4 + $0x68] sm:$0xff] }
0x1906   : > { %v8918_v33 = vadd.f32 %v8917_v30, %v8916_v5  ;;  %v9170_v5 = vld [vmem:[%s10728_s4 + $0x88] sm:$0xff]  ;;  %v9169_v30 = vld [vmem:[%s10728_s4 + $0x80] sm:$0xff] }
0x1907   : > { %9195 = vmatprep.subr.mxu1 %v9170_v5 }
0x1908   : > { %v8919_v31 = vrot.slane %v8918_v33, 1  ;;  %9196 = vmatpush1.xpose.msra.mxu1 %v9169_v30  ;;  %v9428_v30 = vld [vmem:[%s10718_s14] sm:$0xf] }
0x1909   : > { %9197 = vmatprep.subr.mxu1 %v9166_v29 }
0x190a   : > { %v8920_v13 = vadd.f32 %v8919_v31, %v8918_v33  ;;  %v9171_v33 = vld [vmem:[%s10728_s4 + $0x90] sm:$0xff]  ;;  %v9168_v31 = vld [vmem:[%s10728_s4 + $0x78] sm:$0xff] }
0x190c   : > { %v8925_v26 = vsel %vm1103_vm1, %v8924_v34, %v8920_v13  ;;  %vm9105_vm1 = vcmask 1043456   ;;  %v9165_v13 = vld [vmem:[%s10728_s4 + $0x60] sm:$0xff]  ;;  %v9167_v34 = vld [vmem:[%s10728_s4 + $0x70] sm:$0xff] }
0x190d   : > { %9866 = vmatmul.mubr.msk.f32.vlgmr.msra.gmra.mxu0 %vm1077_vm0, %v8925_v26  ;;  %9198 = vmatpush1.xpose.msra.mxu1 %v9165_v13 }
0x190e   : > { %9059 = vmatpush1.msra.mxu0 %v8932_v35  ;;  %9094 = vmatprep.mubr.f32.mxu0 %v10526_v0  ;;  %v9162_v35 = vld [vmem:[%s10728_s4 + $0x48] sm:$0xff] }
0x190f   : > { %9060 = vmatprep.subr.mxu0 %v8929_v36  ;;  %9199 = vmatprep.subr.mxu1 %v9162_v35  ;;  %v9161_v36 = vld [vmem:[%s10728_s4 + $0x40] sm:$0xff] }
0x1910   : > { %9061 = vmatpush1.msra.mxu0 %v8928_v37  ;;  %v9163_v37 = vld [vmem:[%s10728_s4 + $0x50] sm:$0xff] }
0x1911   : > { %9867 = vmatmul.mubr.msk.f32.vlgmr.msra.gmra.mxu0 %vm1077_vm0, %v8925_v26  ;;  %9265 = vmatprep.subr.mxu0 %v9172_v16  ;;  %v9164_v26 = vld [vmem:[%s10728_s4 + $0x58] sm:$0xff]  ;;  %v9350_v16 = vld [vmem:[%s10723_s20] sm:$0x3f] }
0x1912   : > { %9266 = vmatpush1.xpose.msra.mxu0 %v9171_v33  ;;  %9200 = vmatpush1.xpose.msra.mxu1 %v9161_v36 }
0x1913   : > { %9267 = vmatprep.subr.mxu0 %v9168_v31  ;;  %9201 = vmatprep.subr.mxu1 %v9158_v38 }
0x1916   : > { %9268 = vmatpush1.xpose.msra.mxu0 %v9167_v34  ;;  %9202 = vmatpush1.xpose.msra.mxu1 %v9157_v19 }
0x1917   : > { %9269 = vmatprep.subr.mxu0 %v9164_v26  ;;  %9203 = vmatprep.subr.mxu1 %v9154_v40 }
0x191a   : > { %9270 = vmatpush1.xpose.msra.mxu0 %v9163_v37 }
0x19cd   : > { %v9025_v41 = vpop.f32.mrf.mxu0 }
0x19ce   : > { %v9026_v54 = vadd.f32 %v9025_v41, %v8939_v39  ;;  %v9160_v39 = vld [vmem:[%s10728_s4 + $0x38] sm:$0xff] }
0x19cf   : > { %v9027_v42 = vpop.f32.mrf.mxu0  ;;  %9271 = vmatprep.subr.mxu0 %v9160_v39  ;;  %v9156_v41 = vld [vmem:[%s10728_s4 + $0x18] sm:$0xff] }
0x19d0   : > { %v9101_v45 = vmul.f32 %v9026_v54, %v9026_v54  ;;  %v9028_v56 = vadd.f32 %v9027_v42, %v8943_v20  ;;  %v9159_v20 = vld [vmem:[%s10728_s4 + $0x30] sm:$0xff] }
0x19d1   : > { %v9096_v22 = vpop.f32.mrf.mxu0  ;;  %9272 = vmatpush1.xpose.msra.mxu0 %v9159_v20 }
0x19d2   : > { %v9102_v24 = vmul.f32 %v9028_v56, %v9028_v56  ;;  %v9097_v58 = vadd.f32 %v9096_v22, %v8947_v44  ;;  %v9106_v11 = vsel %vm9105_vm1, %v9101_v45, 0.0  ;;  %9273 = vmatprep.subr.mxu0 %v9156_v41  ;;  %v9155_v44 = vld [vmem:[%s10728_s4 + $0x10] sm:$0xff] }
0x19d3   : > { %v9098_v52 = vpop.f32.mrf.mxu0 }
0x19d4   : > { %v9107_v59 = vsel %vm9105_vm1, %v9102_v24, 0.0  ;;  %v9103_v61 = vmul.f32 %v9097_v58, %v9097_v58  ;;  %v9099_v12 = vadd.f32 %v9098_v52, %v8951_v49 }
0x19d5   : > { %v9108_v14 = vadd.f32 %v9107_v59, %v9106_v11  ;;  %9274 = vmatpush1.xpose.msra.mxu0 %v9155_v44 }
0x19d6   : > { %v9109_v60 = vsel %vm9105_vm1, %v9103_v61, 0.0  ;;  %v9104_v47 = vmul.f32 %v9099_v12, %v9099_v12  ;;  %10366 = vmatprep.subr.mxu0 %v10526_v0 }
0x19d7   : > { %v9110_v6 = vadd.f32 %v9109_v60, %v9108_v14 }
0x19d8   : > { %v9111_v46 = vsel %vm9105_vm1, %v9104_v47, 0.0 }
0x19d9   : > { %v9112_v62 = vadd.f32 %v9111_v46, %v9110_v6 }
0x19db   : > { %9113 = vadd.xlane.f32.xlu1 %v9112_v62 }
0x1a64   : > { %v9114_v55 = vpop.xlane.xlu1 %9113 }
0x1a65   : > { %10472 = vrsqrt.f32 %v9114_v55  ;;  %vm9117_vm0 = vcmp.eq.f32.partialorder %v9114_v55, inf  ;;  %v9120_v48 = vand.u32 2147483648, %v9114_v55  ;;  %vm9119_vm9 = vcmp.eq.f32.partialorder %v9114_v55, 0.0 }
0x1a72   : > { %v10473_v63 = vpop.eup %10472 }
0x1a73   : > { %v9116_v8 = vmul.f32 %v10473_v63, %v9114_v55 }
0x1a75   : > { %v9118_v3 = vsel %vm9117_vm0, %v9114_v55, %v9116_v8 }
0x1a76   : > { %v9121_v4 = vsel %vm9119_vm9, %v9120_v48, %v9118_v3 }
0x1a77   : > { %v9122_v28 = vmax.f32 %v9121_v4, 1e-12 }
0x1a79   : > { %10474 = vrcp.f32 %v9122_v28 }
0x1a86   : > { %v10475_v17 = vpop.eup %10474 }
0x1a87   : > { %v11883_v32 = vmul.f32 %v10475_v17, %v9026_v54  ;;  %v11885_v57 = vmul.f32 %v10475_v17, %v9028_v56  ;;  %v11887_v18 = vmul.f32 %v10475_v17, %v9097_v58  ;;  %v11889_v2 = vmul.f32 %v10475_v17, %v9099_v12  ;;  %v9153_v54 = vld [vmem:[%s10728_s4] sm:$0xff] }
0x1a88   : > { %9204 = vmatpush1.xpose.msra.mxu1 %v9153_v54 }
0x1a89   : > { %v9128_v53 = vmul.f32 %v11883_v32, %v11883_v32  ;;  %v9129_v43 = vmul.f32 %v11885_v57, %v11885_v57  ;;  %v9130_v51 = vmul.f32 %v11887_v18, %v11887_v18  ;;  %v9131_v25 = vmul.f32 %v11889_v2, %v11889_v2  ;;  %10361 = vmatprep.subr.mxu1 %v10526_v0 }
0x1a8b   : > { %v9132_v7 = vsel %vm9105_vm1, %v9128_v53, 0.0  ;;  %v9133_v23 = vsel %vm9105_vm1, %v9129_v43, 0.0  ;;  %v9135_v27 = vsel %vm9105_vm1, %v9130_v51, 0.0  ;;  %v9137_v50 = vsel %vm9105_vm1, %v9131_v25, 0.0 }
0x1a8c   : > { %v9134_v21 = vadd.f32 %v9133_v23, %v9132_v7 }
0x1a8e   : > { %v9136_v1 = vadd.f32 %v9135_v27, %v9134_v21 }
0x1a90   : > { %v9138_v15 = vadd.f32 %v9137_v50, %v9136_v1 }
0x1a92   : > { %9139 = vadd.xlane.f32.xlu0 %v9138_v15 }
0x1b1b   : > { %v9140_v42 = vpop.xlane.xlu0 %9139 }
0x1b1c   : > { %10476 = vrsqrt.f32 %v9140_v42  ;;  %vm9143_vm10 = vcmp.eq.f32.partialorder %v9140_v42, inf  ;;  %v9146_v49 = vand.u32 2147483648, %v9140_v42  ;;  %vm9145_vm12 = vcmp.eq.f32.partialorder %v9140_v42, 0.0 }
0x1b29   : > { %v10477_v45 = vpop.eup %10476 }
0x1b2a   : > { %v9142_v56 = vmul.f32 %v10477_v45, %v9140_v42 }
0x1b2c   : > { %v9144_v22 = vsel %vm9143_vm10, %v9140_v42, %v9142_v56 }
0x1b2d   : > { %v9147_v24 = vsel %vm9145_vm12, %v9146_v49, %v9144_v22 }
0x1b2e   : > { %10478 = vrcp.f32 %v9147_v24 }
0x1b3b   : > { %v10479_v58 = vpop.eup %10478 }
0x1b3c   : > { %v9150_v52 = vmul.f32 %v10479_v58, %v11885_v57  ;;  %v9152_v11 = vmul.f32 %v10479_v58, %v11889_v2  ;;  %v9149_v59 = vmul.f32 %v10479_v58, %v11883_v32  ;;  %v9151_v61 = vmul.f32 %v10479_v58, %v11887_v18 }
0x1b3d   : > { %v9327_v57 = vand.u32 127, %v1055_v9 }
0x1b3e   : > { %9237 = vmatprep.mubr.f32.mxu1 %v9150_v52  ;;  %9307 = vmatprep.mubr.f32.mxu0 %v9152_v11 }
0x1b3f   : > { %9238 = vmatmul.mubr.f32.vlgmr.msra.gmra.mxu1 %v9149_v59  ;;  %9308 = vmatmul.mubr.f32.vlgmr.msra.gmra.mxu0 %v9151_v61 }
0x1b40   : > { %10363 = vmatprep.mubr.msk.f32.mxu1 %vm10536_vm11, %v10526_v0  ;;  %10368 = vmatprep.mubr.msk.f32.mxu0 %vm10536_vm11, %v10526_v0 }
0x1b41   : > { %10367 = vmatpush3.msk.msra.mxu0 %vm9105_vm1, %v9428_v30  ;;  %vm9530_vm1 = vcmask 516096  }
0x1bff   : > { %v9239_v12 = vpop.f32.mrf.mxu1  ;;  %v9309_v14 = vpop.f32.mrf.mxu0 }
0x1c00   : > { %v9310_v60 = vadd.f32 %v9309_v14, %v9239_v12 }
0x1c01   : > { %v9241_v47 = vpop.f32.mrf.mxu1  ;;  %v9311_v6 = vpop.f32.mrf.mxu0 }
0x1c02   : > { %v9313_v46 = vmul.f32 100.0, %v9310_v60 }
0x1c04   : > { %v9315_v62 = vsel %vm9314_vm13, %v9313_v46, -inf }
0x1c05   : > { %9316 = vmax.xlane.f32.xlu1 %v9315_v62 }
0x1c8e   : > { %v9317_v55 = vpop.xlane.xlu1 %9316 }
0x1c8f   : > { %v9318_v63 = vsub.f32 %v9313_v46, %v9317_v55 }
0x1c91   : > { %v9319_v8 = vmul.f32 1.442695, %v9318_v63 }
0x1c93   : > { %10480 = vpow2.f32 %v9319_v8 }
0x1ca0   : > { %v10481_v48 = vpop.eup %10480 }
0x1ca1   : > { %v9321_v3 = vsel %vm9314_vm13, %v10481_v48, 0.0 }
0x1ca2   : > { %9322 = vadd.xlane.f32.xlu1 %v9321_v3 }
0x1d2b   : > { %v9323_v4 = vpop.xlane.xlu1 %9322 }
0x1d2c   : > { %10482 = vrcp.f32 %v9323_v4 }
0x1d39   : > { %v10483_v28 = vpop.eup %10482 }
0x1d3a   : > { %v9325_v17 = vmul.f32 %v10483_v28, %v10481_v48 }
0x1d3c   : > { %v9328_v32 = vsel %vm9314_vm13, %v9325_v17, -inf }
0x1d3d   : > { %9329 = vmax.xlane.f32.xlu0 %v9328_v32 }
0x1dc6   : > { %v9330_v18 = vpop.xlane.xlu0 %9329 }
0x1dc7   : > { %vm9331_vm11 = vcmp.eq.f32.partialorder %v9325_v17, %v9330_v18 }
0x1dc8   : > { %v9332_v2 = vsel %vm9331_vm11, %v9327_v57, 40 }
0x1dc9   : > { %v9333_v53 = vsel %vm9314_vm13, %v9332_v2, 2147483647 }
0x1dca   : > { %v9335_v43 = vshra.s32 %v9333_v53, 16  ;;  %v9334_v25 = vand.u32 65535, %v9333_v53 }
0x1dcc   : > { %v9337_v51 = vcvt.s32.f32 %v9335_v43  ;;  %v9336_v23 = vcvt.s32.f32 %v9334_v25 }
0x1dce   : > { %9338 = vmin.xlane.f32.xlu1 %v9337_v51 }
0x1e57   : > { %v9339_v7 = vpop.xlane.xlu1 %9338 }
0x1e58   : > { %vm9340_vm14 = vcmp.eq.f32.partialorder %v9337_v51, %v9339_v7  ;;  %v9345_v27 = vcvt.f32.s32 %v9339_v7 }
0x1e59   : > { %v9341_v21 = vsel %vm9340_vm14, %v9336_v23, inf }
0x1e5a   : > { %9342 = vmin.xlane.f32.xlu0 %v9341_v21  ;;  %v9346_v50 = vshll.u32 %v9345_v27, 16 }
0x1ee3   : > { %v9343_v1 = vpop.xlane.xlu0 %9342 }
0x1ee4   : > { %v9344_v9 = vcvt.f32.s32 %v9343_v1 }
0x1ee6   : > { %v9347_v15 = vadd.s32 %v9346_v50, %v9344_v9 }
0x1ee8   : > { %vm9348_vm2 = vcmp.eq.s32.totalorder %v9327_v57, %v9347_v15 }
0x1ee9   : > { %v9349_v5 = vsel %vm9348_vm2, 1.0, %v10526_v0 }
0x1eea   : > { %10362 = vmatpush3.xpose.msk.msra.mxu1 %vm9351_vm15, %v9349_v5 }
0x1eed   : > { %10364 = vmatmul.mubr.msk.f32.vlgmr.msra.gmra.mxu1 %vm9351_vm15, %v9350_v16 }
0x1fad   : > { %v9424_v33 = vpop.f32.mrf.mxu1 }
0x1fae   : > { %10369 = vmatmul.mubr.msk.f32.vlgmr.msra.gmra.mxu0 %vm9429_vm3, %v9424_v33 }
0x1faf   : > { %v10365_v29 = vpop.f32.mrf.mxu1 }
0x206e   : > { %v9502_v31 = vpop.f32.mrf.mxu0 }
0x206f   : > { %v9509_v13 = vsel %vm9508_vm4, %v9502_v31, -inf }
0x2070   : > { %v9510_v34 = vrot.slane %v9509_v13, 4  ;;  %v10370_v35 = vpop.f32.mrf.mxu0 }
0x2072   : > { %v9511_v26 = vmax.f32 %v9509_v13, %v9510_v34 }
0x2074   : > { %v9512_v36 = vrot.slane %v9511_v26, 2 }
0x2076   : > { %v9513_v37 = vmax.f32 %v9511_v26, %v9512_v36 }
0x2078   : > { %v9514_v38 = vrot.slane %v9513_v37, 1 }
0x207a   : > { %v9515_v39 = vmax.f32 %v9513_v37, %v9514_v38 }
0x207c   : > { %vm9516_vm5 = vcmp.eq.f32.partialorder %v9502_v31, %v9515_v39 }
0x207d   : > { %v9517_v19 = vsel %vm9516_vm5, %v10796_v10, 6 }
0x207e   : > { %v9518_v20 = vsel %vm9508_vm4, %v9517_v19, 2147483647 }
0x207f   : > { %v9519_v40 = vrot.slane %v9518_v20, 4 }
0x2081   : > { %vm9520_vm6 = vcmp.lt.s32.totalorder %v9518_v20, %v9519_v40 }
0x2082   : > { %v9521_v41 = vsel %vm9520_vm6, %v9518_v20, %v9519_v40 }
0x2083   : > { %v9522_v54 = vrot.slane %v9521_v41, 2 }
0x2085   : > { %vm9523_vm7 = vcmp.lt.s32.totalorder %v9521_v41, %v9522_v54 }
0x2086   : > { %v9524_v44 = vsel %vm9523_vm7, %v9521_v41, %v9522_v54 }
0x2087   : > { %v9525_v42 = vrot.slane %v9524_v44, 1 }
0x2089   : > { %vm9526_vm8 = vcmp.lt.s32.totalorder %v9524_v44, %v9525_v42 }
0x208a   : > { %v9527_v45 = vsel %vm9526_vm8, %v9524_v44, %v9525_v42 }
0x208b   : > { %vm9528_vm0 = vcmp.gt.s32.totalorder %v9527_v45, 0 }
0x208c   : > { %v9529_v56 = vsel %vm9528_vm0, 0.044194173, %v10526_v0 }
0x208d   : > { %9531 = vst.msk [vmem:[%s1038_s1] sm:$0x1] %vm9530_vm1, %v9529_v56 }
0x208e PF: > { %s79_s15 = sadd.s32 1, %s10490_s15  }
0x208f   : > { %p76_p4 = scmp.ge.s32.totalorder %s79_s15, 4  }
0x2091   :  { %78 = sbr.rel (!%p76_p4) target bundleno = 61 (0x3d), region = 315 }

</bundles_post_ra>
